<compile_context>
chip_gen: v6e
topology: v6e:2x2x1
jax: 0.10.0
libtpu: 0.0.40
codegen_flags: <defaults>
</compile_context>

<pallas_src>
import math
import jax
import jax.numpy as jnp
from jax.experimental import pallas as pl
from jax.experimental.pallas import tpu as pltpu

# ----------------------------- config (small) -------------------------------
IMAGENET_MEAN = (0.485, 0.456, 0.406)
IMAGENET_STD = (0.229, 0.224, 0.225)

N_IMG = 2          # two images, each yields 1 tile (square => aspect ratio (1,1))
C_IN = 3
IMG = 32           # synthetic "input_size" (stands in for 448)
PATCH = 8
GRID = IMG // PATCH          # 4
T_VIT = GRID * GRID          # 16 tokens per image
VIT_D = 64
VIT_HEADS = 2
VIT_DH = VIT_D // VIT_HEADS  # 32
DOWNSAMPLE = 0.5             # InternVL pixel-shuffle ratio
D4 = int(VIT_D / (DOWNSAMPLE * DOWNSAMPLE))   # 256
T_VIS = int(T_VIT * DOWNSAMPLE * DOWNSAMPLE)  # 4 visual tokens per image
LLM_D = 128
LLM_HEADS = 4
LLM_DH = LLM_D // LLM_HEADS  # 32
FFN = 256
VOCAB = 64
N_PROMPT = 8
LANE = 128                   # lane-dense output width


# --------------------------- in-kernel helpers -------------------------------
def _f32(x):
    return x.astype(jnp.float32)


def _mm(a, w_bf16):
    """bf16 MXU matmul with f32 accumulation (a: f32/bf16 activations)."""
    return jnp.dot(a.astype(jnp.bfloat16), w_bf16,
                   preferred_element_type=jnp.float32)


def _layernorm(x, g, b, eps):
    mu = jnp.mean(x, axis=-1, keepdims=True)
    xc = x - mu
    var = jnp.mean(xc * xc, axis=-1, keepdims=True)
    return xc * jax.lax.rsqrt(var + eps) * _f32(g) + _f32(b)


def _rmsnorm(x, g, eps):
    var = jnp.mean(x * x, axis=-1, keepdims=True)
    return x * jax.lax.rsqrt(var + eps) * _f32(g)


def _sdpa(q, k, v, causal):
    """softmax attention for one head; q/k/v: (S, Dh) f32.
    Score / PV matmuls run with bf16 operands and f32 accumulation."""
    scale = 1.0 / math.sqrt(q.shape[-1])
    s = jax.lax.dot_general(q.astype(jnp.bfloat16), k.astype(jnp.bfloat16),
                            (((1,), (1,)), ((), ())),
                            preferred_element_type=jnp.float32) * scale
    if causal:
        row = jax.lax.broadcasted_iota(jnp.int32, s.shape, 0)
        col = jax.lax.broadcasted_iota(jnp.int32, s.shape, 1)
        s = jnp.where(col <= row, s, -1e30)        # mask applied in f32 only
    m = jnp.max(s, axis=-1, keepdims=True)
    p = jnp.exp(s - m)
    p = p * pl.reciprocal(jnp.sum(p, axis=-1, keepdims=True), approx=True)
    return jnp.dot(p.astype(jnp.bfloat16), v.astype(jnp.bfloat16),
                   preferred_element_type=jnp.float32)


def _mha(hn_b16, wqkv_h_ref, bqkv_h_ref, n_heads, seg_len, causal):
    """Multi-head attention from stacked per-head weights.

    hn_b16      : (S, D) bf16 normalized activations (S multiple of seg_len).
    wqkv_h_ref  : (3*n_heads, D, Dh) ref — rows [3h, 3h+1, 3h+2] = Wq/Wk/Wv of
                  head h (leading-dim indexing only, no in-kernel lane slicing).
    bqkv_h_ref  : (3*n_heads, 1, Dh) ref or None.
    Attention is applied independently per seg_len-row segment (per image for
    the ViT; whole sequence for the LLM).  Returns (S, n_heads*Dh) f32.
    """
    S = hn_b16.shape[0]
    outs = []
    for h in range(n_heads):
        def _proj(j, h=h):
            r = jnp.dot(hn_b16, wqkv_h_ref[3 * h + j],
                        preferred_element_type=jnp.float32)
            if bqkv_h_ref is not None:
                r = r + _f32(bqkv_h_ref[3 * h + j])
            return r
        q, k, v = _proj(0), _proj(1), _proj(2)
        segs = [_sdpa(q[s0:s0 + seg_len], k[s0:s0 + seg_len],
                      v[s0:s0 + seg_len], causal)
                for s0 in range(0, S, seg_len)]
        outs.append(segs[0] if len(segs) == 1 else jnp.concatenate(segs, axis=0))
    # one lane-concat, then a single (S,D)@(D,D) wo matmul in the caller
    return jnp.concatenate(outs, axis=-1)


# --------------------------- Pallas kernels ---------------------------------
def _vision_kernel(patches_ref, pos_ref, pe_w_ref, pe_b_ref,
                   ln1_g_ref, ln1_b_ref, wqkv_h_ref, bqkv_h_ref,
                   wo_ref, bo_ref, ln2_g_ref, ln2_b_ref,
                   w1_ref, b1_ref, w2_ref, b2_ref, o_ref):
    # Patch embedding (Conv2d(k=P, s=P) as matmul; the ImageNet normalize is
    # folded into pe_w / pe_b by prepare_params) + positional embedding.
    x = _mm(patches_ref[...], pe_w_ref[...]) + pe_b_ref[...] + _f32(pos_ref[...])

    # Pre-LN multi-head self-attention (non-causal, per-image segments).
    hn = _layernorm(x, ln1_g_ref[...], ln1_b_ref[...], 1e-6).astype(jnp.bfloat16)
    attn = _mha(hn, wqkv_h_ref, bqkv_h_ref, VIT_HEADS, T_VIT, causal=False)
    x = x + _mm(attn, wo_ref[...]) + _f32(bo_ref[...])

    # Pre-LN GELU MLP, fused into the same kernel.
    h = _layernorm(x, ln2_g_ref[...], ln2_b_ref[...], 1e-6)
    h = _mm(h, w1_ref[...]) + _f32(b1_ref[...])
    h = jax.nn.gelu(h, approximate=True)  # TODO(synk): exact erf GELU approximated by tanh form in-kernel.
    h = _mm(h, w2_ref[...]) + _f32(b2_ref[...])
    x = x + h

    # Lane-dense (128-wide) unmasked store; wrapper slices back to VIT_D.
    pad = jnp.zeros((x.shape[0], LANE - VIT_D), jnp.float32)
    o_ref[...] = jnp.concatenate([x, pad], axis=-1).astype(o_ref.dtype)
    # TODO(synk): real InternViT has a CLS token, layer-scale and 24-45 blocks.


def fused_vision_block(patches, kp):
    NT = patches.shape[0]
    cost = pl.CostEstimate(flops=4_063_232, transcendentals=9_216,
                           bytes_accessed=160_000)
    return pl.pallas_call(
        _vision_kernel,
        out_shape=jax.ShapeDtypeStruct((NT, LANE), jnp.bfloat16),
        compiler_params=pltpu.CompilerParams(vmem_limit_bytes=32 * 1024 * 1024),
        cost_estimate=cost,
    )(patches, kp["pos_tiled"], kp["pe_w"], kp["pe_b"],
      kp["v_ln1_g"], kp["v_ln1_b"], kp["v_wqkv_h"], kp["v_bqkv_h"],
      kp["v_wo"], kp["v_bo"], kp["v_ln2_g"], kp["v_ln2_b"],
      kp["v_w1"], kp["v_b1"], kp["v_w2"], kp["v_b2"])


def _proj_llm_kernel(vis_ref, prompt_ref,
                     mg_ref, mb_ref, mw1_ref, mb1_ref, mw2_ref, mb2_ref,
                     n1g_ref, wqkv_h_ref, wo_ref, n2g_ref, wgu_ref, wd_ref,
                     nfg_ref, lmh_ref, logits_ref):
    # mlp1 projector: LN -> Linear -> GELU -> Linear on pixel-shuffled features.
    hv = _layernorm(_f32(vis_ref[...]), mg_ref[...], mb_ref[...], 1e-5)
    hv = _mm(hv, mw1_ref[...]) + _f32(mb1_ref[...])
    hv = jax.nn.gelu(hv, approximate=True)
    hv = _mm(hv, mw2_ref[...]) + _f32(mb2_ref[...])              # (T_vis, LLM_D)

    # [visual tokens ; prompt embeddings] -> one InternLM2-style decoder block.
    x = jnp.concatenate([hv, _f32(prompt_ref[...])], axis=0)     # (S, LLM_D) f32

    # Attention sub-block: RMSNorm -> per-head QKV -> causal MHA -> wo -> res.
    hn = _rmsnorm(x, n1g_ref[...], 1e-6).astype(jnp.bfloat16)
    attn = _mha(hn, wqkv_h_ref, None, LLM_HEADS, x.shape[0], causal=True)
    x = x + _mm(attn, wo_ref[...])
    # TODO(synk): rotary position embedding omitted.

    # SwiGLU FFN with pre-fused gate|up weight (single wide MXU matmul).
    h = _rmsnorm(x, n2g_ref[...], 1e-6)
    gu = _mm(h, wgu_ref[...])                                    # (S, 2*FFN)
    h = jax.nn.silu(gu[:, :FFN]) * gu[:, FFN:]                   # 128-aligned slices
    x = x + _mm(h, wd_ref[...])

    # Final RMSNorm + lane-dense padded lm_head (VOCAB -> 128 columns).
    x = _rmsnorm(x, nfg_ref[...], 1e-6)
    logits_ref[...] = _mm(x, lmh_ref[...]).astype(logits_ref.dtype)
    # TODO(synk): HF tokenizer, chat template and autoregressive generation
    # (max_new_tokens=256) are not replicated; one greedy step stands in.


def fused_proj_llm(vis, prompt_emb, kp):
    S = vis.shape[0] + prompt_emb.shape[0]
    cost = pl.CostEstimate(flops=6_684_672, transcendentals=6_144,
                           bytes_accessed=473_088)
    return pl.pallas_call(
        _proj_llm_kernel,
        out_shape=jax.ShapeDtypeStruct((S, LANE), jnp.float32),
        compiler_params=pltpu.CompilerParams(vmem_limit_bytes=32 * 1024 * 1024),
        cost_estimate=cost,
    )(vis, prompt_emb, kp["m_ln_g"], kp["m_ln_b"], kp["m_w1"], kp["m_b1"],
      kp["m_w2"], kp["m_b2"], kp["l_n1_g"], kp["l_wqkv_h"], kp["l_wo"],
      kp["l_n2_g"], kp["l_wgu"], kp["l_wd"], kp["l_nf_g"], kp["lm_head_pad"])


# ------------------------------- parameters ---------------------------------
def init_params(key):
    keys = iter(jax.random.split(key, 64))

    def w(shape, scale=0.02):
        return (scale * jax.random.normal(next(keys), shape, jnp.float32)).astype(jnp.bfloat16)

    def ones(d):
        return jnp.ones((1, d), jnp.bfloat16)

    def zeros(shape):
        return jnp.zeros(shape, jnp.bfloat16)

    return {
        # vision: patch embedding (Conv2d(3, D, k=P, s=P) as matmul) + pos emb
        "pe_w": w((C_IN * PATCH * PATCH, VIT_D)), "pe_b": zeros((1, VIT_D)),
        "pos": w((1, T_VIT, VIT_D)),
        # single InternViT block
        "v_ln1_g": ones(VIT_D), "v_ln1_b": zeros((1, VIT_D)),
        "v_wqkv": w((VIT_D, 3 * VIT_D)), "v_bqkv": zeros((1, 3 * VIT_D)),
        "v_wo": w((VIT_D, VIT_D)), "v_bo": zeros((1, VIT_D)),
        "v_ln2_g": ones(VIT_D), "v_ln2_b": zeros((1, VIT_D)),
        "v_w1": w((VIT_D, 4 * VIT_D)), "v_b1": zeros((1, 4 * VIT_D)),
        "v_w2": w((4 * VIT_D, VIT_D)), "v_b2": zeros((1, VIT_D)),
        # mlp1 projector: LN -> Linear -> GELU -> Linear
        "m_ln_g": ones(D4), "m_ln_b": zeros((1, D4)),
        "m_w1": w((D4, LLM_D)), "m_b1": zeros((1, LLM_D)),
        "m_w2": w((LLM_D, LLM_D)), "m_b2": zeros((1, LLM_D)),
        # tiny InternLM2-style decoder (1 block) + lm_head
        "emb": w((VOCAB, LLM_D)),
        "l_n1_g": ones(LLM_D),
        "l_wqkv": w((LLM_D, 3 * LLM_D)),
        "l_wo": w((LLM_D, LLM_D)),
        "l_n2_g": ones(LLM_D),
        "l_wg": w((LLM_D, FFN)), "l_wu": w((LLM_D, FFN)), "l_wd": w((FFN, LLM_D)),
        "l_nf_g": ones(LLM_D),
        "lm_head": w((LLM_D, VOCAB)),
    }


def prepare_params(p):
    """One-time (outside jit) weight re-layout for the kernels:
    * fold the ImageNet normalize affine (1/std, -mean/std) into pe_w / pe_b
      (patch-embed is linear in the pixels),
    * split fused qkv weights into per-head stacks (3*H, D, Dh),
    * pre-concatenate SwiGLU gate|up,
    * pad lm_head to a lane-dense 128 columns,
    * pre-tile the positional embedding for both images.
    Exact mathematical re-parameterization — forward semantics are unchanged.
    """
    mean = jnp.asarray(IMAGENET_MEAN, jnp.float32)
    std = jnp.asarray(IMAGENET_STD, jnp.float32)
    pe_w = p["pe_w"].astype(jnp.float32).reshape(C_IN, PATCH * PATCH, VIT_D)
    pe_w_fold = (pe_w / std[:, None, None]).reshape(C_IN * PATCH * PATCH, VIT_D)
    pe_b_fold = (p["pe_b"].astype(jnp.float32)
                 - jnp.einsum("c,cd->d", mean / std, pe_w.sum(axis=1))[None, :])

    def split_heads(wqkv, d_model, n_heads, d_head):
        wr = wqkv.reshape(d_model, 3, n_heads, d_head)
        return jnp.transpose(wr, (2, 1, 0, 3)).reshape(3 * n_heads, d_model, d_head)

    v_bqkv_h = jnp.transpose(p["v_bqkv"].reshape(3, VIT_HEADS, VIT_DH),
                             (1, 0, 2)).reshape(3 * VIT_HEADS, 1, VIT_DH)

    return {
        "pos_tiled": jnp.tile(p["pos"].reshape(T_VIT, VIT_D), (N_IMG, 1)),
        "pe_w": pe_w_fold.astype(jnp.bfloat16),
        "pe_b": pe_b_fold,                                        # f32
        "v_ln1_g": p["v_ln1_g"], "v_ln1_b": p["v_ln1_b"],
        "v_wqkv_h": split_heads(p["v_wqkv"], VIT_D, VIT_HEADS, VIT_DH),
        "v_bqkv_h": v_bqkv_h,
        "v_wo": p["v_wo"], "v_bo": p["v_bo"],
        "v_ln2_g": p["v_ln2_g"], "v_ln2_b": p["v_ln2_b"],
        "v_w1": p["v_w1"], "v_b1": p["v_b1"],
        "v_w2": p["v_w2"], "v_b2": p["v_b2"],
        "m_ln_g": p["m_ln_g"], "m_ln_b": p["m_ln_b"],
        "m_w1": p["m_w1"], "m_b1": p["m_b1"],
        "m_w2": p["m_w2"], "m_b2": p["m_b2"],
        "emb": p["emb"],
        "l_n1_g": p["l_n1_g"],
        "l_wqkv_h": split_heads(p["l_wqkv"], LLM_D, LLM_HEADS, LLM_DH),
        "l_wo": p["l_wo"],
        "l_n2_g": p["l_n2_g"],
        "l_wgu": jnp.concatenate([p["l_wg"], p["l_wu"]], axis=1),
        "l_wd": p["l_wd"],
        "l_nf_g": p["l_nf_g"],
        "lm_head_pad": jnp.pad(p["lm_head"], ((0, 0), (0, LANE - VOCAB))),
    }


# ------------------------------- model glue ---------------------------------
def extract_patches(x):
    """(N, C, H, W) -> (N, T, C*P*P), matching Conv2d(k=P, s=P) flattening order."""
    N, C, H, W = x.shape
    x = x.reshape(N, C, GRID, PATCH, GRID, PATCH)
    x = x.transpose(0, 2, 4, 1, 3, 5)            # N, Gh, Gw, C, P, P
    return x.reshape(N, GRID * GRID, C * PATCH * PATCH)


def pixel_shuffle(x, scale_factor=0.5):
    """Exact InternVL pixel_shuffle (variable names follow the HF source; square grid here)."""
    n, w, h, c = x.shape
    x = x.reshape(n, w, int(h * scale_factor), int(c / scale_factor))
    x = x.transpose(0, 2, 1, 3)
    x = x.reshape(n, int(h * scale_factor), int(w * scale_factor),
                  int(c / (scale_factor * scale_factor)))
    x = x.transpose(0, 2, 1, 3)
    return x


def extract_feature(images, kp):
    """(folded normalize +) vision encoder -> pixel shuffle.  Returns (N*T_vis, D4)."""
    patches = extract_patches(images).reshape(N_IMG * T_VIT, C_IN * PATCH * PATCH)
    vit = fused_vision_block(patches, kp)[:, :VIT_D]             # (N*T, VIT_D)
    vit = vit.reshape(N_IMG, GRID, GRID, VIT_D)
    vit = pixel_shuffle(vit, DOWNSAMPLE)
    return vit.reshape(N_IMG * T_VIS, D4)


def internvl_forward(images, prompt_ids, kp):
    # load_image / dynamic_preprocess: square synthetic images => aspect ratio
    # (1,1), 1 tile per image, no thumbnail => num_patches_list = [1, 1].
    # T.Normalize + .to(bfloat16) is folded into the patch-embed weights.
    vis = extract_feature(images, kp)                            # (N*T_vis, D4)
    prompt_emb = jnp.take(kp["emb"], prompt_ids, axis=0)         # (N_PROMPT, LLM_D)
    logits = fused_proj_llm(vis, prompt_emb, kp)[:, :VOCAB]      # (S, VOCAB)
    next_token = jnp.argmax(logits[-1])
    return logits, next_token


# --------------------------------- main --------------------------------------
if __name__ == "__main__":
    key = jax.random.PRNGKey(0)
    k_img, _ = jax.random.split(key)
    # Two synthetic RGB images already in [0, 1] (ToTensor equivalent), NCHW.
    images = jax.random.uniform(k_img, (N_IMG, C_IN, IMG, IMG), jnp.float32)
    prompt_ids = (jnp.arange(N_PROMPT, dtype=jnp.int32) * 7 + 3) % VOCAB

    params = prepare_params(init_params(jax.random.PRNGKey(42)))

    fwd = jax.jit(internvl_forward)
    logits, next_token = fwd(images, prompt_ids, params)
    jax.block_until_ready((logits, next_token))

    assert logits.shape == (N_IMG * T_VIS + N_PROMPT, VOCAB)
    print("KERNEL_OK")
</pallas_src>

<mosaic_0001>
module attributes {stable_mosaic.version = 11 : i64} {
  func.func @_vision_kernel(%arg0: memref<32x192xf32, #tpu.memory_space<vmem>>, %arg1: memref<32x64xbf16, #tpu.memory_space<vmem>>, %arg2: memref<192x64xbf16, #tpu.memory_space<vmem>>, %arg3: memref<1x64xf32, #tpu.memory_space<vmem>>, %arg4: memref<1x64xbf16, #tpu.memory_space<vmem>>, %arg5: memref<1x64xbf16, #tpu.memory_space<vmem>>, %arg6: memref<6x64x32xbf16, #tpu.memory_space<vmem>>, %arg7: memref<6x1x32xbf16, #tpu.memory_space<vmem>>, %arg8: memref<64x64xbf16, #tpu.memory_space<vmem>>, %arg9: memref<1x64xbf16, #tpu.memory_space<vmem>>, %arg10: memref<1x64xbf16, #tpu.memory_space<vmem>>, %arg11: memref<1x64xbf16, #tpu.memory_space<vmem>>, %arg12: memref<64x256xbf16, #tpu.memory_space<vmem>>, %arg13: memref<1x256xbf16, #tpu.memory_space<vmem>>, %arg14: memref<256x64xbf16, #tpu.memory_space<vmem>>, %arg15: memref<1x64xbf16, #tpu.memory_space<vmem>>, %arg16: memref<32x128xbf16, #tpu.memory_space<vmem>>) attributes {dimension_semantics = [], scalar_prefetch = 0 : i64, scratch_operands = 0 : i64, tpu.core_type = #tpu.core_type<tc>} {
    %c0 = arith.constant 0 : index
    %c0_0 = arith.constant 0 : index
    %0 = vector.load %arg0[%c0, %c0_0] : memref<32x192xf32, #tpu.memory_space<vmem>>, vector<32x192xf32>
    %c0_1 = arith.constant 0 : index
    %c0_2 = arith.constant 0 : index
    %1 = vector.load %arg2[%c0_1, %c0_2] : memref<192x64xbf16, #tpu.memory_space<vmem>>, vector<192x64xbf16>
    %2 = arith.truncf %0 : vector<32x192xf32> to vector<32x192xbf16>
    %cst = arith.constant dense<0.000000e+00> : vector<32x64xf32>
    %3 = tpu.matmul %2, %1, %cst {dimension_numbers = #tpu.dot_dimension_numbers<[1], [0], [0], [1], [0, 0, 1, 1], [], []>} : vector<32x192xbf16>, vector<192x64xbf16>, vector<32x64xf32> -> vector<32x64xf32>
    %c0_3 = arith.constant 0 : index
    %c0_4 = arith.constant 0 : index
    %4 = vector.load %arg3[%c0_3, %c0_4] : memref<1x64xf32, #tpu.memory_space<vmem>>, vector<1x64xf32>
    %5 = vector.broadcast %4 : vector<1x64xf32> to vector<32x64xf32>
    %6 = arith.addf %3, %5 : vector<32x64xf32>
    %c0_5 = arith.constant 0 : index
    %c0_6 = arith.constant 0 : index
    %7 = vector.load %arg1[%c0_5, %c0_6] : memref<32x64xbf16, #tpu.memory_space<vmem>>, vector<32x64xbf16>
    %8 = arith.extf %7 : vector<32x64xbf16> to vector<32x64xf32>
    %9 = arith.addf %6, %8 : vector<32x64xf32>
    %c0_7 = arith.constant 0 : index
    %c0_8 = arith.constant 0 : index
    %10 = vector.load %arg4[%c0_7, %c0_8] : memref<1x64xbf16, #tpu.memory_space<vmem>>, vector<1x64xbf16>
    %c0_9 = arith.constant 0 : index
    %c0_10 = arith.constant 0 : index
    %11 = vector.load %arg5[%c0_9, %c0_10] : memref<1x64xbf16, #tpu.memory_space<vmem>>, vector<1x64xbf16>
    %cst_11 = arith.constant dense<0.000000e+00> : vector<32xf32>
    %12 = vector.multi_reduction <add>, %9, %cst_11 [1] : vector<32x64xf32> to vector<32xf32>
    %13 = vector.shape_cast %12 : vector<32xf32> to vector<32x1xf32>
    %cst_12 = arith.constant 6.400000e+01 : f32
    %14 = vector.broadcast %cst_12 : f32 to vector<32x1xf32>
    %15 = arith.divf %13, %14 : vector<32x1xf32>
    %16 = vector.broadcast %15 : vector<32x1xf32> to vector<32x64xf32>
    %17 = arith.subf %9, %16 : vector<32x64xf32>
    %18 = arith.mulf %17, %17 : vector<32x64xf32>
    %cst_13 = arith.constant dense<0.000000e+00> : vector<32xf32>
    %19 = vector.multi_reduction <add>, %18, %cst_13 [1] : vector<32x64xf32> to vector<32xf32>
    %20 = vector.shape_cast %19 : vector<32xf32> to vector<32x1xf32>
    %cst_14 = arith.constant 6.400000e+01 : f32
    %21 = vector.broadcast %cst_14 : f32 to vector<32x1xf32>
    %22 = arith.divf %20, %21 : vector<32x1xf32>
    %cst_15 = arith.constant 9.99999997E-7 : f32
    %23 = vector.broadcast %cst_15 : f32 to vector<32x1xf32>
    %24 = arith.addf %22, %23 : vector<32x1xf32>
    %25 = math.rsqrt %24 : vector<32x1xf32>
    %26 = vector.broadcast %25 : vector<32x1xf32> to vector<32x64xf32>
    %27 = arith.mulf %17, %26 : vector<32x64xf32>
    %28 = arith.extf %10 : vector<1x64xbf16> to vector<1x64xf32>
    %29 = vector.broadcast %28 : vector<1x64xf32> to vector<32x64xf32>
    %30 = arith.mulf %27, %29 : vector<32x64xf32>
    %31 = arith.extf %11 : vector<1x64xbf16> to vector<1x64xf32>
    %32 = vector.broadcast %31 : vector<1x64xf32> to vector<32x64xf32>
    %33 = arith.addf %30, %32 : vector<32x64xf32>
    %34 = arith.truncf %33 : vector<32x64xf32> to vector<32x64xbf16>
    %c0_16 = arith.constant 0 : index
    %c0_17 = arith.constant 0 : index
    %c0_18 = arith.constant 0 : index
    %35 = vector.load %arg6[%c0_16, %c0_17, %c0_18] : memref<6x64x32xbf16, #tpu.memory_space<vmem>>, vector<1x64x32xbf16>
    %36 = vector.shape_cast %35 : vector<1x64x32xbf16> to vector<64x32xbf16>
    %cst_19 = arith.constant dense<0.000000e+00> : vector<32x32xf32>
    %37 = tpu.matmul %34, %36, %cst_19 {dimension_numbers = #tpu.dot_dimension_numbers<[1], [0], [0], [1], [0, 0, 1, 1], [], []>} : vector<32x64xbf16>, vector<64x32xbf16>, vector<32x32xf32> -> vector<32x32xf32>
    %c0_20 = arith.constant 0 : index
    %c0_21 = arith.constant 0 : index
    %c0_22 = arith.constant 0 : index
    %38 = vector.load %arg7[%c0_20, %c0_21, %c0_22] : memref<6x1x32xbf16, #tpu.memory_space<vmem>>, vector<1x1x32xbf16>
    %39 = vector.shape_cast %38 : vector<1x1x32xbf16> to vector<1x32xbf16>
    %40 = arith.extf %39 : vector<1x32xbf16> to vector<1x32xf32>
    %41 = vector.broadcast %40 : vector<1x32xf32> to vector<32x32xf32>
    %42 = arith.addf %37, %41 : vector<32x32xf32>
    %c1 = arith.constant 1 : index
    %c0_23 = arith.constant 0 : index
    %c0_24 = arith.constant 0 : index
    %43 = vector.load %arg6[%c1, %c0_23, %c0_24] : memref<6x64x32xbf16, #tpu.memory_space<vmem>>, vector<1x64x32xbf16>
    %44 = vector.shape_cast %43 : vector<1x64x32xbf16> to vector<64x32xbf16>
    %cst_25 = arith.constant dense<0.000000e+00> : vector<32x32xf32>
    %45 = tpu.matmul %34, %44, %cst_25 {dimension_numbers = #tpu.dot_dimension_numbers<[1], [0], [0], [1], [0, 0, 1, 1], [], []>} : vector<32x64xbf16>, vector<64x32xbf16>, vector<32x32xf32> -> vector<32x32xf32>
    %c1_26 = arith.constant 1 : index
    %c0_27 = arith.constant 0 : index
    %c0_28 = arith.constant 0 : index
    %46 = vector.load %arg7[%c1_26, %c0_27, %c0_28] : memref<6x1x32xbf16, #tpu.memory_space<vmem>>, vector<1x1x32xbf16>
    %47 = vector.shape_cast %46 : vector<1x1x32xbf16> to vector<1x32xbf16>
    %48 = arith.extf %47 : vector<1x32xbf16> to vector<1x32xf32>
    %49 = vector.broadcast %48 : vector<1x32xf32> to vector<32x32xf32>
    %50 = arith.addf %45, %49 : vector<32x32xf32>
    %c2 = arith.constant 2 : index
    %c0_29 = arith.constant 0 : index
    %c0_30 = arith.constant 0 : index
    %51 = vector.load %arg6[%c2, %c0_29, %c0_30] : memref<6x64x32xbf16, #tpu.memory_space<vmem>>, vector<1x64x32xbf16>
    %52 = vector.shape_cast %51 : vector<1x64x32xbf16> to vector<64x32xbf16>
    %cst_31 = arith.constant dense<0.000000e+00> : vector<32x32xf32>
    %53 = tpu.matmul %34, %52, %cst_31 {dimension_numbers = #tpu.dot_dimension_numbers<[1], [0], [0], [1], [0, 0, 1, 1], [], []>} : vector<32x64xbf16>, vector<64x32xbf16>, vector<32x32xf32> -> vector<32x32xf32>
    %c2_32 = arith.constant 2 : index
    %c0_33 = arith.constant 0 : index
    %c0_34 = arith.constant 0 : index
    %54 = vector.load %arg7[%c2_32, %c0_33, %c0_34] : memref<6x1x32xbf16, #tpu.memory_space<vmem>>, vector<1x1x32xbf16>
    %55 = vector.shape_cast %54 : vector<1x1x32xbf16> to vector<1x32xbf16>
    %56 = arith.extf %55 : vector<1x32xbf16> to vector<1x32xf32>
    %57 = vector.broadcast %56 : vector<1x32xf32> to vector<32x32xf32>
    %58 = arith.addf %53, %57 : vector<32x32xf32>
    %59 = vector.extract_strided_slice %42 {offsets = [0, 0], sizes = [16, 32], strides = [1, 1]} : vector<32x32xf32> to vector<16x32xf32>
    %60 = vector.extract_strided_slice %50 {offsets = [0, 0], sizes = [16, 32], strides = [1, 1]} : vector<32x32xf32> to vector<16x32xf32>
    %61 = vector.extract_strided_slice %58 {offsets = [0, 0], sizes = [16, 32], strides = [1, 1]} : vector<32x32xf32> to vector<16x32xf32>
    %62 = arith.truncf %59 : vector<16x32xf32> to vector<16x32xbf16>
    %63 = arith.truncf %60 : vector<16x32xf32> to vector<16x32xbf16>
    %cst_35 = arith.constant dense<0.000000e+00> : vector<16x16xf32>
    %64 = tpu.matmul %62, %63, %cst_35 {dimension_numbers = #tpu.dot_dimension_numbers<[1], [1], [0], [0], [0, 0, 1, 0], [], []>} : vector<16x32xbf16>, vector<16x32xbf16>, vector<16x16xf32> -> vector<16x16xf32>
    %cst_36 = arith.constant 0.176776692 : f32
    %65 = vector.broadcast %cst_36 : f32 to vector<16x16xf32>
    %66 = arith.mulf %64, %65 : vector<16x16xf32>
    %cst_37 = arith.constant dense<0xFF800000> : vector<16xf32>
    %67 = vector.multi_reduction <maximumf>, %66, %cst_37 [1] : vector<16x16xf32> to vector<16xf32>
    %68 = vector.shape_cast %67 : vector<16xf32> to vector<16x1xf32>
    %69 = vector.broadcast %68 : vector<16x1xf32> to vector<16x16xf32>
    %70 = arith.subf %66, %69 : vector<16x16xf32>
    %71 = math.exp %70 : vector<16x16xf32>
    %cst_38 = arith.constant dense<0.000000e+00> : vector<16xf32>
    %72 = vector.multi_reduction <add>, %71, %cst_38 [1] : vector<16x16xf32> to vector<16xf32>
    %73 = vector.shape_cast %72 : vector<16xf32> to vector<16x1xf32>
    %74 = tpu.reciprocal %73 {approx = true} : vector<16x1xf32> -> vector<16x1xf32>
    %75 = vector.broadcast %74 : vector<16x1xf32> to vector<16x16xf32>
    %76 = arith.mulf %71, %75 : vector<16x16xf32>
    %77 = arith.truncf %76 : vector<16x16xf32> to vector<16x16xbf16>
    %78 = arith.truncf %61 : vector<16x32xf32> to vector<16x32xbf16>
    %cst_39 = arith.constant dense<0.000000e+00> : vector<16x32xf32>
    %79 = tpu.matmul %77, %78, %cst_39 {dimension_numbers = #tpu.dot_dimension_numbers<[1], [0], [0], [1], [0, 0, 1, 1], [], []>} : vector<16x16xbf16>, vector<16x32xbf16>, vector<16x32xf32> -> vector<16x32xf32>
    %80 = vector.extract_strided_slice %42 {offsets = [16, 0], sizes = [16, 32], strides = [1, 1]} : vector<32x32xf32> to vector<16x32xf32>
    %81 = vector.extract_strided_slice %50 {offsets = [16, 0], sizes = [16, 32], strides = [1, 1]} : vector<32x32xf32> to vector<16x32xf32>
    %82 = vector.extract_strided_slice %58 {offsets = [16, 0], sizes = [16, 32], strides = [1, 1]} : vector<32x32xf32> to vector<16x32xf32>
    %83 = arith.truncf %80 : vector<16x32xf32> to vector<16x32xbf16>
    %84 = arith.truncf %81 : vector<16x32xf32> to vector<16x32xbf16>
    %cst_40 = arith.constant dense<0.000000e+00> : vector<16x16xf32>
    %85 = tpu.matmul %83, %84, %cst_40 {dimension_numbers = #tpu.dot_dimension_numbers<[1], [1], [0], [0], [0, 0, 1, 0], [], []>} : vector<16x32xbf16>, vector<16x32xbf16>, vector<16x16xf32> -> vector<16x16xf32>
    %cst_41 = arith.constant 0.176776692 : f32
    %86 = vector.broadcast %cst_41 : f32 to vector<16x16xf32>
    %87 = arith.mulf %85, %86 : vector<16x16xf32>
    %cst_42 = arith.constant dense<0xFF800000> : vector<16xf32>
    %88 = vector.multi_reduction <maximumf>, %87, %cst_42 [1] : vector<16x16xf32> to vector<16xf32>
    %89 = vector.shape_cast %88 : vector<16xf32> to vector<16x1xf32>
    %90 = vector.broadcast %89 : vector<16x1xf32> to vector<16x16xf32>
    %91 = arith.subf %87, %90 : vector<16x16xf32>
    %92 = math.exp %91 : vector<16x16xf32>
    %cst_43 = arith.constant dense<0.000000e+00> : vector<16xf32>
    %93 = vector.multi_reduction <add>, %92, %cst_43 [1] : vector<16x16xf32> to vector<16xf32>
    %94 = vector.shape_cast %93 : vector<16xf32> to vector<16x1xf32>
    %95 = tpu.reciprocal %94 {approx = true} : vector<16x1xf32> -> vector<16x1xf32>
    %96 = vector.broadcast %95 : vector<16x1xf32> to vector<16x16xf32>
    %97 = arith.mulf %92, %96 : vector<16x16xf32>
    %98 = arith.truncf %97 : vector<16x16xf32> to vector<16x16xbf16>
    %99 = arith.truncf %82 : vector<16x32xf32> to vector<16x32xbf16>
    %cst_44 = arith.constant dense<0.000000e+00> : vector<16x32xf32>
    %100 = tpu.matmul %98, %99, %cst_44 {dimension_numbers = #tpu.dot_dimension_numbers<[1], [0], [0], [1], [0, 0, 1, 1], [], []>} : vector<16x16xbf16>, vector<16x32xbf16>, vector<16x32xf32> -> vector<16x32xf32>
    %101 = tpu.concatenate %79, %100 in 0 : vector<16x32xf32>, vector<16x32xf32> -> vector<32x32xf32>
    %c3 = arith.constant 3 : index
    %c0_45 = arith.constant 0 : index
    %c0_46 = arith.constant 0 : index
    %102 = vector.load %arg6[%c3, %c0_45, %c0_46] : memref<6x64x32xbf16, #tpu.memory_space<vmem>>, vector<1x64x32xbf16>
    %103 = vector.shape_cast %102 : vector<1x64x32xbf16> to vector<64x32xbf16>
    %cst_47 = arith.constant dense<0.000000e+00> : vector<32x32xf32>
    %104 = tpu.matmul %34, %103, %cst_47 {dimension_numbers = #tpu.dot_dimension_numbers<[1], [0], [0], [1], [0, 0, 1, 1], [], []>} : vector<32x64xbf16>, vector<64x32xbf16>, vector<32x32xf32> -> vector<32x32xf32>
    %c3_48 = arith.constant 3 : index
    %c0_49 = arith.constant 0 : index
    %c0_50 = arith.constant 0 : index
    %105 = vector.load %arg7[%c3_48, %c0_49, %c0_50] : memref<6x1x32xbf16, #tpu.memory_space<vmem>>, vector<1x1x32xbf16>
    %106 = vector.shape_cast %105 : vector<1x1x32xbf16> to vector<1x32xbf16>
    %107 = arith.extf %106 : vector<1x32xbf16> to vector<1x32xf32>
    %108 = vector.broadcast %107 : vector<1x32xf32> to vector<32x32xf32>
    %109 = arith.addf %104, %108 : vector<32x32xf32>
    %c4 = arith.constant 4 : index
    %c0_51 = arith.constant 0 : index
    %c0_52 = arith.constant 0 : index
    %110 = vector.load %arg6[%c4, %c0_51, %c0_52] : memref<6x64x32xbf16, #tpu.memory_space<vmem>>, vector<1x64x32xbf16>
    %111 = vector.shape_cast %110 : vector<1x64x32xbf16> to vector<64x32xbf16>
    %cst_53 = arith.constant dense<0.000000e+00> : vector<32x32xf32>
    %112 = tpu.matmul %34, %111, %cst_53 {dimension_numbers = #tpu.dot_dimension_numbers<[1], [0], [0], [1], [0, 0, 1, 1], [], []>} : vector<32x64xbf16>, vector<64x32xbf16>, vector<32x32xf32> -> vector<32x32xf32>
    %c4_54 = arith.constant 4 : index
    %c0_55 = arith.constant 0 : index
    %c0_56 = arith.constant 0 : index
    %113 = vector.load %arg7[%c4_54, %c0_55, %c0_56] : memref<6x1x32xbf16, #tpu.memory_space<vmem>>, vector<1x1x32xbf16>
    %114 = vector.shape_cast %113 : vector<1x1x32xbf16> to vector<1x32xbf16>
    %115 = arith.extf %114 : vector<1x32xbf16> to vector<1x32xf32>
    %116 = vector.broadcast %115 : vector<1x32xf32> to vector<32x32xf32>
    %117 = arith.addf %112, %116 : vector<32x32xf32>
    %c5 = arith.constant 5 : index
    %c0_57 = arith.constant 0 : index
    %c0_58 = arith.constant 0 : index
    %118 = vector.load %arg6[%c5, %c0_57, %c0_58] : memref<6x64x32xbf16, #tpu.memory_space<vmem>>, vector<1x64x32xbf16>
    %119 = vector.shape_cast %118 : vector<1x64x32xbf16> to vector<64x32xbf16>
    %cst_59 = arith.constant dense<0.000000e+00> : vector<32x32xf32>
    %120 = tpu.matmul %34, %119, %cst_59 {dimension_numbers = #tpu.dot_dimension_numbers<[1], [0], [0], [1], [0, 0, 1, 1], [], []>} : vector<32x64xbf16>, vector<64x32xbf16>, vector<32x32xf32> -> vector<32x32xf32>
    %c5_60 = arith.constant 5 : index
    %c0_61 = arith.constant 0 : index
    %c0_62 = arith.constant 0 : index
    %121 = vector.load %arg7[%c5_60, %c0_61, %c0_62] : memref<6x1x32xbf16, #tpu.memory_space<vmem>>, vector<1x1x32xbf16>
    %122 = vector.shape_cast %121 : vector<1x1x32xbf16> to vector<1x32xbf16>
    %123 = arith.extf %122 : vector<1x32xbf16> to vector<1x32xf32>
    %124 = vector.broadcast %123 : vector<1x32xf32> to vector<32x32xf32>
    %125 = arith.addf %120, %124 : vector<32x32xf32>
    %126 = vector.extract_strided_slice %109 {offsets = [0, 0], sizes = [16, 32], strides = [1, 1]} : vector<32x32xf32> to vector<16x32xf32>
    %127 = vector.extract_strided_slice %117 {offsets = [0, 0], sizes = [16, 32], strides = [1, 1]} : vector<32x32xf32> to vector<16x32xf32>
    %128 = vector.extract_strided_slice %125 {offsets = [0, 0], sizes = [16, 32], strides = [1, 1]} : vector<32x32xf32> to vector<16x32xf32>
    %129 = arith.truncf %126 : vector<16x32xf32> to vector<16x32xbf16>
    %130 = arith.truncf %127 : vector<16x32xf32> to vector<16x32xbf16>
    %cst_63 = arith.constant dense<0.000000e+00> : vector<16x16xf32>
    %131 = tpu.matmul %129, %130, %cst_63 {dimension_numbers = #tpu.dot_dimension_numbers<[1], [1], [0], [0], [0, 0, 1, 0], [], []>} : vector<16x32xbf16>, vector<16x32xbf16>, vector<16x16xf32> -> vector<16x16xf32>
    %cst_64 = arith.constant 0.176776692 : f32
    %132 = vector.broadcast %cst_64 : f32 to vector<16x16xf32>
    %133 = arith.mulf %131, %132 : vector<16x16xf32>
    %cst_65 = arith.constant dense<0xFF800000> : vector<16xf32>
    %134 = vector.multi_reduction <maximumf>, %133, %cst_65 [1] : vector<16x16xf32> to vector<16xf32>
    %135 = vector.shape_cast %134 : vector<16xf32> to vector<16x1xf32>
    %136 = vector.broadcast %135 : vector<16x1xf32> to vector<16x16xf32>
    %137 = arith.subf %133, %136 : vector<16x16xf32>
    %138 = math.exp %137 : vector<16x16xf32>
    %cst_66 = arith.constant dense<0.000000e+00> : vector<16xf32>
    %139 = vector.multi_reduction <add>, %138, %cst_66 [1] : vector<16x16xf32> to vector<16xf32>
    %140 = vector.shape_cast %139 : vector<16xf32> to vector<16x1xf32>
    %141 = tpu.reciprocal %140 {approx = true} : vector<16x1xf32> -> vector<16x1xf32>
    %142 = vector.broadcast %141 : vector<16x1xf32> to vector<16x16xf32>
    %143 = arith.mulf %138, %142 : vector<16x16xf32>
    %144 = arith.truncf %143 : vector<16x16xf32> to vector<16x16xbf16>
    %145 = arith.truncf %128 : vector<16x32xf32> to vector<16x32xbf16>
    %cst_67 = arith.constant dense<0.000000e+00> : vector<16x32xf32>
    %146 = tpu.matmul %144, %145, %cst_67 {dimension_numbers = #tpu.dot_dimension_numbers<[1], [0], [0], [1], [0, 0, 1, 1], [], []>} : vector<16x16xbf16>, vector<16x32xbf16>, vector<16x32xf32> -> vector<16x32xf32>
    %147 = vector.extract_strided_slice %109 {offsets = [16, 0], sizes = [16, 32], strides = [1, 1]} : vector<32x32xf32> to vector<16x32xf32>
    %148 = vector.extract_strided_slice %117 {offsets = [16, 0], sizes = [16, 32], strides = [1, 1]} : vector<32x32xf32> to vector<16x32xf32>
    %149 = vector.extract_strided_slice %125 {offsets = [16, 0], sizes = [16, 32], strides = [1, 1]} : vector<32x32xf32> to vector<16x32xf32>
    %150 = arith.truncf %147 : vector<16x32xf32> to vector<16x32xbf16>
    %151 = arith.truncf %148 : vector<16x32xf32> to vector<16x32xbf16>
    %cst_68 = arith.constant dense<0.000000e+00> : vector<16x16xf32>
    %152 = tpu.matmul %150, %151, %cst_68 {dimension_numbers = #tpu.dot_dimension_numbers<[1], [1], [0], [0], [0, 0, 1, 0], [], []>} : vector<16x32xbf16>, vector<16x32xbf16>, vector<16x16xf32> -> vector<16x16xf32>
    %cst_69 = arith.constant 0.176776692 : f32
    %153 = vector.broadcast %cst_69 : f32 to vector<16x16xf32>
    %154 = arith.mulf %152, %153 : vector<16x16xf32>
    %cst_70 = arith.constant dense<0xFF800000> : vector<16xf32>
    %155 = vector.multi_reduction <maximumf>, %154, %cst_70 [1] : vector<16x16xf32> to vector<16xf32>
    %156 = vector.shape_cast %155 : vector<16xf32> to vector<16x1xf32>
    %157 = vector.broadcast %156 : vector<16x1xf32> to vector<16x16xf32>
    %158 = arith.subf %154, %157 : vector<16x16xf32>
    %159 = math.exp %158 : vector<16x16xf32>
    %cst_71 = arith.constant dense<0.000000e+00> : vector<16xf32>
    %160 = vector.multi_reduction <add>, %159, %cst_71 [1] : vector<16x16xf32> to vector<16xf32>
    %161 = vector.shape_cast %160 : vector<16xf32> to vector<16x1xf32>
    %162 = tpu.reciprocal %161 {approx = true} : vector<16x1xf32> -> vector<16x1xf32>
    %163 = vector.broadcast %162 : vector<16x1xf32> to vector<16x16xf32>
    %164 = arith.mulf %159, %163 : vector<16x16xf32>
    %165 = arith.truncf %164 : vector<16x16xf32> to vector<16x16xbf16>
    %166 = arith.truncf %149 : vector<16x32xf32> to vector<16x32xbf16>
    %cst_72 = arith.constant dense<0.000000e+00> : vector<16x32xf32>
    %167 = tpu.matmul %165, %166, %cst_72 {dimension_numbers = #tpu.dot_dimension_numbers<[1], [0], [0], [1], [0, 0, 1, 1], [], []>} : vector<16x16xbf16>, vector<16x32xbf16>, vector<16x32xf32> -> vector<16x32xf32>
    %168 = tpu.concatenate %146, %167 in 0 : vector<16x32xf32>, vector<16x32xf32> -> vector<32x32xf32>
    %169 = tpu.concatenate %101, %168 in 1 : vector<32x32xf32>, vector<32x32xf32> -> vector<32x64xf32>
    %c0_73 = arith.constant 0 : index
    %c0_74 = arith.constant 0 : index
    %170 = vector.load %arg8[%c0_73, %c0_74] : memref<64x64xbf16, #tpu.memory_space<vmem>>, vector<64x64xbf16>
    %171 = arith.truncf %169 : vector<32x64xf32> to vector<32x64xbf16>
    %cst_75 = arith.constant dense<0.000000e+00> : vector<32x64xf32>
    %172 = tpu.matmul %171, %170, %cst_75 {dimension_numbers = #tpu.dot_dimension_numbers<[1], [0], [0], [1], [0, 0, 1, 1], [], []>} : vector<32x64xbf16>, vector<64x64xbf16>, vector<32x64xf32> -> vector<32x64xf32>
    %173 = arith.addf %9, %172 : vector<32x64xf32>
    %c0_76 = arith.constant 0 : index
    %c0_77 = arith.constant 0 : index
    %174 = vector.load %arg9[%c0_76, %c0_77] : memref<1x64xbf16, #tpu.memory_space<vmem>>, vector<1x64xbf16>
    %175 = arith.extf %174 : vector<1x64xbf16> to vector<1x64xf32>
    %176 = vector.broadcast %175 : vector<1x64xf32> to vector<32x64xf32>
    %177 = arith.addf %173, %176 : vector<32x64xf32>
    %c0_78 = arith.constant 0 : index
    %c0_79 = arith.constant 0 : index
    %178 = vector.load %arg10[%c0_78, %c0_79] : memref<1x64xbf16, #tpu.memory_space<vmem>>, vector<1x64xbf16>
    %c0_80 = arith.constant 0 : index
    %c0_81 = arith.constant 0 : index
    %179 = vector.load %arg11[%c0_80, %c0_81] : memref<1x64xbf16, #tpu.memory_space<vmem>>, vector<1x64xbf16>
    %cst_82 = arith.constant dense<0.000000e+00> : vector<32xf32>
    %180 = vector.multi_reduction <add>, %177, %cst_82 [1] : vector<32x64xf32> to vector<32xf32>
    %181 = vector.shape_cast %180 : vector<32xf32> to vector<32x1xf32>
    %cst_83 = arith.constant 6.400000e+01 : f32
    %182 = vector.broadcast %cst_83 : f32 to vector<32x1xf32>
    %183 = arith.divf %181, %182 : vector<32x1xf32>
    %184 = vector.broadcast %183 : vector<32x1xf32> to vector<32x64xf32>
    %185 = arith.subf %177, %184 : vector<32x64xf32>
    %186 = arith.mulf %185, %185 : vector<32x64xf32>
    %cst_84 = arith.constant dense<0.000000e+00> : vector<32xf32>
    %187 = vector.multi_reduction <add>, %186, %cst_84 [1] : vector<32x64xf32> to vector<32xf32>
    %188 = vector.shape_cast %187 : vector<32xf32> to vector<32x1xf32>
    %cst_85 = arith.constant 6.400000e+01 : f32
    %189 = vector.broadcast %cst_85 : f32 to vector<32x1xf32>
    %190 = arith.divf %188, %189 : vector<32x1xf32>
    %cst_86 = arith.constant 9.99999997E-7 : f32
    %191 = vector.broadcast %cst_86 : f32 to vector<32x1xf32>
    %192 = arith.addf %190, %191 : vector<32x1xf32>
    %193 = math.rsqrt %192 : vector<32x1xf32>
    %194 = vector.broadcast %193 : vector<32x1xf32> to vector<32x64xf32>
    %195 = arith.mulf %185, %194 : vector<32x64xf32>
    %196 = arith.extf %178 : vector<1x64xbf16> to vector<1x64xf32>
    %197 = vector.broadcast %196 : vector<1x64xf32> to vector<32x64xf32>
    %198 = arith.mulf %195, %197 : vector<32x64xf32>
    %199 = arith.extf %179 : vector<1x64xbf16> to vector<1x64xf32>
    %200 = vector.broadcast %199 : vector<1x64xf32> to vector<32x64xf32>
    %201 = arith.addf %198, %200 : vector<32x64xf32>
    %c0_87 = arith.constant 0 : index
    %c0_88 = arith.constant 0 : index
    %202 = vector.load %arg12[%c0_87, %c0_88] : memref<64x256xbf16, #tpu.memory_space<vmem>>, vector<64x256xbf16>
    %203 = arith.truncf %201 : vector<32x64xf32> to vector<32x64xbf16>
    %cst_89 = arith.constant dense<0.000000e+00> : vector<32x256xf32>
    %204 = tpu.matmul %203, %202, %cst_89 {dimension_numbers = #tpu.dot_dimension_numbers<[1], [0], [0], [1], [0, 0, 1, 1], [], []>} : vector<32x64xbf16>, vector<64x256xbf16>, vector<32x256xf32> -> vector<32x256xf32>
    %c0_90 = arith.constant 0 : index
    %c0_91 = arith.constant 0 : index
    %205 = vector.load %arg13[%c0_90, %c0_91] : memref<1x256xbf16, #tpu.memory_space<vmem>>, vector<1x256xbf16>
    %206 = arith.extf %205 : vector<1x256xbf16> to vector<1x256xf32>
    %207 = vector.broadcast %206 : vector<1x256xf32> to vector<32x256xf32>
    %208 = arith.addf %204, %207 : vector<32x256xf32>
    %209 = arith.mulf %208, %208 : vector<32x256xf32>
    %210 = arith.mulf %208, %209 : vector<32x256xf32>
    %cst_92 = arith.constant 4.471500e-02 : f32
    %211 = vector.broadcast %cst_92 : f32 to vector<32x256xf32>
    %212 = arith.mulf %211, %210 : vector<32x256xf32>
    %213 = arith.addf %208, %212 : vector<32x256xf32>
    %cst_93 = arith.constant 0.797884583 : f32
    %214 = vector.broadcast %cst_93 : f32 to vector<32x256xf32>
    %215 = arith.mulf %214, %213 : vector<32x256xf32>
    %216 = math.tanh %215 : vector<32x256xf32>
    %cst_94 = arith.constant 1.000000e+00 : f32
    %217 = vector.broadcast %cst_94 : f32 to vector<32x256xf32>
    %218 = arith.addf %217, %216 : vector<32x256xf32>
    %cst_95 = arith.constant 5.000000e-01 : f32
    %219 = vector.broadcast %cst_95 : f32 to vector<32x256xf32>
    %220 = arith.mulf %219, %218 : vector<32x256xf32>
    %221 = arith.mulf %208, %220 : vector<32x256xf32>
    %c0_96 = arith.constant 0 : index
    %c0_97 = arith.constant 0 : index
    %222 = vector.load %arg14[%c0_96, %c0_97] : memref<256x64xbf16, #tpu.memory_space<vmem>>, vector<256x64xbf16>
    %223 = arith.truncf %221 : vector<32x256xf32> to vector<32x256xbf16>
    %cst_98 = arith.constant dense<0.000000e+00> : vector<32x64xf32>
    %224 = tpu.matmul %223, %222, %cst_98 {dimension_numbers = #tpu.dot_dimension_numbers<[1], [0], [0], [1], [0, 0, 1, 1], [], []>} : vector<32x256xbf16>, vector<256x64xbf16>, vector<32x64xf32> -> vector<32x64xf32>
    %c0_99 = arith.constant 0 : index
    %c0_100 = arith.constant 0 : index
    %225 = vector.load %arg15[%c0_99, %c0_100] : memref<1x64xbf16, #tpu.memory_space<vmem>>, vector<1x64xbf16>
    %226 = arith.extf %225 : vector<1x64xbf16> to vector<1x64xf32>
    %227 = vector.broadcast %226 : vector<1x64xf32> to vector<32x64xf32>
    %228 = arith.addf %224, %227 : vector<32x64xf32>
    %229 = arith.addf %177, %228 : vector<32x64xf32>
    %cst_101 = arith.constant 0.000000e+00 : f32
    %230 = vector.broadcast %cst_101 : f32 to vector<32x64xf32>
    %231 = tpu.concatenate %229, %230 in 1 : vector<32x64xf32>, vector<32x64xf32> -> vector<32x128xf32>
    %232 = arith.truncf %231 : vector<32x128xf32> to vector<32x128xbf16>
    %c0_102 = arith.constant 0 : index
    %c0_103 = arith.constant 0 : index
    %233 = vector.load %arg16[%c0_102, %c0_103] : memref<32x128xbf16, #tpu.memory_space<vmem>>, vector<32x128xbf16>
    tpu.vector_store %arg16[%c0_102, %c0_103], %232 {strides = array<i32>} : memref<32x128xbf16, #tpu.memory_space<vmem>>, vector<32x128xbf16>,
    return
  }
}

module attributes {stable_mosaic.version = 11 : i64} {
  func.func @_proj_llm_kernel(%arg0: memref<8x256xbf16, #tpu.memory_space<vmem>>, %arg1: memref<8x128xbf16, #tpu.memory_space<vmem>>, %arg2: memref<1x256xbf16, #tpu.memory_space<vmem>>, %arg3: memref<1x256xbf16, #tpu.memory_space<vmem>>, %arg4: memref<256x128xbf16, #tpu.memory_space<vmem>>, %arg5: memref<1x128xbf16, #tpu.memory_space<vmem>>, %arg6: memref<128x128xbf16, #tpu.memory_space<vmem>>, %arg7: memref<1x128xbf16, #tpu.memory_space<vmem>>, %arg8: memref<1x128xbf16, #tpu.memory_space<vmem>>, %arg9: memref<12x128x32xbf16, #tpu.memory_space<vmem>>, %arg10: memref<128x128xbf16, #tpu.memory_space<vmem>>, %arg11: memref<1x128xbf16, #tpu.memory_space<vmem>>, %arg12: memref<128x512xbf16, #tpu.memory_space<vmem>>, %arg13: memref<256x128xbf16, #tpu.memory_space<vmem>>, %arg14: memref<1x128xbf16, #tpu.memory_space<vmem>>, %arg15: memref<128x128xbf16, #tpu.memory_space<vmem>>, %arg16: memref<16x128xf32, #tpu.memory_space<vmem>>) attributes {dimension_semantics = [], scalar_prefetch = 0 : i64, scratch_operands = 0 : i64, tpu.core_type = #tpu.core_type<tc>} {
    %c0 = arith.constant 0 : index
    %c0_0 = arith.constant 0 : index
    %0 = vector.load %arg0[%c0, %c0_0] : memref<8x256xbf16, #tpu.memory_space<vmem>>, vector<8x256xbf16>
    %1 = arith.extf %0 : vector<8x256xbf16> to vector<8x256xf32>
    %c0_1 = arith.constant 0 : index
    %c0_2 = arith.constant 0 : index
    %2 = vector.load %arg2[%c0_1, %c0_2] : memref<1x256xbf16, #tpu.memory_space<vmem>>, vector<1x256xbf16>
    %c0_3 = arith.constant 0 : index
    %c0_4 = arith.constant 0 : index
    %3 = vector.load %arg3[%c0_3, %c0_4] : memref<1x256xbf16, #tpu.memory_space<vmem>>, vector<1x256xbf16>
    %cst = arith.constant dense<0.000000e+00> : vector<8xf32>
    %4 = vector.multi_reduction <add>, %1, %cst [1] : vector<8x256xf32> to vector<8xf32>
    %5 = vector.shape_cast %4 : vector<8xf32> to vector<8x1xf32>
    %cst_5 = arith.constant 2.560000e+02 : f32
    %6 = vector.broadcast %cst_5 : f32 to vector<8x1xf32>
    %7 = arith.divf %5, %6 : vector<8x1xf32>
    %8 = vector.broadcast %7 : vector<8x1xf32> to vector<8x256xf32>
    %9 = arith.subf %1, %8 : vector<8x256xf32>
    %10 = arith.mulf %9, %9 : vector<8x256xf32>
    %cst_6 = arith.constant dense<0.000000e+00> : vector<8xf32>
    %11 = vector.multi_reduction <add>, %10, %cst_6 [1] : vector<8x256xf32> to vector<8xf32>
    %12 = vector.shape_cast %11 : vector<8xf32> to vector<8x1xf32>
    %cst_7 = arith.constant 2.560000e+02 : f32
    %13 = vector.broadcast %cst_7 : f32 to vector<8x1xf32>
    %14 = arith.divf %12, %13 : vector<8x1xf32>
    %cst_8 = arith.constant 9.99999974E-6 : f32
    %15 = vector.broadcast %cst_8 : f32 to vector<8x1xf32>
    %16 = arith.addf %14, %15 : vector<8x1xf32>
    %17 = math.rsqrt %16 : vector<8x1xf32>
    %18 = vector.broadcast %17 : vector<8x1xf32> to vector<8x256xf32>
    %19 = arith.mulf %9, %18 : vector<8x256xf32>
    %20 = arith.extf %2 : vector<1x256xbf16> to vector<1x256xf32>
    %21 = vector.broadcast %20 : vector<1x256xf32> to vector<8x256xf32>
    %22 = arith.mulf %19, %21 : vector<8x256xf32>
    %23 = arith.extf %3 : vector<1x256xbf16> to vector<1x256xf32>
    %24 = vector.broadcast %23 : vector<1x256xf32> to vector<8x256xf32>
    %25 = arith.addf %22, %24 : vector<8x256xf32>
    %c0_9 = arith.constant 0 : index
    %c0_10 = arith.constant 0 : index
    %26 = vector.load %arg4[%c0_9, %c0_10] : memref<256x128xbf16, #tpu.memory_space<vmem>>, vector<256x128xbf16>
    %27 = arith.truncf %25 : vector<8x256xf32> to vector<8x256xbf16>
    %cst_11 = arith.constant dense<0.000000e+00> : vector<8x128xf32>
    %28 = tpu.matmul %27, %26, %cst_11 {dimension_numbers = #tpu.dot_dimension_numbers<[1], [0], [0], [1], [0, 0, 1, 1], [], []>} : vector<8x256xbf16>, vector<256x128xbf16>, vector<8x128xf32> -> vector<8x128xf32>
    %c0_12 = arith.constant 0 : index
    %c0_13 = arith.constant 0 : index
    %29 = vector.load %arg5[%c0_12, %c0_13] : memref<1x128xbf16, #tpu.memory_space<vmem>>, vector<1x128xbf16>
    %30 = arith.extf %29 : vector<1x128xbf16> to vector<1x128xf32>
    %31 = vector.broadcast %30 : vector<1x128xf32> to vector<8x128xf32>
    %32 = arith.addf %28, %31 : vector<8x128xf32>
    %33 = arith.mulf %32, %32 : vector<8x128xf32>
    %34 = arith.mulf %32, %33 : vector<8x128xf32>
    %cst_14 = arith.constant 4.471500e-02 : f32
    %35 = vector.broadcast %cst_14 : f32 to vector<8x128xf32>
    %36 = arith.mulf %35, %34 : vector<8x128xf32>
    %37 = arith.addf %32, %36 : vector<8x128xf32>
    %cst_15 = arith.constant 0.797884583 : f32
    %38 = vector.broadcast %cst_15 : f32 to vector<8x128xf32>
    %39 = arith.mulf %38, %37 : vector<8x128xf32>
    %40 = math.tanh %39 : vector<8x128xf32>
    %cst_16 = arith.constant 1.000000e+00 : f32
    %41 = vector.broadcast %cst_16 : f32 to vector<8x128xf32>
    %42 = arith.addf %41, %40 : vector<8x128xf32>
    %cst_17 = arith.constant 5.000000e-01 : f32
    %43 = vector.broadcast %cst_17 : f32 to vector<8x128xf32>
    %44 = arith.mulf %43, %42 : vector<8x128xf32>
    %45 = arith.mulf %32, %44 : vector<8x128xf32>
    %c0_18 = arith.constant 0 : index
    %c0_19 = arith.constant 0 : index
    %46 = vector.load %arg6[%c0_18, %c0_19] : memref<128x128xbf16, #tpu.memory_space<vmem>>, vector<128x128xbf16>
    %47 = arith.truncf %45 : vector<8x128xf32> to vector<8x128xbf16>
    %cst_20 = arith.constant dense<0.000000e+00> : vector<8x128xf32>
    %48 = tpu.matmul %47, %46, %cst_20 {dimension_numbers = #tpu.dot_dimension_numbers<[1], [0], [0], [1], [0, 0, 1, 1], [], []>} : vector<8x128xbf16>, vector<128x128xbf16>, vector<8x128xf32> -> vector<8x128xf32>
    %c0_21 = arith.constant 0 : index
    %c0_22 = arith.constant 0 : index
    %49 = vector.load %arg7[%c0_21, %c0_22] : memref<1x128xbf16, #tpu.memory_space<vmem>>, vector<1x128xbf16>
    %50 = arith.extf %49 : vector<1x128xbf16> to vector<1x128xf32>
    %51 = vector.broadcast %50 : vector<1x128xf32> to vector<8x128xf32>
    %52 = arith.addf %48, %51 : vector<8x128xf32>
    %c0_23 = arith.constant 0 : index
    %c0_24 = arith.constant 0 : index
    %53 = vector.load %arg1[%c0_23, %c0_24] : memref<8x128xbf16, #tpu.memory_space<vmem>>, vector<8x128xbf16>
    %54 = arith.extf %53 : vector<8x128xbf16> to vector<8x128xf32>
    %55 = tpu.concatenate %52, %54 in 0 : vector<8x128xf32>, vector<8x128xf32> -> vector<16x128xf32>
    %c0_25 = arith.constant 0 : index
    %c0_26 = arith.constant 0 : index
    %56 = vector.load %arg8[%c0_25, %c0_26] : memref<1x128xbf16, #tpu.memory_space<vmem>>, vector<1x128xbf16>
    %57 = arith.mulf %55, %55 : vector<16x128xf32>
    %cst_27 = arith.constant dense<0.000000e+00> : vector<16xf32>
    %58 = vector.multi_reduction <add>, %57, %cst_27 [1] : vector<16x128xf32> to vector<16xf32>
    %59 = vector.shape_cast %58 : vector<16xf32> to vector<16x1xf32>
    %cst_28 = arith.constant 1.280000e+02 : f32
    %60 = vector.broadcast %cst_28 : f32 to vector<16x1xf32>
    %61 = arith.divf %59, %60 : vector<16x1xf32>
    %cst_29 = arith.constant 9.99999997E-7 : f32
    %62 = vector.broadcast %cst_29 : f32 to vector<16x1xf32>
    %63 = arith.addf %61, %62 : vector<16x1xf32>
    %64 = math.rsqrt %63 : vector<16x1xf32>
    %65 = vector.broadcast %64 : vector<16x1xf32> to vector<16x128xf32>
    %66 = arith.mulf %55, %65 : vector<16x128xf32>
    %67 = arith.extf %56 : vector<1x128xbf16> to vector<1x128xf32>
    %68 = vector.broadcast %67 : vector<1x128xf32> to vector<16x128xf32>
    %69 = arith.mulf %66, %68 : vector<16x128xf32>
    %70 = arith.truncf %69 : vector<16x128xf32> to vector<16x128xbf16>
    %c0_30 = arith.constant 0 : index
    %c0_31 = arith.constant 0 : index
    %c0_32 = arith.constant 0 : index
    %71 = vector.load %arg9[%c0_30, %c0_31, %c0_32] : memref<12x128x32xbf16, #tpu.memory_space<vmem>>, vector<1x128x32xbf16>
    %72 = vector.shape_cast %71 : vector<1x128x32xbf16> to vector<128x32xbf16>
    %cst_33 = arith.constant dense<0.000000e+00> : vector<16x32xf32>
    %73 = tpu.matmul %70, %72, %cst_33 {dimension_numbers = #tpu.dot_dimension_numbers<[1], [0], [0], [1], [0, 0, 1, 1], [], []>} : vector<16x128xbf16>, vector<128x32xbf16>, vector<16x32xf32> -> vector<16x32xf32>
    %c1 = arith.constant 1 : index
    %c0_34 = arith.constant 0 : index
    %c0_35 = arith.constant 0 : index
    %74 = vector.load %arg9[%c1, %c0_34, %c0_35] : memref<12x128x32xbf16, #tpu.memory_space<vmem>>, vector<1x128x32xbf16>
    %75 = vector.shape_cast %74 : vector<1x128x32xbf16> to vector<128x32xbf16>
    %cst_36 = arith.constant dense<0.000000e+00> : vector<16x32xf32>
    %76 = tpu.matmul %70, %75, %cst_36 {dimension_numbers = #tpu.dot_dimension_numbers<[1], [0], [0], [1], [0, 0, 1, 1], [], []>} : vector<16x128xbf16>, vector<128x32xbf16>, vector<16x32xf32> -> vector<16x32xf32>
    %c2 = arith.constant 2 : index
    %c0_37 = arith.constant 0 : index
    %c0_38 = arith.constant 0 : index
    %77 = vector.load %arg9[%c2, %c0_37, %c0_38] : memref<12x128x32xbf16, #tpu.memory_space<vmem>>, vector<1x128x32xbf16>
    %78 = vector.shape_cast %77 : vector<1x128x32xbf16> to vector<128x32xbf16>
    %cst_39 = arith.constant dense<0.000000e+00> : vector<16x32xf32>
    %79 = tpu.matmul %70, %78, %cst_39 {dimension_numbers = #tpu.dot_dimension_numbers<[1], [0], [0], [1], [0, 0, 1, 1], [], []>} : vector<16x128xbf16>, vector<128x32xbf16>, vector<16x32xf32> -> vector<16x32xf32>
    %80 = arith.truncf %73 : vector<16x32xf32> to vector<16x32xbf16>
    %81 = arith.truncf %76 : vector<16x32xf32> to vector<16x32xbf16>
    %cst_40 = arith.constant dense<0.000000e+00> : vector<16x16xf32>
    %82 = tpu.matmul %80, %81, %cst_40 {dimension_numbers = #tpu.dot_dimension_numbers<[1], [1], [0], [0], [0, 0, 1, 0], [], []>} : vector<16x32xbf16>, vector<16x32xbf16>, vector<16x16xf32> -> vector<16x16xf32>
    %cst_41 = arith.constant 0.176776692 : f32
    %83 = vector.broadcast %cst_41 : f32 to vector<16x16xf32>
    %84 = arith.mulf %82, %83 : vector<16x16xf32>
    %85 = tpu.iota {dimensions = array<i32: 0>} : vector<16x16xi32>
    %86 = tpu.iota {dimensions = array<i32: 1>} : vector<16x16xi32>
    %87 = arith.cmpi sle, %86, %85 : vector<16x16xi32>
    %cst_42 = arith.constant -1.000000e+30 : f32
    %88 = vector.broadcast %cst_42 : f32 to vector<16x16xf32>
    %89 = arith.select %87, %84, %88 : vector<16x16xi1>, vector<16x16xf32>
    %cst_43 = arith.constant dense<0xFF800000> : vector<16xf32>
    %90 = vector.multi_reduction <maximumf>, %89, %cst_43 [1] : vector<16x16xf32> to vector<16xf32>
    %91 = vector.shape_cast %90 : vector<16xf32> to vector<16x1xf32>
    %92 = vector.broadcast %91 : vector<16x1xf32> to vector<16x16xf32>
    %93 = arith.subf %89, %92 : vector<16x16xf32>
    %94 = math.exp %93 : vector<16x16xf32>
    %cst_44 = arith.constant dense<0.000000e+00> : vector<16xf32>
    %95 = vector.multi_reduction <add>, %94, %cst_44 [1] : vector<16x16xf32> to vector<16xf32>
    %96 = vector.shape_cast %95 : vector<16xf32> to vector<16x1xf32>
    %97 = tpu.reciprocal %96 {approx = true} : vector<16x1xf32> -> vector<16x1xf32>
    %98 = vector.broadcast %97 : vector<16x1xf32> to vector<16x16xf32>
    %99 = arith.mulf %94, %98 : vector<16x16xf32>
    %100 = arith.truncf %99 : vector<16x16xf32> to vector<16x16xbf16>
    %101 = arith.truncf %79 : vector<16x32xf32> to vector<16x32xbf16>
    %cst_45 = arith.constant dense<0.000000e+00> : vector<16x32xf32>
    %102 = tpu.matmul %100, %101, %cst_45 {dimension_numbers = #tpu.dot_dimension_numbers<[1], [0], [0], [1], [0, 0, 1, 1], [], []>} : vector<16x16xbf16>, vector<16x32xbf16>, vector<16x32xf32> -> vector<16x32xf32>
    %c3 = arith.constant 3 : index
    %c0_46 = arith.constant 0 : index
    %c0_47 = arith.constant 0 : index
    %103 = vector.load %arg9[%c3, %c0_46, %c0_47] : memref<12x128x32xbf16, #tpu.memory_space<vmem>>, vector<1x128x32xbf16>
    %104 = vector.shape_cast %103 : vector<1x128x32xbf16> to vector<128x32xbf16>
    %cst_48 = arith.constant dense<0.000000e+00> : vector<16x32xf32>
    %105 = tpu.matmul %70, %104, %cst_48 {dimension_numbers = #tpu.dot_dimension_numbers<[1], [0], [0], [1], [0, 0, 1, 1], [], []>} : vector<16x128xbf16>, vector<128x32xbf16>, vector<16x32xf32> -> vector<16x32xf32>
    %c4 = arith.constant 4 : index
    %c0_49 = arith.constant 0 : index
    %c0_50 = arith.constant 0 : index
    %106 = vector.load %arg9[%c4, %c0_49, %c0_50] : memref<12x128x32xbf16, #tpu.memory_space<vmem>>, vector<1x128x32xbf16>
    %107 = vector.shape_cast %106 : vector<1x128x32xbf16> to vector<128x32xbf16>
    %cst_51 = arith.constant dense<0.000000e+00> : vector<16x32xf32>
    %108 = tpu.matmul %70, %107, %cst_51 {dimension_numbers = #tpu.dot_dimension_numbers<[1], [0], [0], [1], [0, 0, 1, 1], [], []>} : vector<16x128xbf16>, vector<128x32xbf16>, vector<16x32xf32> -> vector<16x32xf32>
    %c5 = arith.constant 5 : index
    %c0_52 = arith.constant 0 : index
    %c0_53 = arith.constant 0 : index
    %109 = vector.load %arg9[%c5, %c0_52, %c0_53] : memref<12x128x32xbf16, #tpu.memory_space<vmem>>, vector<1x128x32xbf16>
    %110 = vector.shape_cast %109 : vector<1x128x32xbf16> to vector<128x32xbf16>
    %cst_54 = arith.constant dense<0.000000e+00> : vector<16x32xf32>
    %111 = tpu.matmul %70, %110, %cst_54 {dimension_numbers = #tpu.dot_dimension_numbers<[1], [0], [0], [1], [0, 0, 1, 1], [], []>} : vector<16x128xbf16>, vector<128x32xbf16>, vector<16x32xf32> -> vector<16x32xf32>
    %112 = arith.truncf %105 : vector<16x32xf32> to vector<16x32xbf16>
    %113 = arith.truncf %108 : vector<16x32xf32> to vector<16x32xbf16>
    %cst_55 = arith.constant dense<0.000000e+00> : vector<16x16xf32>
    %114 = tpu.matmul %112, %113, %cst_55 {dimension_numbers = #tpu.dot_dimension_numbers<[1], [1], [0], [0], [0, 0, 1, 0], [], []>} : vector<16x32xbf16>, vector<16x32xbf16>, vector<16x16xf32> -> vector<16x16xf32>
    %cst_56 = arith.constant 0.176776692 : f32
    %115 = vector.broadcast %cst_56 : f32 to vector<16x16xf32>
    %116 = arith.mulf %114, %115 : vector<16x16xf32>
    %117 = tpu.iota {dimensions = array<i32: 0>} : vector<16x16xi32>
    %118 = tpu.iota {dimensions = array<i32: 1>} : vector<16x16xi32>
    %119 = arith.cmpi sle, %118, %117 : vector<16x16xi32>
    %cst_57 = arith.constant -1.000000e+30 : f32
    %120 = vector.broadcast %cst_57 : f32 to vector<16x16xf32>
    %121 = arith.select %119, %116, %120 : vector<16x16xi1>, vector<16x16xf32>
    %cst_58 = arith.constant dense<0xFF800000> : vector<16xf32>
    %122 = vector.multi_reduction <maximumf>, %121, %cst_58 [1] : vector<16x16xf32> to vector<16xf32>
    %123 = vector.shape_cast %122 : vector<16xf32> to vector<16x1xf32>
    %124 = vector.broadcast %123 : vector<16x1xf32> to vector<16x16xf32>
    %125 = arith.subf %121, %124 : vector<16x16xf32>
    %126 = math.exp %125 : vector<16x16xf32>
    %cst_59 = arith.constant dense<0.000000e+00> : vector<16xf32>
    %127 = vector.multi_reduction <add>, %126, %cst_59 [1] : vector<16x16xf32> to vector<16xf32>
    %128 = vector.shape_cast %127 : vector<16xf32> to vector<16x1xf32>
    %129 = tpu.reciprocal %128 {approx = true} : vector<16x1xf32> -> vector<16x1xf32>
    %130 = vector.broadcast %129 : vector<16x1xf32> to vector<16x16xf32>
    %131 = arith.mulf %126, %130 : vector<16x16xf32>
    %132 = arith.truncf %131 : vector<16x16xf32> to vector<16x16xbf16>
    %133 = arith.truncf %111 : vector<16x32xf32> to vector<16x32xbf16>
    %cst_60 = arith.constant dense<0.000000e+00> : vector<16x32xf32>
    %134 = tpu.matmul %132, %133, %cst_60 {dimension_numbers = #tpu.dot_dimension_numbers<[1], [0], [0], [1], [0, 0, 1, 1], [], []>} : vector<16x16xbf16>, vector<16x32xbf16>, vector<16x32xf32> -> vector<16x32xf32>
    %c6 = arith.constant 6 : index
    %c0_61 = arith.constant 0 : index
    %c0_62 = arith.constant 0 : index
    %135 = vector.load %arg9[%c6, %c0_61, %c0_62] : memref<12x128x32xbf16, #tpu.memory_space<vmem>>, vector<1x128x32xbf16>
    %136 = vector.shape_cast %135 : vector<1x128x32xbf16> to vector<128x32xbf16>
    %cst_63 = arith.constant dense<0.000000e+00> : vector<16x32xf32>
    %137 = tpu.matmul %70, %136, %cst_63 {dimension_numbers = #tpu.dot_dimension_numbers<[1], [0], [0], [1], [0, 0, 1, 1], [], []>} : vector<16x128xbf16>, vector<128x32xbf16>, vector<16x32xf32> -> vector<16x32xf32>
    %c7 = arith.constant 7 : index
    %c0_64 = arith.constant 0 : index
    %c0_65 = arith.constant 0 : index
    %138 = vector.load %arg9[%c7, %c0_64, %c0_65] : memref<12x128x32xbf16, #tpu.memory_space<vmem>>, vector<1x128x32xbf16>
    %139 = vector.shape_cast %138 : vector<1x128x32xbf16> to vector<128x32xbf16>
    %cst_66 = arith.constant dense<0.000000e+00> : vector<16x32xf32>
    %140 = tpu.matmul %70, %139, %cst_66 {dimension_numbers = #tpu.dot_dimension_numbers<[1], [0], [0], [1], [0, 0, 1, 1], [], []>} : vector<16x128xbf16>, vector<128x32xbf16>, vector<16x32xf32> -> vector<16x32xf32>
    %c8 = arith.constant 8 : index
    %c0_67 = arith.constant 0 : index
    %c0_68 = arith.constant 0 : index
    %141 = vector.load %arg9[%c8, %c0_67, %c0_68] : memref<12x128x32xbf16, #tpu.memory_space<vmem>>, vector<1x128x32xbf16>
    %142 = vector.shape_cast %141 : vector<1x128x32xbf16> to vector<128x32xbf16>
    %cst_69 = arith.constant dense<0.000000e+00> : vector<16x32xf32>
    %143 = tpu.matmul %70, %142, %cst_69 {dimension_numbers = #tpu.dot_dimension_numbers<[1], [0], [0], [1], [0, 0, 1, 1], [], []>} : vector<16x128xbf16>, vector<128x32xbf16>, vector<16x32xf32> -> vector<16x32xf32>
    %144 = arith.truncf %137 : vector<16x32xf32> to vector<16x32xbf16>
    %145 = arith.truncf %140 : vector<16x32xf32> to vector<16x32xbf16>
    %cst_70 = arith.constant dense<0.000000e+00> : vector<16x16xf32>
    %146 = tpu.matmul %144, %145, %cst_70 {dimension_numbers = #tpu.dot_dimension_numbers<[1], [1], [0], [0], [0, 0, 1, 0], [], []>} : vector<16x32xbf16>, vector<16x32xbf16>, vector<16x16xf32> -> vector<16x16xf32>
    %cst_71 = arith.constant 0.176776692 : f32
    %147 = vector.broadcast %cst_71 : f32 to vector<16x16xf32>
    %148 = arith.mulf %146, %147 : vector<16x16xf32>
    %149 = tpu.iota {dimensions = array<i32: 0>} : vector<16x16xi32>
    %150 = tpu.iota {dimensions = array<i32: 1>} : vector<16x16xi32>
    %151 = arith.cmpi sle, %150, %149 : vector<16x16xi32>
    %cst_72 = arith.constant -1.000000e+30 : f32
    %152 = vector.broadcast %cst_72 : f32 to vector<16x16xf32>
    %153 = arith.select %151, %148, %152 : vector<16x16xi1>, vector<16x16xf32>
    %cst_73 = arith.constant dense<0xFF800000> : vector<16xf32>
    %154 = vector.multi_reduction <maximumf>, %153, %cst_73 [1] : vector<16x16xf32> to vector<16xf32>
    %155 = vector.shape_cast %154 : vector<16xf32> to vector<16x1xf32>
    %156 = vector.broadcast %155 : vector<16x1xf32> to vector<16x16xf32>
    %157 = arith.subf %153, %156 : vector<16x16xf32>
    %158 = math.exp %157 : vector<16x16xf32>
    %cst_74 = arith.constant dense<0.000000e+00> : vector<16xf32>
    %159 = vector.multi_reduction <add>, %158, %cst_74 [1] : vector<16x16xf32> to vector<16xf32>
    %160 = vector.shape_cast %159 : vector<16xf32> to vector<16x1xf32>
    %161 = tpu.reciprocal %160 {approx = true} : vector<16x1xf32> -> vector<16x1xf32>
    %162 = vector.broadcast %161 : vector<16x1xf32> to vector<16x16xf32>
    %163 = arith.mulf %158, %162 : vector<16x16xf32>
    %164 = arith.truncf %163 : vector<16x16xf32> to vector<16x16xbf16>
    %165 = arith.truncf %143 : vector<16x32xf32> to vector<16x32xbf16>
    %cst_75 = arith.constant dense<0.000000e+00> : vector<16x32xf32>
    %166 = tpu.matmul %164, %165, %cst_75 {dimension_numbers = #tpu.dot_dimension_numbers<[1], [0], [0], [1], [0, 0, 1, 1], [], []>} : vector<16x16xbf16>, vector<16x32xbf16>, vector<16x32xf32> -> vector<16x32xf32>
    %c9 = arith.constant 9 : index
    %c0_76 = arith.constant 0 : index
    %c0_77 = arith.constant 0 : index
    %167 = vector.load %arg9[%c9, %c0_76, %c0_77] : memref<12x128x32xbf16, #tpu.memory_space<vmem>>, vector<1x128x32xbf16>
    %168 = vector.shape_cast %167 : vector<1x128x32xbf16> to vector<128x32xbf16>
    %cst_78 = arith.constant dense<0.000000e+00> : vector<16x32xf32>
    %169 = tpu.matmul %70, %168, %cst_78 {dimension_numbers = #tpu.dot_dimension_numbers<[1], [0], [0], [1], [0, 0, 1, 1], [], []>} : vector<16x128xbf16>, vector<128x32xbf16>, vector<16x32xf32> -> vector<16x32xf32>
    %c10 = arith.constant 10 : index
    %c0_79 = arith.constant 0 : index
    %c0_80 = arith.constant 0 : index
    %170 = vector.load %arg9[%c10, %c0_79, %c0_80] : memref<12x128x32xbf16, #tpu.memory_space<vmem>>, vector<1x128x32xbf16>
    %171 = vector.shape_cast %170 : vector<1x128x32xbf16> to vector<128x32xbf16>
    %cst_81 = arith.constant dense<0.000000e+00> : vector<16x32xf32>
    %172 = tpu.matmul %70, %171, %cst_81 {dimension_numbers = #tpu.dot_dimension_numbers<[1], [0], [0], [1], [0, 0, 1, 1], [], []>} : vector<16x128xbf16>, vector<128x32xbf16>, vector<16x32xf32> -> vector<16x32xf32>
    %c11 = arith.constant 11 : index
    %c0_82 = arith.constant 0 : index
    %c0_83 = arith.constant 0 : index
    %173 = vector.load %arg9[%c11, %c0_82, %c0_83] : memref<12x128x32xbf16, #tpu.memory_space<vmem>>, vector<1x128x32xbf16>
    %174 = vector.shape_cast %173 : vector<1x128x32xbf16> to vector<128x32xbf16>
    %cst_84 = arith.constant dense<0.000000e+00> : vector<16x32xf32>
    %175 = tpu.matmul %70, %174, %cst_84 {dimension_numbers = #tpu.dot_dimension_numbers<[1], [0], [0], [1], [0, 0, 1, 1], [], []>} : vector<16x128xbf16>, vector<128x32xbf16>, vector<16x32xf32> -> vector<16x32xf32>
    %176 = arith.truncf %169 : vector<16x32xf32> to vector<16x32xbf16>
    %177 = arith.truncf %172 : vector<16x32xf32> to vector<16x32xbf16>
    %cst_85 = arith.constant dense<0.000000e+00> : vector<16x16xf32>
    %178 = tpu.matmul %176, %177, %cst_85 {dimension_numbers = #tpu.dot_dimension_numbers<[1], [1], [0], [0], [0, 0, 1, 0], [], []>} : vector<16x32xbf16>, vector<16x32xbf16>, vector<16x16xf32> -> vector<16x16xf32>
    %cst_86 = arith.constant 0.176776692 : f32
    %179 = vector.broadcast %cst_86 : f32 to vector<16x16xf32>
    %180 = arith.mulf %178, %179 : vector<16x16xf32>
    %181 = tpu.iota {dimensions = array<i32: 0>} : vector<16x16xi32>
    %182 = tpu.iota {dimensions = array<i32: 1>} : vector<16x16xi32>
    %183 = arith.cmpi sle, %182, %181 : vector<16x16xi32>
    %cst_87 = arith.constant -1.000000e+30 : f32
    %184 = vector.broadcast %cst_87 : f32 to vector<16x16xf32>
    %185 = arith.select %183, %180, %184 : vector<16x16xi1>, vector<16x16xf32>
    %cst_88 = arith.constant dense<0xFF800000> : vector<16xf32>
    %186 = vector.multi_reduction <maximumf>, %185, %cst_88 [1] : vector<16x16xf32> to vector<16xf32>
    %187 = vector.shape_cast %186 : vector<16xf32> to vector<16x1xf32>
    %188 = vector.broadcast %187 : vector<16x1xf32> to vector<16x16xf32>
    %189 = arith.subf %185, %188 : vector<16x16xf32>
    %190 = math.exp %189 : vector<16x16xf32>
    %cst_89 = arith.constant dense<0.000000e+00> : vector<16xf32>
    %191 = vector.multi_reduction <add>, %190, %cst_89 [1] : vector<16x16xf32> to vector<16xf32>
    %192 = vector.shape_cast %191 : vector<16xf32> to vector<16x1xf32>
    %193 = tpu.reciprocal %192 {approx = true} : vector<16x1xf32> -> vector<16x1xf32>
    %194 = vector.broadcast %193 : vector<16x1xf32> to vector<16x16xf32>
    %195 = arith.mulf %190, %194 : vector<16x16xf32>
    %196 = arith.truncf %195 : vector<16x16xf32> to vector<16x16xbf16>
    %197 = arith.truncf %175 : vector<16x32xf32> to vector<16x32xbf16>
    %cst_90 = arith.constant dense<0.000000e+00> : vector<16x32xf32>
    %198 = tpu.matmul %196, %197, %cst_90 {dimension_numbers = #tpu.dot_dimension_numbers<[1], [0], [0], [1], [0, 0, 1, 1], [], []>} : vector<16x16xbf16>, vector<16x32xbf16>, vector<16x32xf32> -> vector<16x32xf32>
    %199 = tpu.concatenate %102, %134, %166, %198 in 1 : vector<16x32xf32>, vector<16x32xf32>, vector<16x32xf32>, vector<16x32xf32> -> vector<16x128xf32>
    %c0_91 = arith.constant 0 : index
    %c0_92 = arith.constant 0 : index
    %200 = vector.load %arg10[%c0_91, %c0_92] : memref<128x128xbf16, #tpu.memory_space<vmem>>, vector<128x128xbf16>
    %201 = arith.truncf %199 : vector<16x128xf32> to vector<16x128xbf16>
    %cst_93 = arith.constant dense<0.000000e+00> : vector<16x128xf32>
    %202 = tpu.matmul %201, %200, %cst_93 {dimension_numbers = #tpu.dot_dimension_numbers<[1], [0], [0], [1], [0, 0, 1, 1], [], []>} : vector<16x128xbf16>, vector<128x128xbf16>, vector<16x128xf32> -> vector<16x128xf32>
    %203 = arith.addf %55, %202 : vector<16x128xf32>
    %c0_94 = arith.constant 0 : index
    %c0_95 = arith.constant 0 : index
    %204 = vector.load %arg11[%c0_94, %c0_95] : memref<1x128xbf16, #tpu.memory_space<vmem>>, vector<1x128xbf16>
    %205 = arith.mulf %203, %203 : vector<16x128xf32>
    %cst_96 = arith.constant dense<0.000000e+00> : vector<16xf32>
    %206 = vector.multi_reduction <add>, %205, %cst_96 [1] : vector<16x128xf32> to vector<16xf32>
    %207 = vector.shape_cast %206 : vector<16xf32> to vector<16x1xf32>
    %cst_97 = arith.constant 1.280000e+02 : f32
    %208 = vector.broadcast %cst_97 : f32 to vector<16x1xf32>
    %209 = arith.divf %207, %208 : vector<16x1xf32>
    %cst_98 = arith.constant 9.99999997E-7 : f32
    %210 = vector.broadcast %cst_98 : f32 to vector<16x1xf32>
    %211 = arith.addf %209, %210 : vector<16x1xf32>
    %212 = math.rsqrt %211 : vector<16x1xf32>
    %213 = vector.broadcast %212 : vector<16x1xf32> to vector<16x128xf32>
    %214 = arith.mulf %203, %213 : vector<16x128xf32>
    %215 = arith.extf %204 : vector<1x128xbf16> to vector<1x128xf32>
    %216 = vector.broadcast %215 : vector<1x128xf32> to vector<16x128xf32>
    %217 = arith.mulf %214, %216 : vector<16x128xf32>
    %c0_99 = arith.constant 0 : index
    %c0_100 = arith.constant 0 : index
    %218 = vector.load %arg12[%c0_99, %c0_100] : memref<128x512xbf16, #tpu.memory_space<vmem>>, vector<128x512xbf16>
    %219 = arith.truncf %217 : vector<16x128xf32> to vector<16x128xbf16>
    %cst_101 = arith.constant dense<0.000000e+00> : vector<16x512xf32>
    %220 = tpu.matmul %219, %218, %cst_101 {dimension_numbers = #tpu.dot_dimension_numbers<[1], [0], [0], [1], [0, 0, 1, 1], [], []>} : vector<16x128xbf16>, vector<128x512xbf16>, vector<16x512xf32> -> vector<16x512xf32>
    %221 = vector.extract_strided_slice %220 {offsets = [0, 0], sizes = [16, 256], strides = [1, 1]} : vector<16x512xf32> to vector<16x256xf32>
    %222 = arith.negf %221 : vector<16x256xf32>
    %223 = math.exp %222 : vector<16x256xf32>
    %cst_102 = arith.constant 1.000000e+00 : f32
    %224 = vector.broadcast %cst_102 : f32 to vector<16x256xf32>
    %225 = arith.addf %224, %223 : vector<16x256xf32>
    %226 = arith.divf %224, %225 : vector<16x256xf32>
    %227 = arith.mulf %221, %226 : vector<16x256xf32>
    %228 = vector.extract_strided_slice %220 {offsets = [0, 256], sizes = [16, 256], strides = [1, 1]} : vector<16x512xf32> to vector<16x256xf32>
    %229 = arith.mulf %227, %228 : vector<16x256xf32>
    %c0_103 = arith.constant 0 : index
    %c0_104 = arith.constant 0 : index
    %230 = vector.load %arg13[%c0_103, %c0_104] : memref<256x128xbf16, #tpu.memory_space<vmem>>, vector<256x128xbf16>
    %231 = arith.truncf %229 : vector<16x256xf32> to vector<16x256xbf16>
    %cst_105 = arith.constant dense<0.000000e+00> : vector<16x128xf32>
    %232 = tpu.matmul %231, %230, %cst_105 {dimension_numbers = #tpu.dot_dimension_numbers<[1], [0], [0], [1], [0, 0, 1, 1], [], []>} : vector<16x256xbf16>, vector<256x128xbf16>, vector<16x128xf32> -> vector<16x128xf32>
    %233 = arith.addf %203, %232 : vector<16x128xf32>
    %c0_106 = arith.constant 0 : index
    %c0_107 = arith.constant 0 : index
    %234 = vector.load %arg14[%c0_106, %c0_107] : memref<1x128xbf16, #tpu.memory_space<vmem>>, vector<1x128xbf16>
    %235 = arith.mulf %233, %233 : vector<16x128xf32>
    %cst_108 = arith.constant dense<0.000000e+00> : vector<16xf32>
    %236 = vector.multi_reduction <add>, %235, %cst_108 [1] : vector<16x128xf32> to vector<16xf32>
    %237 = vector.shape_cast %236 : vector<16xf32> to vector<16x1xf32>
    %cst_109 = arith.constant 1.280000e+02 : f32
    %238 = vector.broadcast %cst_109 : f32 to vector<16x1xf32>
    %239 = arith.divf %237, %238 : vector<16x1xf32>
    %cst_110 = arith.constant 9.99999997E-7 : f32
    %240 = vector.broadcast %cst_110 : f32 to vector<16x1xf32>
    %241 = arith.addf %239, %240 : vector<16x1xf32>
    %242 = math.rsqrt %241 : vector<16x1xf32>
    %243 = vector.broadcast %242 : vector<16x1xf32> to vector<16x128xf32>
    %244 = arith.mulf %233, %243 : vector<16x128xf32>
    %245 = arith.extf %234 : vector<1x128xbf16> to vector<1x128xf32>
    %246 = vector.broadcast %245 : vector<1x128xf32> to vector<16x128xf32>
    %247 = arith.mulf %244, %246 : vector<16x128xf32>
    %c0_111 = arith.constant 0 : index
    %c0_112 = arith.constant 0 : index
    %248 = vector.load %arg15[%c0_111, %c0_112] : memref<128x128xbf16, #tpu.memory_space<vmem>>, vector<128x128xbf16>
    %249 = arith.truncf %247 : vector<16x128xf32> to vector<16x128xbf16>
    %cst_113 = arith.constant dense<0.000000e+00> : vector<16x128xf32>
    %250 = tpu.matmul %249, %248, %cst_113 {dimension_numbers = #tpu.dot_dimension_numbers<[1], [0], [0], [1], [0, 0, 1, 1], [], []>} : vector<16x128xbf16>, vector<128x128xbf16>, vector<16x128xf32> -> vector<16x128xf32>
    %c0_114 = arith.constant 0 : index
    %c0_115 = arith.constant 0 : index
    %251 = vector.load %arg16[%c0_114, %c0_115] : memref<16x128xf32, #tpu.memory_space<vmem>>, vector<16x128xf32>
    tpu.vector_store %arg16[%c0_114, %c0_115], %250 {strides = array<i32>} : memref<16x128xf32, #tpu.memory_space<vmem>>, vector<16x128xf32>,
    return
  }
}

</mosaic_0001>

<bundles_post_ra>
// kernel: internvl_forward.2
= control target key start
LH: loop header
LB: loop body
LE: loop exit
PB: predicated region body
PF: predicated region fallthrough
CT: control target
= control target key end

     0   :  { %v2472_v0 = vmov 0   ;;  %vm169_vm0 = vcmask 523264   ;;  %vm2474_vm1 = vmmov 0   ;;  %vm585_vm2 = vcmask 261120   ;;  %s3134_s2 = inlined_call_operand.vmem [shape: bf16[192,64], index: 2, kind: input, shape index: {}]   ;;  %s3135_s0 = inlined_call_operand.vmem [shape: f32[32,192], index: 0, kind: input, shape index: {}]   ;;  %s3136_s1 = inlined_call_operand.vmem [shape: bf16[32,64], index: 1, kind: input, shape index: {}]   ;;  %s3137_s3 = inlined_call_operand.vmem [shape: f32[1,64], index: 3, kind: input, shape index: {}]   ;;  %s3138_s6 = inlined_call_operand.vmem [shape: bf16[6,64,32], index: 6, kind: input, shape index: {}]   ;;  %s3139_s4 = inlined_call_operand.vmem [shape: bf16[1,64], index: 4, kind: input, shape index: {}]   ;;  %s3140_s5 = inlined_call_operand.vmem [shape: bf16[1,64], index: 5, kind: input, shape index: {}]   ;;  %s3141_s7 = inlined_call_operand.vmem [shape: bf16[6,1,32], index: 7, kind: input, shape index: {}]   ;;  %s3142_s8 = inlined_call_operand.vmem [shape: bf16[64,64], index: 8, kind: input, shape index: {}]   ;;  %s3143_s9 = inlined_call_operand.vmem [shape: bf16[1,64], index: 9, kind: input, shape index: {}]   ;;  %s3144_s12 = inlined_call_operand.vmem [shape: bf16[64,256], index: 12, kind: input, shape index: {}]   ;;  %s3145_s10 = inlined_call_operand.vmem [shape: bf16[1,64], index: 10, kind: input, shape index: {}]   ;;  %s3146_s11 = inlined_call_operand.vmem [shape: bf16[1,64], index: 11, kind: input, shape index: {}]   ;;  %s3147_s14 = inlined_call_operand.vmem [shape: bf16[256,64], index: 14, kind: input, shape index: {}]   ;;  %s3148_s13 = inlined_call_operand.vmem [shape: bf16[1,256], index: 13, kind: input, shape index: {}]   ;;  %s3149_s15 = inlined_call_operand.vmem [shape: bf16[1,64], index: 15, kind: input, shape index: {}]   ;;  %s3150_s16 = inlined_call_operand.vmem [shape: bf16[32,128], index: 16, kind: output, shape index: {}]  }
   0x1   :  { %3152 = sst [smem:[#allocation2_spill]] %s3134_s2  ;;  %176 = vmatprep.subr.bf16.mxu0 %v2472_v0  ;;  %v55_v5 = vld [vmem:[%s3135_s0 + $0x8] sm:$0xff]  ;;  %v57_v6 = vld [vmem:[%s3135_s0 + $0x18] sm:$0xff]  ;;  %v54_v16 = vld [vmem:[%s3135_s0] sm:$0xff]  ;;  %vm635_vm3 = vcmask 130048   ;;  %s2475_s2 = smov 32  }
   0x2   :  { %s3153_s23 = sld [smem:[#allocation2_spill]]  ;;  %v87_v7 = vpack.c.bf16 %v57_v6, %v55_v5  ;;  %v56_v17 = vld [vmem:[%s3135_s0 + $0x10] sm:$0xff]  ;;  %v59_v18 = vld [vmem:[%s3135_s0 + $0x28] sm:$0xff]  ;;  %v61_v19 = vld [vmem:[%s3135_s0 + $0x38] sm:$0xff] }
   0x3   :  { %v86_v20 = vpack.c.bf16 %v56_v17, %v54_v16  ;;  %v89_v21 = vpack.c.bf16 %v61_v19, %v59_v18  ;;  %v58_v22 = vld [vmem:[%s3135_s0 + $0x20] sm:$0xff]  ;;  %v60_v23 = vld [vmem:[%s3135_s0 + $0x30] sm:$0xff]  ;;  %v2106_v34 = vld [vmem:[%s3136_s1 + $0x8] sm:$0xff]  }
   0x4   :  { %1957 = vmatprep.mubr.msk.bf16.mxu0 %vm169_vm0, %v87_v7  ;;  %v88_v24 = vpack.c.bf16 %v60_v23, %v58_v22  ;;  %v2089_v25 = vld [vmem:[%s3136_s1] sm:$0xff]   ;;  %v2094_v39 = vunpack.c.l.bf16 %v2106_v34  ;;  %v2095_v45 = vunpack.c.h.bf16 %v2106_v34  ;;  %v2360_v17 = vld [vmem:[%s3138_s6 + $0x58] sm:$0xff]   ;;  %v293_v23 = vlaneseq }
   0x5   :  { %v1944_v26 = vld [vmem:[%s3137_s3] ss:$0 sm:$0xff]  ;;  %v2090_v27 = vunpack.c.l.bf16 %v2089_v25  ;;  %v2091_v32 = vunpack.c.h.bf16 %v2089_v25 }
   0x6   :  { %v2359_v16 = vld [vmem:[%s3138_s6] sm:$0xff]  }
   0x8   :  { %v2340_v1 = vld [vmem:[%s3153_s23 + $0x38] sm:$0xff]   ;;  %v2341_v2 = vld [vmem:[%s3153_s23 + $0x30] sm:$0xff]   ;;  %v2342_v3 = vld [vmem:[%s3153_s23 + $0x28] sm:$0xff]  }
   0x9   :  { %177 = vmatpush1.bf16.msra.mxu0 %v2340_v1  ;;  %v2343_v4 = vld [vmem:[%s3153_s23 + $0x20] sm:$0xff]   ;;  %v2344_v8 = vld [vmem:[%s3153_s23 + $0x18] sm:$0xff]   ;;  %v2345_v9 = vld [vmem:[%s3153_s23 + $0x10] sm:$0xff]  }
   0xa   :  { %178 = vmatprep.subr.bf16.mxu0 %v2472_v0  ;;  %v2346_v10 = vld [vmem:[%s3153_s23 + $0x8] sm:$0xff]   ;;  %v2347_v11 = vld [vmem:[%s3153_s23] sm:$0xff]   ;;  %v2348_v12 = vld [vmem:[%s3153_s23 + $0x58] sm:$0xff]  }
   0xb   :  { %v2349_v13 = vld [vmem:[%s3153_s23 + $0x50] sm:$0xff]   ;;  %v2350_v14 = vld [vmem:[%s3153_s23 + $0x48] sm:$0xff]   ;;  %v2351_v15 = vld [vmem:[%s3153_s23 + $0x40] sm:$0xff]  }
   0xd   :  { %179 = vmatpush1.bf16.msra.mxu0 %v2341_v2 }
   0xe   :  { %180 = vmatprep.subr.bf16.mxu0 %v2472_v0 }
  0x11   :  { %181 = vmatpush1.bf16.msra.mxu0 %v2342_v3 }
  0x12   :  { %182 = vmatprep.subr.bf16.mxu0 %v2472_v0 }
  0x15   :  { %183 = vmatpush1.bf16.msra.mxu0 %v2343_v4 }
  0x16   :  { %184 = vmatprep.subr.bf16.mxu0 %v2472_v0 }
  0x19   :  { %185 = vmatpush1.bf16.msra.mxu0 %v2344_v8 }
  0x1a   :  { %186 = vmatprep.subr.bf16.mxu0 %v2472_v0 }
  0x1d   :  { %187 = vmatpush1.bf16.msra.mxu0 %v2345_v9  ;;  %v2352_v9 = vld [vmem:[%s3138_s6 + $0x38] sm:$0xff]  }
  0x1e   :  { %188 = vmatprep.subr.bf16.mxu0 %v2472_v0  ;;  %2206 = vmatprep.subr.bf16.mxu1 %v2352_v9 }
  0x1f   :  { %2207 = vmatpush3.bf16.msra.mxu1 %v2352_v9 }
  0x21   :  { %189 = vmatpush1.bf16.msra.mxu0 %v2346_v10  ;;  %v2353_v10 = vld [vmem:[%s3138_s6 + $0x18] sm:$0xff]  }
  0x22   :  { %190 = vmatprep.subr.bf16.mxu0 %v2472_v0 }
  0x25   :  { %191 = vmatpush1.bf16.msra.mxu0 %v2347_v11  ;;  %v2354_v11 = vld [vmem:[%s3138_s6 + $0x30] sm:$0xff]  }
  0x26   :  { %200 = vmatprep.subr.bf16.mxu0 %v2472_v0  ;;  %2208 = vmatprep.subr.bf16.mxu1 %v2354_v11 }
  0x27   :  { %2209 = vmatpush3.bf16.msra.mxu1 %v2354_v11 }
  0x29   :  { %201 = vmatpush2.bf16.msra.mxu0 %v2348_v12  ;;  %v2355_v12 = vld [vmem:[%s3138_s6 + $0x10] sm:$0xff]  }
  0x2a   :  { %202 = vmatprep.subr.bf16.mxu0 %v2472_v0 }
  0x2d   :  { %203 = vmatpush2.bf16.msra.mxu0 %v2349_v13  ;;  %v2356_v13 = vld [vmem:[%s3138_s6 + $0x28] sm:$0xff]  }
  0x2e   :  { %204 = vmatprep.subr.bf16.mxu0 %v2472_v0  ;;  %2210 = vmatprep.subr.bf16.mxu1 %v2356_v13 }
  0x2f   :  { %2211 = vmatpush3.bf16.msra.mxu1 %v2356_v13  ;;  %v1988_v13 = vld [vmem:[%s3141_s7 + $0x2] sm:$0x1] }
  0x31   :  { %205 = vmatpush2.bf16.msra.mxu0 %v2350_v14  ;;  %v2357_v14 = vld [vmem:[%s3138_s6 + $0x8] sm:$0xff]  }
  0x32   :  { %206 = vmatprep.subr.bf16.mxu0 %v2472_v0 }
  0x35   :  { %207 = vmatpush2.bf16.msra.mxu0 %v2351_v15  ;;  %v2358_v15 = vld [vmem:[%s3138_s6 + $0x20] sm:$0xff]  }
  0x36   :  { %2194 = vmatprep.subr.bf16.mxu0 %v2353_v10  ;;  %2212 = vmatprep.subr.bf16.mxu1 %v2358_v15 }
  0x37   :  { %2213 = vmatpush3.bf16.msra.mxu1 %v2358_v15 }
  0x38   :  { %209 = vmatmul.mubr.bf16.vlgmr.msra.gmra.mxu0 %v86_v20  ;;  %2218 = vmatprep.subr.bf16.mxu1 %v2360_v17 }
  0x39   :  { %1958 = vmatprep.mubr.msk.bf16.mxu0 %vm169_vm0, %v89_v21  ;;  %2195 = vmatpush3.bf16.msra.mxu0 %v2353_v10 }
  0x3a   :  { %2196 = vmatprep.subr.bf16.mxu0 %v2355_v12 }
  0x3d   :  { %2197 = vmatpush3.bf16.msra.mxu0 %v2355_v12 }
  0x3e   :  { %2198 = vmatprep.subr.bf16.mxu0 %v2357_v14 }
  0x40   :  { %217 = vmatmul.mubr.bf16.gmra.mxu0 %v88_v24 }
  0x41   :  { %2199 = vmatpush3.bf16.msra.mxu0 %v2357_v14 }
  0x42   :  { %2200 = vmatprep.subr.bf16.mxu0 %v2359_v16 }
  0x45   :  { %2201 = vmatpush3.bf16.msra.mxu0 %v2359_v16 }
  0xf8   :  { %v210_v28 = vpop.f32.mrf.mxu0 }
  0xf9   :  { %v211_v29 = vadd.f32 %v1944_v26, %v210_v28 }
  0xfa   :  { %v212_v30 = vpop.f32.mrf.mxu0 }
  0xfb   :  { %v2641_v31 = vadd.f32 %v2090_v27, %v211_v29  ;;  %v2711_v27 = vshrl.u32 %v293_v23, 7  ;;  %v237_v29 = vld [vmem:[%s3139_s4] sm:$0x1] }
  0xfc   :  { %v213_v33 = vpop.f32.mrf.mxu0 }
  0xfd   :  { %v214_v35 = vadd.f32 %v1944_v26, %v213_v33  ;;  %v239_v36 = vsel %vm169_vm0, %v2641_v31, 0.0  ;;  %v292_v33 = vunpack.c.l.bf16 %v237_v29  ;;  %v2717_v34 = vsub.s32 0, %v2711_v27 }
  0xfe   :  { %v215_v37 = vpop.f32.mrf.mxu0  ;;  %240 = vadd.xlane.f32.xlu0 %v239_v36  ;;  %v238_v36 = vld [vmem:[%s3140_s5] sm:$0x1] }
  0xff   :  { %v2648_v38 = vadd.f32 %v2091_v32, %v214_v35 }
 0x100   :  { %v218_v40 = vpop.f32.mrf.mxu0 }
 0x101   :  { %v219_v41 = vadd.f32 %v1944_v26, %v218_v40  ;;  %v242_v42 = vsel %vm169_vm0, %v2648_v38, 0.0 }
 0x102   :  { %v220_v43 = vpop.f32.mrf.mxu0  ;;  %243 = vadd.xlane.f32.xlu0 %v242_v42 }
 0x103   :  { %v2652_v44 = vadd.f32 %v2094_v39, %v219_v41  ;;  %v296_v39 = vrot.slane %v292_v33, %v2717_v34  ;;  %v301_v41 = vunpack.c.l.bf16 %v238_v36  ;;  %v2364_v33 = vld [vmem:[%s3138_s6 + $0x78] sm:$0xff]  }
 0x104   :  { %v221_v46 = vpop.f32.mrf.mxu0 }
 0x105   :  { %v222_v47 = vadd.f32 %v1944_v26, %v221_v46  ;;  %v245_v48 = vsel %vm169_vm0, %v2652_v44, 0.0  ;;  %v305_v46 = vrot.slane %v301_v41, %v2717_v34 }
 0x106   :  { %v223_v49 = vpop.f32.mrf.mxu0  ;;  %246 = vadd.xlane.f32.xlu1 %v245_v48 }
 0x107   :  { %v2656_v50 = vadd.f32 %v2095_v45, %v222_v47 }
 0x109   :  { %v248_v51 = vsel %vm169_vm0, %v2656_v50, 0.0 }
 0x10a   :  { %249 = vadd.xlane.f32.xlu1 %v248_v51 }
 0x187   :  { %v241_v52 = vpop.xlane.xlu0 %240 }
 0x188   :  { %v252_v53 = vmul.f32 0.015625, %v241_v52 }
 0x18a   :  { %v2661_v54 = vsub.f32 %v2641_v31, %v252_v53 }
 0x18b   :  { %v244_v55 = vpop.xlane.xlu0 %243 }
 0x18c   :  { %v253_v56 = vmul.f32 0.015625, %v244_v55  ;;  %v260_v57 = vmul.f32 %v2661_v54, %v2661_v54 }
 0x18e   :  { %v2666_v58 = vsub.f32 %v2648_v38, %v253_v56  ;;  %v264_v59 = vsel %vm169_vm0, %v260_v57, 0.0 }
 0x18f   :  { %v247_v60 = vpop.xlane.xlu1 %246  ;;  %265 = vadd.xlane.f32.xlu0 %v264_v59 }
 0x190   :  { %v254_v61 = vmul.f32 0.015625, %v247_v60  ;;  %v261_v62 = vmul.f32 %v2666_v58, %v2666_v58 }
 0x192   :  { %v2672_v63 = vsub.f32 %v2652_v44, %v254_v61  ;;  %v267_v1 = vsel %vm169_vm0, %v261_v62, 0.0  ;;  %v2361_v61 = vld [vmem:[%s3138_s6 + $0x50] sm:$0xff]   ;;  %v2362_v62 = vld [vmem:[%s3138_s6 + $0x48] sm:$0xff]  }
 0x193   :  { %v250_v2 = vpop.xlane.xlu1 %249  ;;  %268 = vadd.xlane.f32.xlu1 %v267_v1  ;;  %v2473_v1 = vmov 0.0  }
 0x194   :  { %v255_v3 = vmul.f32 0.015625, %v250_v2  ;;  %v262_v4 = vmul.f32 %v2672_v63, %v2672_v63  ;;  %2236 = vmatprep.subr.bf16.mxu0 %v2473_v1  ;;  %v1973_v2 = vld [vmem:[%s3141_s7 + $0x1] sm:$0x1] }
 0x196   :  { %v2678_v5 = vsub.f32 %v2656_v50, %v255_v3  ;;  %v270_v6 = vsel %vm169_vm0, %v262_v4, 0.0 }
 0x197   :  { %271 = vadd.xlane.f32.xlu0 %v270_v6 }
 0x198   :  { %v263_v7 = vmul.f32 %v2678_v5, %v2678_v5 }
 0x19a   :  { %v273_v8 = vsel %vm169_vm0, %v263_v7, 0.0 }
 0x19b   :  { %274 = vadd.xlane.f32.xlu1 %v273_v8  ;;  %v320_v8 = vld [vmem:[%s3141_s7] sm:$0x1] }
 0x19c   :  { %v321_v14 = vunpack.c.l.bf16 %v320_v8 }
 0x218   :  { %v266_v18 = vpop.xlane.xlu0 %265 }
 0x219   :  { %v276_v19 = vmul.f32 0.015625, %v266_v18  ;;  %v505_v18 = vunpack.c.l.bf16 %v1988_v13 }
 0x21b   :  { %v280_v20 = vadd.f32 1e-06, %v276_v19 }
 0x21c   :  { %v269_v21 = vpop.xlane.xlu1 %268 }
 0x21d   :  { %2408 = vrsqrt.f32 %v280_v20  ;;  %v277_v22 = vmul.f32 0.015625, %v269_v21  ;;  %v325_v20 = vrot.slane %v321_v14, %v2717_v34 }
 0x21f   :  { %v281_v24 = vadd.f32 1e-06, %v277_v22 }
 0x220   :  { %v272_v25 = vpop.xlane.xlu0 %271 }
 0x221   :  { %2410 = vrsqrt.f32 %v281_v24  ;;  %v278_v26 = vmul.f32 0.015625, %v272_v25  ;;  %v509_v25 = vrot.slane %v505_v18, %v2717_v34 }
 0x223   :  { %v282_v28 = vadd.f32 1e-06, %v278_v26 }
 0x224   :  { %v275_v30 = vpop.xlane.xlu1 %274 }
 0x225   :  { %2412 = vrsqrt.f32 %v282_v28  ;;  %v279_v32 = vmul.f32 0.015625, %v275_v30 }
 0x227   :  { %v283_v35 = vadd.f32 1e-06, %v279_v32 }
 0x229   :  { %2414 = vrsqrt.f32 %v283_v35 }
 0x22a   :  { %v2409_v37 = vpop.eup %2408 }
 0x22b   :  { %v288_v40 = vmul.f32 %v2409_v37, %v2661_v54 }
 0x22d   :  { %v297_v43 = vmul.f32 %v296_v39, %v288_v40 }
 0x22e   :  { %v2411_v42 = vpop.eup %2410 }
 0x22f   :  { %v289_v45 = vmul.f32 %v2411_v42, %v2666_v58  ;;  %v306_v51 = vadd.f32 %v305_v46, %v297_v43 }
 0x231   :  { %v298_v47 = vmul.f32 %v296_v39, %v289_v45 }
 0x232   :  { %v2413_v48 = vpop.eup %2412 }
 0x233   :  { %v290_v49 = vmul.f32 %v2413_v48, %v2672_v63  ;;  %v307_v52 = vadd.f32 %v305_v46, %v298_v47  ;;  %v2363_v63 = vld [vmem:[%s3138_s6 + $0x40] sm:$0xff]  }
 0x235   :  { %v2727_v53 = vpack.c.bf16 %v307_v52, %v306_v51  ;;  %v299_v56 = vmul.f32 %v296_v39, %v290_v49  ;;  %v2365_v49 = vld [vmem:[%s3138_s6 + $0x70] sm:$0xff]   ;;  %v2366_v51 = vld [vmem:[%s3138_s6 + $0x68] sm:$0xff]   ;;  %v2367_v52 = vld [vmem:[%s3138_s6 + $0x60] sm:$0xff]  }
 0x236   :  { %v2415_v55 = vpop.eup %2414 }
 0x237   :  { %v291_v57 = vmul.f32 %v2415_v55, %v2678_v5  ;;  %2202 = vmatprep.mubr.msk.bf16.mxu0 %vm169_vm0, %v2727_v53  ;;  %2214 = vmatprep.mubr.msk.bf16.mxu1 %vm169_vm0, %v2727_v53  ;;  %v308_v58 = vadd.f32 %v305_v46, %v299_v56  ;;  %v416_v5 = vunpack.c.l.bf16 %v1973_v2  ;;  %v2368_v55 = vld [vmem:[%s3138_s6 + $0xb8] sm:$0xff]   ;;  %v2369_v56 = vld [vmem:[%s3138_s6 + $0xb0] sm:$0xff]  }
 0x239   :  { %v300_v54 = vmul.f32 %v296_v39, %v291_v57  ;;  %v420_v10 = vrot.slane %v416_v5, %v2717_v34  ;;  %v2370_v57 = vld [vmem:[%s3138_s6 + $0xa8] sm:$0xff]  }
 0x23b   :  { %v309_v59 = vadd.f32 %v305_v46, %v300_v54  ;;  %v2371_v54 = vld [vmem:[%s3138_s6 + $0xa0] sm:$0xff]  }
 0x23d   :  { %v2734_v60 = vpack.c.bf16 %v309_v59, %v308_v58 }
 0x23f   :  { %2203 = vmatmul.mubr.msk.bf16.vlgmr.msra.gmra.mxu0 %vm169_vm0, %v2734_v60  ;;  %2215 = vmatmul.mubr.msk.bf16.vlgmr.msra.gmra.mxu1 %vm169_vm0, %v2734_v60 }
 0x240   :  { %2219 = vmatpush3.bf16.msra.mxu1 %v2360_v17  ;;  %2226 = vmatprep.mubr.msk.bf16.mxu1 %vm169_vm0, %v2727_v53 }
 0x241   :  { %2220 = vmatprep.subr.bf16.mxu1 %v2361_v61  ;;  %2238 = vmatprep.mubr.msk.bf16.mxu0 %vm2474_vm1, %v2473_v1 }
 0x244   :  { %2221 = vmatpush3.bf16.msra.mxu1 %v2361_v61 }
 0x245   :  { %2222 = vmatprep.subr.bf16.mxu1 %v2362_v62 }
 0x248   :  { %2223 = vmatpush3.bf16.msra.mxu1 %v2362_v62 }
 0x249   :  { %2224 = vmatprep.subr.bf16.mxu1 %v2363_v63 }
 0x24c   :  { %2225 = vmatpush3.bf16.msra.mxu1 %v2363_v63 }
 0x24d   :  { %2230 = vmatprep.subr.bf16.mxu1 %v2473_v1 }
 0x24f   :  { %2227 = vmatmul.mubr.msk.bf16.vlgmr.msra.gmra.mxu1 %vm169_vm0, %v2734_v60 }
 0x250   :  { %2232 = vmatprep.mubr.msk.bf16.mxu1 %vm2474_vm1, %v2473_v1 }
 0x2ff   :  { %v2204_v3 = vpop.f32.mrf.mxu0  ;;  %v2216_v4 = vpop.f32.mrf.mxu1 }
 0x300   :  { %v488_v23 = vadd.f32 %v2216_v4, %v420_v10  ;;  %v399_v42 = vadd.f32 %v2204_v3, %v325_v20 }
 0x301   :  { %v390_v6 = vpop.f32.mrf.mxu0  ;;  %v479_v7 = vpop.f32.mrf.mxu1 }
 0x302   :  { %v480_v15 = vadd.f32 %v479_v7, %v420_v10  ;;  %v391_v26 = vadd.f32 %v390_v6, %v325_v20 }
 0x303   :  { %v2217_v9 = vpop.f32.mrf.mxu1  ;;  %v2205_v11 = vpop.f32.mrf.mxu0 }
 0x304   :  { %v491_v21 = vadd.f32 %v2217_v9, %v420_v10  ;;  %v402_v39 = vadd.f32 %v2205_v11, %v325_v20 }
 0x305   :  { %v482_v12 = vpop.f32.mrf.mxu1  ;;  %v393_v19 = vpop.f32.mrf.mxu0 }
 0x306   :  { %v483_v16 = vadd.f32 %v482_v12, %v420_v10  ;;  %v394_v24 = vadd.f32 %v393_v19, %v325_v20  ;;  %v705_v28 = vpack.c.bf16 %v491_v21, %v488_v23  ;;  %v704_v47 = vpack.c.bf16 %v402_v39, %v399_v42 }
 0x308   :  { %v584_v17 = vpack.c.bf16 %v483_v16, %v480_v15  ;;  %v583_v30 = vpack.c.bf16 %v394_v24, %v391_v26  ;;  %v710_v36 = vsel %vm585_vm2, %v705_v28, 0  ;;  %v2037_v15 = vld [vmem:[%s3141_s7 + $0x5] sm:$0x1] }
 0x309   :  { %v1012_v16 = vunpack.c.l.bf16 %v2037_v15 }
 0x30a   :  { %v590_v22 = vsel %vm585_vm2, %v584_v17, 0 }
 0x30b   :  { %2231 = vmatpush3.bf16.xpose.msra.mxu1 %v590_v22  ;;  %v2834_v18 = vrot.slane %v1012_v16, %v2717_v34 }
 0x30c   :  { %2242 = vmatprep.subr.bf16.mxu1 %v2473_v1 }
 0x30f   :  { %v2228_v29 = vpop.f32.mrf.mxu1 }
 0x310   :  { %v2773_v32 = vadd.f32 %v2228_v29, %v509_v25 }
 0x311   :  { %v568_v35 = vpop.f32.mrf.mxu1 }
 0x312   :  { %2233 = vmatmul.mubr.msk.bf16.vlgmr.msra.gmra.mxu1 %vm585_vm2, %v583_v30  ;;  %v569_v43 = vadd.f32 %v568_v35, %v509_v25 }
 0x313   :  { %v2229_v37 = vpop.f32.mrf.mxu1  ;;  %2243 = vmatpush3.bf16.xpose.msra.mxu1 %v710_v36  ;;  %2244 = vmatprep.mubr.msk.bf16.mxu1 %vm2474_vm1, %v2473_v1 }
 0x314   :  { %v2782_v40 = vadd.f32 %v2229_v37, %v509_v25  ;;  %2254 = vmatprep.subr.bf16.mxu1 %v2364_v33 }
 0x315   :  { %v571_v41 = vpop.f32.mrf.mxu1 }
 0x316   :  { %v778_v45 = vpack.c.bf16 %v2782_v40, %v2773_v32  ;;  %v572_v46 = vadd.f32 %v571_v41, %v509_v25  ;;  %v2374_v32 = vld [vmem:[%s3138_s6 + $0x88] sm:$0xff]   ;;  %v2375_v40 = vld [vmem:[%s3138_s6 + $0x80] sm:$0xff]  }
 0x318   :  { %v659_v48 = vpack.c.bf16 %v572_v46, %v569_v43 }
 0x31a   :  { %2237 = vmatpush3.bf16.msra.mxu0 %v659_v48  ;;  %2245 = vmatmul.mubr.msk.bf16.vlgmr.msra.gmra.mxu1 %vm585_vm2, %v704_v47 }
 0x31b   :  { %2255 = vmatpush3.bf16.msra.mxu1 %v2364_v33  ;;  %2262 = vmatprep.mubr.msk.bf16.mxu1 %vm169_vm0, %v2727_v53 }
 0x31c   :  { %2256 = vmatprep.subr.bf16.mxu1 %v2365_v49  ;;  %2248 = vmatprep.subr.bf16.mxu0 %v2473_v1 }
 0x31f   :  { %2257 = vmatpush3.bf16.msra.mxu1 %v2365_v49 }
 0x320   :  { %2258 = vmatprep.subr.bf16.mxu1 %v2366_v51 }
 0x323   :  { %2259 = vmatpush3.bf16.msra.mxu1 %v2366_v51 }
 0x324   :  { %2260 = vmatprep.subr.bf16.mxu1 %v2367_v52 }
 0x327   :  { %2261 = vmatpush3.bf16.msra.mxu1 %v2367_v52 }
 0x328   :  { %2278 = vmatprep.subr.bf16.mxu1 %v2368_v55 }
 0x32a   :  { %2263 = vmatmul.mubr.msk.bf16.vlgmr.msra.gmra.mxu1 %vm169_vm0, %v2734_v60 }
 0x32b   :  { %2279 = vmatpush3.bf16.msra.mxu1 %v2368_v55  ;;  %2286 = vmatprep.mubr.msk.bf16.mxu1 %vm169_vm0, %v2727_v53 }
 0x32c   :  { %2280 = vmatprep.subr.bf16.mxu1 %v2369_v56 }
 0x32f   :  { %2281 = vmatpush3.bf16.msra.mxu1 %v2369_v56 }
 0x330   :  { %2282 = vmatprep.subr.bf16.mxu1 %v2370_v57 }
 0x333   :  { %2283 = vmatpush3.bf16.msra.mxu1 %v2370_v57 }
 0x334   :  { %2284 = vmatprep.subr.bf16.mxu1 %v2371_v54 }
 0x337   :  { %2285 = vmatpush3.bf16.msra.mxu1 %v2371_v54 }
 0x338   :  { %2302 = vmatprep.subr.bf16.mxu1 %v2473_v1 }
 0x33a   :  { %2287 = vmatmul.mubr.msk.bf16.vlgmr.msra.gmra.mxu1 %vm169_vm0, %v2734_v60 }
 0x33b   :  { %2304 = vmatprep.mubr.msk.bf16.mxu1 %vm2474_vm1, %v2473_v1 }
 0x3d2   :  { %v626_v58 = vpop.f32.mrf.mxu1 }
 0x3d3   :  { %v633_v59 = vmul.f32 0.17677669, %v626_v58 }
 0x3d4   :  { %v2234_v61 = vpop.f32.mrf.mxu1 }
 0x3d5   :  { %v636_v62 = vsel %vm635_vm3, %v633_v59, -inf }
 0x3d6   :  { %637 = vmax.xlane.f32.xlu0 %v636_v62  ;;  %v629_v63 = vpop.f32.mrf.mxu1 }
 0x3d7   :  { %v634_v2 = vmul.f32 0.17677669, %v629_v63 }
 0x3d8   :  { %v2235_v3 = vpop.f32.mrf.mxu1 }
 0x3d9   :  { %v639_v4 = vsel %vm635_vm3, %v634_v2, -inf }
 0x3da   :  { %640 = vmax.xlane.f32.xlu1 %v639_v4  ;;  %v746_v5 = vpop.f32.mrf.mxu1  ;;  %v2372_v4 = vld [vmem:[%s3138_s6 + $0x98] sm:$0xff]  }
 0x3db   :  { %v753_v6 = vmul.f32 0.17677669, %v746_v5 }
 0x3dc   :  { %v2246_v7 = vpop.f32.mrf.mxu1 }
 0x3dd   :  { %v755_v8 = vsel %vm635_vm3, %v753_v6, -inf }
 0x3de   :  { %756 = vmax.xlane.f32.xlu0 %v755_v8  ;;  %v749_v9 = vpop.f32.mrf.mxu1 }
 0x3df   :  { %v754_v10 = vmul.f32 0.17677669, %v749_v9 }
 0x3e0   :  { %v2247_v11 = vpop.f32.mrf.mxu1 }
 0x3e1   :  { %v758_v12 = vsel %vm635_vm3, %v754_v10, -inf }
 0x3e2   :  { %759 = vmax.xlane.f32.xlu1 %v758_v12 }
 0x3ea   :  { %v2824_v13 = vpop.f32.mrf.mxu1 }
 0x3ec   :  { %v2826_v14 = vpop.f32.mrf.mxu1 }
 0x3ee   :  { %v2831_v17 = vpop.f32.mrf.mxu1 }
 0x3f0   :  { %v2836_v19 = vpop.f32.mrf.mxu1 }
 0x3fa   :  { %v2288_v20 = vpop.f32.mrf.mxu1 }
 0x3fb   :  { %v2839_v21 = vadd.f32 %v2288_v20, %v2834_v18 }
 0x3fc   :  { %v2841_v22 = vpop.f32.mrf.mxu1 }
 0x3fe   :  { %v2289_v23 = vpop.f32.mrf.mxu1 }
 0x3ff   :  { %v2844_v24 = vadd.f32 %v2289_v23, %v2834_v18 }
 0x401   :  { %v1283_v25 = vpack.c.bf16 %v2844_v24, %v2839_v21  ;;  %v2377_v21 = vld [vmem:[%s3142_s8 + $0x10] sm:$0xff]  }
 0x45f   :  { %v638_v26 = vpop.xlane.xlu0 %637 }
 0x460   :  { %v642_v28 = vsub.f32 %v633_v59, %v638_v26  ;;  %v2022_v26 = vld [vmem:[%s3141_s7 + $0x4] sm:$0x1] }
 0x462   :  { %v644_v29 = vmul.f32 1.442695, %v642_v28 }
 0x463   :  { %v641_v30 = vpop.xlane.xlu1 %640 }
 0x464   :  { %2416 = vpow2.f32 %v644_v29  ;;  %v643_v33 = vsub.f32 %v634_v2, %v641_v30  ;;  %v2007_v30 = vld [vmem:[%s3141_s7 + $0x3] sm:$0x1] }
 0x466   :  { %v646_v35 = vmul.f32 1.442695, %v643_v33 }
 0x467   :  { %v757_v36 = vpop.xlane.xlu0 %756 }
 0x468   :  { %2418 = vpow2.f32 %v646_v35  ;;  %v761_v37 = vsub.f32 %v753_v6, %v757_v36  ;;  %v834_v36 = vunpack.c.l.bf16 %v2007_v30 }
 0x46a   :  { %v763_v39 = vmul.f32 1.442695, %v761_v37 }
 0x46b   :  { %v760_v41 = vpop.xlane.xlu1 %759 }
 0x46c   :  { %2420 = vpow2.f32 %v763_v39  ;;  %v762_v42 = vsub.f32 %v754_v10, %v760_v41  ;;  %v2373_v10 = vld [vmem:[%s3138_s6 + $0x90] sm:$0xff]  }
 0x46e   :  { %v765_v43 = vmul.f32 1.442695, %v762_v42 }
 0x470   :  { %2422 = vpow2.f32 %v765_v43 }
 0x471   :  { %v2417_v46 = vpop.eup %2416 }
 0x472   :  { %v648_v47 = vsel %vm635_vm3, %v2417_v46, 0.0 }
 0x473   :  { %649 = vadd.xlane.f32.xlu0 %v648_v47  ;;  %v838_v47 = vrot.slane %v834_v36, %v2717_v34 }
 0x475   :  { %v2419_v48 = vpop.eup %2418 }
 0x476   :  { %v651_v49 = vsel %vm635_vm3, %v2419_v48, 0.0 }
 0x477   :  { %652 = vadd.xlane.f32.xlu1 %v651_v49 }
 0x479   :  { %v2421_v51 = vpop.eup %2420 }
 0x47a   :  { %v767_v52 = vsel %vm635_vm3, %v2421_v51, 0.0 }
 0x47b   :  { %768 = vadd.xlane.f32.xlu0 %v767_v52  ;;  %v1078_v52 = vpop.f32.mrf.mxu1 }
 0x47d   :  { %v2423_v55 = vpop.eup %2422 }
 0x47e   :  { %v770_v56 = vsel %vm635_vm3, %v2423_v55, 0.0 }
 0x47f   :  { %771 = vadd.xlane.f32.xlu1 %v770_v56  ;;  %v906_v56 = vadd.f32 %v2824_v13, %v838_v47 }
 0x4fc   :  { %v650_v57 = vpop.xlane.xlu0 %649 }
 0x4fd   :  { %2424 = vrcp.f32 %v650_v57  ;;  %v901_v57 = vadd.f32 %v2836_v19, %v838_v47 }
 0x500   :  { %v653_v54 = vpop.xlane.xlu1 %652 }
 0x501   :  { %2426 = vrcp.f32 %v653_v54  ;;  %v1079_v54 = vadd.f32 %v1078_v52, %v2834_v18 }
 0x504   :  { %v769_v58 = vpop.xlane.xlu0 %768 }
 0x505   :  { %2428 = vrcp.f32 %v769_v58  ;;  %v898_v58 = vadd.f32 %v2826_v14, %v838_v47 }
 0x508   :  { %v772_v59 = vpop.xlane.xlu1 %771 }
 0x509   :  { %2430 = vrcp.f32 %v772_v59 }
 0x50a   :  { %v2425_v61 = vpop.eup %2424 }
 0x50b   :  { %v656_v63 = vmul.f32 %v2425_v61, %v2417_v46  ;;  %v1076_v61 = vadd.f32 %v2841_v22, %v2834_v18 }
 0x50e   :  { %v2427_v62 = vpop.eup %2426 }
 0x50f   :  { %v657_v2 = vmul.f32 %v2427_v62, %v2419_v48  ;;  %v1090_v62 = vpack.c.bf16 %v901_v57, %v898_v58 }
 0x511   :  { %v658_v3 = vpack.c.bf16 %v657_v2, %v656_v63 }
 0x512   :  { %v2429_v5 = vpop.eup %2428 }
 0x513   :  { %2239 = vmatmul.mubr.msk.bf16.vlgmr.msra.gmra.mxu0 %vm635_vm3, %v658_v3  ;;  %v775_v7 = vmul.f32 %v2429_v5, %v2421_v51  ;;  %v909_v51 = vadd.f32 %v2831_v17, %v838_v47  ;;  %v1164_v17 = vpack.c.bf16 %v1079_v54, %v1076_v61 }
 0x514   :  { %2249 = vmatpush3.bf16.msra.mxu0 %v778_v45  ;;  %2250 = vmatprep.mubr.msk.bf16.mxu0 %vm2474_vm1, %v2473_v1 }
 0x515   :  { %2266 = vmatprep.subr.bf16.mxu0 %v2372_v4  ;;  %v1209_v59 = vpack.c.bf16 %v909_v51, %v906_v56 }
 0x516   :  { %v2431_v6 = vpop.eup %2430 }
 0x517   :  { %v776_v8 = vmul.f32 %v2431_v6, %v2423_v55 }
 0x519   :  { %v777_v9 = vpack.c.bf16 %v776_v8, %v775_v7 }
 0x51b   :  { %2251 = vmatmul.mubr.msk.bf16.vlgmr.msra.gmra.mxu0 %vm635_vm3, %v777_v9 }
 0x51c   :  { %2267 = vmatpush3.bf16.msra.mxu0 %v2372_v4  ;;  %2274 = vmatprep.mubr.msk.bf16.mxu0 %vm169_vm0, %v2727_v53 }
 0x51d   :  { %2268 = vmatprep.subr.bf16.mxu0 %v2373_v10 }
 0x520   :  { %2269 = vmatpush3.bf16.msra.mxu0 %v2373_v10 }
 0x521   :  { %2270 = vmatprep.subr.bf16.mxu0 %v2374_v32 }
 0x524   :  { %2271 = vmatpush3.bf16.msra.mxu0 %v2374_v32 }
 0x525   :  { %2272 = vmatprep.subr.bf16.mxu0 %v2375_v40 }
 0x528   :  { %2273 = vmatpush3.bf16.msra.mxu0 %v2375_v40 }
 0x529   :  { %2290 = vmatprep.subr.bf16.mxu0 %v2473_v1 }
 0x52b   :  { %2275 = vmatmul.mubr.msk.bf16.vlgmr.msra.gmra.mxu0 %vm169_vm0, %v2734_v60  ;;  %v923_v60 = vunpack.c.l.bf16 %v2022_v26 }
 0x52c   :  { %2292 = vmatprep.mubr.msk.bf16.mxu0 %vm2474_vm1, %v2473_v1 }
 0x52d   :  { %v927_v29 = vrot.slane %v923_v60, %v2717_v34 }
 0x5d3   :  { %v2878_v53 = vpop.f32.mrf.mxu0 }
 0x5d5   :  { %v2240_v45 = vpop.f32.mrf.mxu0 }
 0x5d7   :  { %v2880_v11 = vpop.f32.mrf.mxu0 }
 0x5d9   :  { %v2241_v12 = vpop.f32.mrf.mxu0 }
 0x5db   :  { %v2882_v15 = vpop.f32.mrf.mxu0 }
 0x5dd   :  { %v2252_v16 = vpop.f32.mrf.mxu0 }
 0x5df   :  { %v2884_v20 = vpop.f32.mrf.mxu0 }
 0x5e1   :  { %v2253_v23 = vpop.f32.mrf.mxu0 }
 0x5eb   :  { %v2276_v28 = vpop.f32.mrf.mxu0 }
 0x5ec   :  { %v995_v37 = vadd.f32 %v2276_v28, %v927_v29 }
 0x5ed   :  { %v986_v33 = vpop.f32.mrf.mxu0 }
 0x5ee   :  { %v987_v42 = vadd.f32 %v986_v33, %v927_v29 }
 0x5ef   :  { %v2277_v35 = vpop.f32.mrf.mxu0 }
 0x5f0   :  { %v998_v39 = vadd.f32 %v2277_v35, %v927_v29 }
 0x5f1   :  { %v989_v41 = vpop.f32.mrf.mxu0 }
 0x5f2   :  { %v1210_v43 = vpack.c.bf16 %v998_v39, %v995_v37  ;;  %v990_v46 = vadd.f32 %v989_v41, %v927_v29 }
 0x5f4   :  { %v1091_v48 = vpack.c.bf16 %v990_v46, %v987_v42  ;;  %v1215_v49 = vsel %vm585_vm2, %v1210_v43, 0 }
 0x5f5   :  { %2303 = vmatpush3.bf16.xpose.msra.mxu1 %v1215_v49 }
 0x5f6   :  { %v1096_v55 = vsel %vm585_vm2, %v1091_v48, 0 }
 0x5f7   :  { %2291 = vmatpush3.bf16.xpose.msra.mxu0 %v1096_v55 }
 0x5f8   :  { %2296 = vmatprep.subr.bf16.mxu0 %v2473_v1 }
 0x5fc   :  { %2305 = vmatmul.mubr.msk.bf16.vlgmr.msra.gmra.mxu1 %vm585_vm2, %v1209_v59 }
 0x5fe   :  { %2293 = vmatmul.mubr.msk.bf16.vlgmr.msra.gmra.mxu0 %vm585_vm2, %v1090_v62 }
 0x5ff   :  { %2297 = vmatpush3.bf16.msra.mxu0 %v1164_v17  ;;  %2298 = vmatprep.mubr.msk.bf16.mxu0 %vm2474_vm1, %v2473_v1 }
 0x600   :  { %2308 = vmatprep.subr.bf16.mxu0 %v2473_v1 }
 0x6bc   :  { %v1251_v13 = vpop.f32.mrf.mxu1 }
 0x6bd   :  { %v1258_v4 = vmul.f32 0.17677669, %v1251_v13 }
 0x6be   :  { %v1132_v19 = vpop.f32.mrf.mxu0  ;;  %v2306_v63 = vpop.f32.mrf.mxu1 }
 0x6bf   :  { %v1139_v14 = vmul.f32 0.17677669, %v1132_v19  ;;  %v1260_v9 = vsel %vm635_vm3, %v1258_v4, -inf  ;;  %v2376_v19 = vld [vmem:[%s3142_s8 + $0x18] sm:$0xff]   ;;  %v2379_v63 = vld [vmem:[%s3142_s8] sm:$0xff]  }
 0x6c0   :  { %v2294_v2 = vpop.f32.mrf.mxu0  ;;  %v1254_v3 = vpop.f32.mrf.mxu1  ;;  %2314 = vmatprep.subr.bf16.mxu1 %v2376_v19 }
 0x6c1   :  { %v1141_v18 = vsel %vm635_vm3, %v1139_v14, -inf  ;;  %v1259_v8 = vmul.f32 0.17677669, %v1254_v3  ;;  %2315 = vmatpush3.bf16.msra.mxu1 %v2376_v19 }
 0x6c2   :  { %v2307_v22 = vpop.f32.mrf.mxu1  ;;  %1142 = vmax.xlane.f32.xlu0 %v1141_v18  ;;  %v1135_v5 = vpop.f32.mrf.mxu0  ;;  %2316 = vmatprep.subr.bf16.mxu1 %v2377_v21 }
 0x6c3   :  { %v1140_v6 = vmul.f32 0.17677669, %v1135_v5  ;;  %v1263_v32 = vsel %vm635_vm3, %v1259_v8, -inf }
 0x6c4   :  { %v2295_v7 = vpop.f32.mrf.mxu0 }
 0x6c5   :  { %v1144_v10 = vsel %vm635_vm3, %v1140_v6, -inf  ;;  %2317 = vmatpush3.bf16.msra.mxu1 %v2377_v21 }
 0x6c6   :  { %1261 = vmax.xlane.f32.xlu0 %v1260_v9  ;;  %1145 = vmax.xlane.f32.xlu1 %v1144_v10 }
 0x6ca   :  { %1264 = vmax.xlane.f32.xlu1 %v1263_v32 }
 0x74b   :  { %v1143_v40 = vpop.xlane.xlu0 %1142 }
 0x74c   :  { %v1147_v45 = vsub.f32 %v1139_v14, %v1143_v40 }
 0x74e   :  { %v1149_v12 = vmul.f32 1.442695, %v1147_v45 }
 0x74f   :  { %v1262_v16 = vpop.xlane.xlu0 %1261  ;;  %v1146_v23 = vpop.xlane.xlu1 %1145 }
 0x750   :  { %2432 = vpow2.f32 %v1149_v12  ;;  %v1266_v26 = vsub.f32 %v1258_v4, %v1262_v16  ;;  %v1148_v60 = vsub.f32 %v1140_v6, %v1146_v23 }
 0x752   :  { %v1268_v28 = vmul.f32 1.442695, %v1266_v26  ;;  %v1151_v29 = vmul.f32 1.442695, %v1148_v60 }
 0x753   :  { %v1265_v30 = vpop.xlane.xlu1 %1264 }
 0x754   :  { %2434 = vpow2.f32 %v1268_v28  ;;  %v1267_v33 = vsub.f32 %v1259_v8, %v1265_v30 }
 0x755   :  { %2436 = vpow2.f32 %v1151_v29 }
 0x756   :  { %v1270_v35 = vmul.f32 1.442695, %v1267_v33 }
 0x758   :  { %2438 = vpow2.f32 %v1270_v35 }
 0x75d   :  { %v2433_v36 = vpop.eup %2432 }
 0x75e   :  { %v1153_v37 = vsel %vm635_vm3, %v2433_v36, 0.0 }
 0x75f   :  { %1154 = vadd.xlane.f32.xlu0 %v1153_v37 }
 0x761   :  { %v2435_v39 = vpop.eup %2434 }
 0x762   :  { %v2437_v41 = vpop.eup %2436  ;;  %v1272_v42 = vsel %vm635_vm3, %v2435_v39, 0.0 }
 0x763   :  { %1273 = vadd.xlane.f32.xlu0 %v1272_v42  ;;  %v1156_v43 = vsel %vm635_vm3, %v2437_v41, 0.0 }
 0x764   :  { %1157 = vadd.xlane.f32.xlu1 %v1156_v43 }
 0x765   :  { %v2439_v46 = vpop.eup %2438 }
 0x766   :  { %v1275_v47 = vsel %vm635_vm3, %v2439_v46, 0.0 }
 0x768   :  { %1276 = vadd.xlane.f32.xlu1 %v1275_v47 }
 0x7e8   :  { %v1155_v48 = vpop.xlane.xlu0 %1154 }
 0x7e9   :  { %2440 = vrcp.f32 %v1155_v48 }
 0x7ec   :  { %v1274_v51 = vpop.xlane.xlu0 %1273 }
 0x7ed   :  { %v1158_v49 = vpop.xlane.xlu1 %1157 }
 0x7ee   :  { %2442 = vrcp.f32 %v1158_v49 }
 0x7f1   :  { %v1277_v52 = vpop.xlane.xlu1 %1276 }
 0x7f2   :  { %2444 = vrcp.f32 %v1277_v52 }
 0x7f3   :  { %2446 = vrcp.f32 %v1274_v51 }
 0x7f6   :  { %v2441_v55 = vpop.eup %2440 }
 0x7f7   :  { %v1161_v57 = vmul.f32 %v2441_v55, %v2433_v36 }
 0x7fb   :  { %v2443_v56 = vpop.eup %2442 }
 0x7fc   :  { %v1162_v54 = vmul.f32 %v2443_v56, %v2437_v41 }
 0x7fe   :  { %v1163_v58 = vpack.c.bf16 %v1162_v54, %v1161_v57 }
 0x7ff   :  { %v2445_v59 = vpop.eup %2444 }
 0x800   :  { %2299 = vmatmul.mubr.msk.bf16.vlgmr.msra.gmra.mxu0 %vm635_vm3, %v1163_v58  ;;  %v2447_v61 = vpop.eup %2446  ;;  %v1281_v62 = vmul.f32 %v2445_v59, %v2439_v46 }
 0x801   :  { %2309 = vmatpush3.bf16.msra.mxu0 %v1283_v25  ;;  %2310 = vmatprep.mubr.msk.bf16.mxu0 %vm2474_vm1, %v2473_v1  ;;  %v1280_v17 = vmul.f32 %v2447_v61, %v2435_v39  ;;  %v2378_v1 = vld [vmem:[%s3142_s8 + $0x8] sm:$0xff]  }
 0x802   :  { %2318 = vmatprep.subr.bf16.mxu1 %v2378_v1 }
 0x803   :  { %v1282_v13 = vpack.c.bf16 %v1281_v62, %v1280_v17  ;;  %2319 = vmatpush3.bf16.msra.mxu1 %v2378_v1 }
 0x804   :  { %2320 = vmatprep.subr.bf16.mxu1 %v2379_v63 }
 0x807   :  { %2321 = vmatpush3.bf16.msra.mxu1 %v2379_v63  ;;  %v2380_v63 = vld [vmem:[%s3144_s12 + $0x30] ss:$8 sps:$4 sm:$0xff]  }
 0x808   :  { %2311 = vmatmul.mubr.msk.bf16.vlgmr.msra.gmra.mxu0 %vm635_vm3, %v1282_v13 }
 0x809   :  { %1632 = vmatprep.mubr.bf16.mxu0 %v2472_v0 }
 0x8c0   :  { %v1202_v24 = vpop.f32.mrf.mxu0 }
 0x8c2   :  { %v2300_v25 = vpop.f32.mrf.mxu0 }
 0x8c3   :  { %v2382_v25 = vld [vmem:[%s3144_s12 + $0x34] ss:$8 sps:$4 sm:$0xff]  }
 0x8c4   :  { %v1205_v14 = vpop.f32.mrf.mxu0  ;;  %1608 = vmatprep.subr.bf16.mxu0 %v2382_v25  ;;  %v2406_v25 = vld [vmem:[%s3147_s14 + $0x40] sm:$0xff]  }
 0x8c5   :  { %v2330_v2 = vpack.i.bf16 %v1205_v14, %v1202_v24  ;;  %1609 = vmatpush1.bf16.msra.mxu0 %v2380_v63  ;;  %v2385_v14 = vld [vmem:[%s3144_s12 + $0x24] ss:$8 sps:$4 sm:$0xff]  }
 0x8c6   :  { %v2301_v3 = vpop.f32.mrf.mxu0  ;;  %1610 = vmatprep.subr.bf16.mxu0 %v2385_v14  ;;  %v2407_v63 = vld [vmem:[%s3147_s14] sm:$0xff]  }
 0x8c7   :  { %2331 = vrot.lane.b32.xlu0 %v2330_v2, %s2475_s2  ;;  %v2383_v2 = vld [vmem:[%s3144_s12 + $0x20] ss:$8 sps:$4 sm:$0xff]   ;;  %v2388_v3 = vld [vmem:[%s3144_s12 + $0x14] ss:$8 sps:$4 sm:$0xff]  }
 0x8c8   :  { %v1321_v4 = vpop.f32.mrf.mxu0  ;;  %v1533_v14 = vld [vmem:[%s3148_s13] sm:$0x3] }
 0x8c9   :  { %1611 = vmatpush1.bf16.msra.mxu0 %v2383_v2  ;;  %v1534_v2 = vunpack.c.l.bf16 %v1533_v14 }
 0x8ca   :  { %v2312_v18 = vpop.f32.mrf.mxu0  ;;  %1612 = vmatprep.subr.bf16.mxu0 %v2388_v3  ;;  %v1542_v3 = vsub.s32 2, %v2711_v27 }
 0x8cb   :  { %v2391_v18 = vld [vmem:[%s3144_s12 + $0x4] ss:$8 sps:$4 sm:$0xff]  }
 0x8cc   :  { %v1324_v22 = vpop.f32.mrf.mxu0 }
 0x8cd   :  { %v2335_v5 = vpack.i.bf16 %v1324_v22, %v1321_v4  ;;  %v2386_v4 = vld [vmem:[%s3144_s12 + $0x10] ss:$8 sps:$4 sm:$0xff]   ;;  %v2389_v22 = vld [vmem:[%s3144_s12] ss:$8 sps:$4 sm:$0xff]  }
 0x8ce   :  { %v2313_v6 = vpop.f32.mrf.mxu0  ;;  %1613 = vmatpush1.bf16.msra.mxu0 %v2386_v4  ;;  %v1539_v4 = vrot.slane %v1534_v2, %v2717_v34 }
 0x8cf   :  { %2336 = vrot.lane.b32.xlu1 %v2335_v5, %s2475_s2  ;;  %1614 = vmatprep.subr.bf16.mxu0 %v2391_v18  ;;  %v1543_v18 = vrot.slane %v1534_v2, %v1542_v3 }
 0x8d2   :  { %1615 = vmatpush1.bf16.msra.mxu0 %v2389_v22  ;;  %v1549_v22 = vrot.slane %v1539_v4, %v2717_v34 }
 0x939   :  { %v2332_v7 = vpop.permute.xlu0 %2331 }
 0x93a   :  { %v2334_v8 = vunpack.i.h.bf16 %v2332_v7  ;;  %v2333_v9 = vunpack.i.l.bf16 %v2332_v7 }
 0x93c   :  { %v1345_v10 = vsel %vm585_vm2, %v2880_v11, %v2334_v8  ;;  %v1344_v32 = vsel %vm585_vm2, %v2878_v53, %v2333_v9  ;;  %v1441_v11 = vld [vmem:[%s3143_s9] sm:$0x1] }
 0x93d   :  { %v1356_v40 = vpack.c.bf16 %v1345_v10, %v1344_v32  ;;  %v1442_v53 = vunpack.c.l.bf16 %v1441_v11  ;;  %v1452_v11 = vld [vmem:[%s3146_s11] sm:$0x1] }
 0x93f   :  { %2322 = vmatprep.mubr.msk.bf16.mxu1 %vm169_vm0, %v1356_v40  ;;  %v1446_v30 = vrot.slane %v1442_v53, %v2717_v34 }
 0x941   :  { %v2337_v45 = vpop.permute.xlu1 %2336 }
 0x942   :  { %v2339_v12 = vunpack.i.h.bf16 %v2337_v45  ;;  %v2338_v16 = vunpack.i.l.bf16 %v2337_v45 }
 0x944   :  { %v1347_v23 = vsel %vm585_vm2, %v2884_v20, %v2339_v12  ;;  %v1346_v26 = vsel %vm585_vm2, %v2882_v15, %v2338_v16 }
 0x945   :  { %v1357_v60 = vpack.c.bf16 %v1347_v23, %v1346_v26  ;;  %v1451_v26 = vld [vmem:[%s3145_s10] sm:$0x1] }
 0x947   :  { %2323 = vmatmul.mubr.msk.bf16.vlgmr.msra.gmra.mxu1 %vm169_vm0, %v1357_v60  ;;  %v1505_v60 = vunpack.c.l.bf16 %v1451_v26 }
 0xa07   :  { %v2324_v28 = vpop.f32.mrf.mxu1 }
 0xa08   :  { %v1439_v37 = vadd.f32 %v2324_v28, %v2652_v44 }
 0xa09   :  { %v1422_v29 = vpop.f32.mrf.mxu1 }
 0xa0a   :  { %v1437_v33 = vadd.f32 %v1422_v29, %v2641_v31  ;;  %v2963_v46 = vadd.f32 %v1446_v30, %v1439_v37  ;;  %v1509_v29 = vrot.slane %v1505_v60, %v2717_v34 }
 0xa0b   :  { %v2325_v35 = vpop.f32.mrf.mxu1 }
 0xa0c   :  { %v2952_v36 = vadd.f32 %v1446_v30, %v1437_v33  ;;  %v1440_v20 = vadd.f32 %v2325_v35, %v2656_v50  ;;  %v1459_v44 = vsel %vm169_vm0, %v2963_v46, 0.0 }
 0xa0d   :  { %v1425_v15 = vpop.f32.mrf.mxu1 }
 0xa0e   :  { %v2956_v39 = vadd.f32 %v1446_v30, %v1440_v20  ;;  %v1438_v41 = vadd.f32 %v1425_v15, %v2648_v38  ;;  %v1453_v42 = vsel %vm169_vm0, %v2952_v36, 0.0 }
 0xa0f   :  { %1454 = vadd.xlane.f32.xlu1 %v1453_v42 }
 0xa10   :  { %v2961_v43 = vadd.f32 %v1446_v30, %v1438_v41  ;;  %v1462_v31 = vsel %vm169_vm0, %v2956_v39, 0.0  ;;  %v1514_v30 = vunpack.c.l.bf16 %v1452_v11 }
 0xa12   :  { %v1456_v50 = vsel %vm169_vm0, %v2961_v43, 0.0  ;;  %v1518_v15 = vrot.slane %v1514_v30, %v2717_v34 }
 0xa13   :  { %1463 = vadd.xlane.f32.xlu1 %v1462_v31  ;;  %1457 = vadd.xlane.f32.xlu0 %v1456_v50 }
 0xa17   :  { %1460 = vadd.xlane.f32.xlu0 %v1459_v44 }
 0xa98   :  { %v1455_v38 = vpop.xlane.xlu1 %1454 }
 0xa99   :  { %v1465_v47 = vmul.f32 0.015625, %v1455_v38 }
 0xa9b   :  { %v1469_v48 = vsub.f32 %v2952_v36, %v1465_v47 }
 0xa9c   :  { %v1464_v49 = vpop.xlane.xlu1 %1463  ;;  %v1458_v51 = vpop.xlane.xlu0 %1457 }
 0xa9d   :  { %v1468_v52 = vmul.f32 0.015625, %v1464_v49  ;;  %v1466_v55 = vmul.f32 0.015625, %v1458_v51  ;;  %v1473_v56 = vmul.f32 %v1469_v48, %v1469_v48 }
 0xa9f   :  { %v2973_v57 = vsub.f32 %v2956_v39, %v1468_v52  ;;  %v1470_v54 = vsub.f32 %v2961_v43, %v1466_v55  ;;  %v1477_v58 = vsel %vm169_vm0, %v1473_v56, 0.0  ;;  %v2392_v56 = vld [vmem:[%s3147_s14 + $0x78] sm:$0xff]  }
 0xaa0   :  { %1478 = vadd.xlane.f32.xlu0 %v1477_v58  ;;  %v1461_v59 = vpop.xlane.xlu0 %1460  ;;  %2166 = vmatprep.subr.bf16.mxu1 %v2392_v56  ;;  %v2396_v58 = vld [vmem:[%s3147_s14 + $0x68] sm:$0xff]  }
 0xaa1   :  { %v1467_v61 = vmul.f32 0.015625, %v1461_v59  ;;  %v1474_v62 = vmul.f32 %v1470_v54, %v1470_v54  ;;  %v1476_v19 = vmul.f32 %v2973_v57, %v2973_v57  ;;  %v2397_v59 = vld [vmem:[%s3147_s14 + $0x28] sm:$0xff]  }
 0xaa3   :  { %v1471_v17 = vsub.f32 %v2963_v46, %v1467_v61  ;;  %v1480_v13 = vsel %vm169_vm0, %v1474_v62, 0.0  ;;  %v1486_v1 = vsel %vm169_vm0, %v1476_v19, 0.0  ;;  %v2398_v61 = vld [vmem:[%s3147_s14 + $0x60] sm:$0xff]   ;;  %v2402_v19 = vld [vmem:[%s3147_s14 + $0x50] sm:$0xff]  }
 0xaa4   :  { %1481 = vadd.xlane.f32.xlu1 %v1480_v13  ;;  %v2399_v62 = vld [vmem:[%s3147_s14 + $0x20] sm:$0xff]   ;;  %v2401_v13 = vld [vmem:[%s3147_s14 + $0x18] sm:$0xff]  }
 0xaa5   :  { %v1475_v21 = vmul.f32 %v1471_v17, %v1471_v17 }
 0xaa7   :  { %v1483_v24 = vsel %vm169_vm0, %v1475_v21, 0.0  ;;  %v2403_v21 = vld [vmem:[%s3147_s14 + $0x10] sm:$0xff]  }
 0xaa8   :  { %1487 = vadd.xlane.f32.xlu1 %v1486_v1  ;;  %1484 = vadd.xlane.f32.xlu0 %v1483_v24  ;;  %v2404_v1 = vld [vmem:[%s3147_s14 + $0x48] sm:$0xff]  }
 0xaa9   :  { %v2405_v24 = vld [vmem:[%s3147_s14 + $0x8] sm:$0xff]  }
 0xb29   :  { %v1479_v5 = vpop.xlane.xlu0 %1478 }
 0xb2a   :  { %v1489_v6 = vmul.f32 0.015625, %v1479_v5  ;;  %v1553_v5 = vrot.slane %v1543_v18, %v2717_v34 }
 0xb2c   :  { %v1493_v7 = vadd.f32 1e-06, %v1489_v6 }
 0xb2d   :  { %v1482_v8 = vpop.xlane.xlu1 %1481 }
 0xb2e   :  { %2448 = vrsqrt.f32 %v1493_v7  ;;  %v1490_v9 = vmul.f32 0.015625, %v1482_v8 }
 0xb30   :  { %v1494_v10 = vadd.f32 1e-06, %v1490_v9 }
 0xb31   :  { %v1488_v32 = vpop.xlane.xlu1 %1487  ;;  %v1485_v40 = vpop.xlane.xlu0 %1484 }
 0xb32   :  { %2450 = vrsqrt.f32 %v1494_v10  ;;  %v1492_v45 = vmul.f32 0.015625, %v1488_v32  ;;  %v1491_v12 = vmul.f32 0.015625, %v1485_v40 }
 0xb34   :  { %v1496_v16 = vadd.f32 1e-06, %v1492_v45  ;;  %v1495_v23 = vadd.f32 1e-06, %v1491_v12 }
 0xb36   :  { %2452 = vrsqrt.f32 %v1496_v16 }
 0xb37   :  { %2454 = vrsqrt.f32 %v1495_v23 }
 0xb3b   :  { %v2449_v53 = vpop.eup %2448 }
 0xb3c   :  { %v1501_v28 = vmul.f32 %v2449_v53, %v1469_v48 }
 0xb3e   :  { %v1510_v20 = vmul.f32 %v1509_v29, %v1501_v28 }
 0xb3f   :  { %v2451_v33 = vpop.eup %2450 }
 0xb40   :  { %v1502_v35 = vmul.f32 %v2451_v33, %v1470_v54  ;;  %v1519_v31 = vadd.f32 %v1518_v15, %v1510_v20  ;;  %v2394_v54 = vld [vmem:[%s3147_s14 + $0x70] sm:$0xff]  }
 0xb42   :  { %v1511_v37 = vmul.f32 %v1509_v29, %v1502_v35 }
 0xb43   :  { %v2453_v41 = vpop.eup %2452 }
 0xb44   :  { %v2455_v42 = vpop.eup %2454  ;;  %v1520_v50 = vadd.f32 %v1518_v15, %v1511_v37  ;;  %v1504_v44 = vmul.f32 %v2453_v41, %v2973_v57  ;;  %v2393_v57 = vld [vmem:[%s3147_s14 + $0x38] sm:$0xff]  }
 0xb45   :  { %v1503_v38 = vmul.f32 %v2455_v42, %v1471_v17  ;;  %2167 = vmatpush3.bf16.msra.mxu1 %v2393_v57  ;;  %v2400_v17 = vld [vmem:[%s3147_s14 + $0x58] sm:$0xff]  }
 0xb46   :  { %v1531_v47 = vpack.c.bf16 %v1520_v50, %v1519_v31  ;;  %v1513_v49 = vmul.f32 %v1509_v29, %v1504_v44  ;;  %2168 = vmatprep.subr.bf16.mxu1 %v2394_v54 }
 0xb47   :  { %v1512_v51 = vmul.f32 %v1509_v29, %v1503_v38 }
 0xb48   :  { %2062 = vmatmul.mubr.msk.bf16.vlgmr.msra.gmra.mxu0 %vm169_vm0, %v1531_v47  ;;  %v1522_v52 = vadd.f32 %v1518_v15, %v1513_v49 }
 0xb49   :  { %1642 = vmatprep.mubr.bf16.mxu0 %v2472_v0  ;;  %v1521_v48 = vadd.f32 %v1518_v15, %v1512_v51  ;;  %v2395_v0 = vld [vmem:[%s3147_s14 + $0x30] sm:$0xff]  }
 0xb4a   :  { %2169 = vmatpush3.bf16.msra.mxu1 %v2395_v0 }
 0xb4b   :  { %v1532_v55 = vpack.c.bf16 %v1522_v52, %v1521_v48  ;;  %2170 = vmatprep.subr.bf16.mxu1 %v2396_v58 }
 0xb4e   :  { %2171 = vmatpush3.bf16.msra.mxu1 %v2397_v59 }
 0xb4f   :  { %2172 = vmatprep.subr.bf16.mxu1 %v2398_v61 }
 0xb50   :  { %2063 = vmatmul.mubr.msk.bf16.gmra.mxu0 %vm169_vm0, %v1532_v55 }
 0xb52   :  { %2173 = vmatpush3.bf16.msra.mxu1 %v2399_v62 }
 0xb53   :  { %2174 = vmatprep.subr.bf16.mxu1 %v2400_v17 }
 0xb56   :  { %2175 = vmatpush3.bf16.msra.mxu1 %v2401_v13 }
 0xb57   :  { %2176 = vmatprep.subr.bf16.mxu1 %v2402_v19 }
 0xb5a   :  { %2177 = vmatpush3.bf16.msra.mxu1 %v2403_v21 }
 0xb5b   :  { %2178 = vmatprep.subr.bf16.mxu1 %v2404_v1 }
 0xb5e   :  { %2179 = vmatpush3.bf16.msra.mxu1 %v2405_v24 }
 0xb5f   :  { %2180 = vmatprep.subr.bf16.mxu1 %v2406_v25 }
 0xb62   :  { %2181 = vmatpush3.bf16.msra.mxu1 %v2407_v63 }
 0xc08   :  { %v1634_v6 = vpop.f32.mrf.mxu0 }
 0xc09   :  { %v3074_v7 = vadd.f32 %v1634_v6, %v1549_v22 }
 0xc0a   :  { %v1636_v8 = vpop.f32.mrf.mxu0 }
 0xc0b   :  { %v1653_v9 = vmul.f32 %v3074_v7, %v3074_v7  ;;  %v3078_v10 = vadd.f32 %v1636_v8, %v1553_v5 }
 0xc0c   :  { %v1638_v32 = vpop.f32.mrf.mxu0 }
 0xc0d   :  { %v1661_v40 = vmul.f32 %v1653_v9, %v3074_v7  ;;  %v1654_v27 = vmul.f32 %v3078_v10, %v3078_v10  ;;  %v3083_v45 = vadd.f32 %v1638_v32, %v1549_v22 }
 0xc0e   :  { %v1640_v12 = vpop.f32.mrf.mxu0 }
 0xc0f   :  { %v1669_v16 = vmul.f32 0.044715, %v1661_v40  ;;  %v1662_v23 = vmul.f32 %v1654_v27, %v3078_v10  ;;  %v1655_v26 = vmul.f32 %v3083_v45, %v3083_v45  ;;  %v3088_v60 = vadd.f32 %v1640_v12, %v1553_v5 }
 0xc10   :  { %v1644_v11 = vpop.f32.mrf.mxu0 }
 0xc11   :  { %v1677_v53 = vadd.f32 %v1669_v16, %v3074_v7  ;;  %v1670_v28 = vmul.f32 0.044715, %v1662_v23  ;;  %v1663_v29 = vmul.f32 %v1655_v26, %v3083_v45  ;;  %v1656_v30 = vmul.f32 %v3088_v60, %v3088_v60 }
 0xc12   :  { %v3094_v33 = vadd.f32 %v1644_v11, %v1549_v22  ;;  %v1646_v35 = vpop.f32.mrf.mxu0 }
 0xc13   :  { %v1685_v20 = vmul.f32 0.7978846, %v1677_v53  ;;  %v1678_v15 = vadd.f32 %v1670_v28, %v3078_v10  ;;  %v1671_v37 = vmul.f32 0.044715, %v1663_v29  ;;  %v1664_v41 = vmul.f32 %v1656_v30, %v3088_v60 }
 0xc14   :  { %v1657_v42 = vmul.f32 %v3094_v33, %v3094_v33  ;;  %v3100_v31 = vadd.f32 %v1646_v35, %v1553_v5  ;;  %v1648_v50 = vpop.f32.mrf.mxu0 }
 0xc15   :  { %v1686_v44 = vmul.f32 0.7978846, %v1678_v15  ;;  %v1679_v38 = vadd.f32 %v1671_v37, %v3083_v45  ;;  %v1672_v47 = vmul.f32 0.044715, %v1664_v41  ;;  %2456 = vtanh.f32 %v1685_v20 }
 0xc16   :  { %v1665_v49 = vmul.f32 %v1657_v42, %v3094_v33  ;;  %v1658_v51 = vmul.f32 %v3100_v31, %v3100_v31  ;;  %v1649_v48 = vadd.f32 %v1648_v50, %v1549_v22  ;;  %v1650_v52 = vpop.f32.mrf.mxu0 }
 0xc17   :  { %2458 = vtanh.f32 %v1686_v44  ;;  %v1687_v55 = vmul.f32 0.7978846, %v1679_v38  ;;  %v1680_v56 = vadd.f32 %v1672_v47, %v3088_v60  ;;  %v1651_v57 = vadd.f32 %v1650_v52, %v1553_v5 }
 0xc18   :  { %v1673_v54 = vmul.f32 0.044715, %v1665_v49  ;;  %v1666_v0 = vmul.f32 %v1658_v51, %v3100_v31  ;;  %v1659_v58 = vmul.f32 %v1649_v48, %v1649_v48 }
 0xc19   :  { %2460 = vtanh.f32 %v1687_v55  ;;  %v1688_v59 = vmul.f32 0.7978846, %v1680_v56  ;;  %v1660_v61 = vmul.f32 %v1651_v57, %v1651_v57  ;;  %v1761_v56 = vld [vmem:[%s3149_s15] sm:$0x1] }
 0xc1a   :  { %v1681_v62 = vadd.f32 %v1673_v54, %v3094_v33  ;;  %v1674_v17 = vmul.f32 0.044715, %v1666_v0  ;;  %v1667_v13 = vmul.f32 %v1659_v58, %v1649_v48  ;;  %v1762_v54 = vunpack.c.l.bf16 %v1761_v56 }
 0xc1b   :  { %2462 = vtanh.f32 %v1688_v59  ;;  %v1668_v19 = vmul.f32 %v1660_v61, %v1651_v57 }
 0xc1c   :  { %v1689_v21 = vmul.f32 0.7978846, %v1681_v62  ;;  %v1682_v1 = vadd.f32 %v1674_v17, %v3100_v31  ;;  %v1675_v24 = vmul.f32 0.044715, %v1667_v13  ;;  %v1766_v58 = vrot.slane %v1762_v54, %v2717_v34 }
 0xc1d   :  { %v1676_v25 = vmul.f32 0.044715, %v1668_v19 }
 0xc1e   :  { %2464 = vtanh.f32 %v1689_v21  ;;  %v1690_v63 = vmul.f32 0.7978846, %v1682_v1  ;;  %v1683_v14 = vadd.f32 %v1675_v24, %v1649_v48 }
 0xc1f   :  { %v1684_v2 = vadd.f32 %v1676_v25, %v1651_v57 }
 0xc20   :  { %2466 = vtanh.f32 %v1690_v63  ;;  %v1691_v3 = vmul.f32 0.7978846, %v1683_v14 }
 0xc21   :  { %v1692_v4 = vmul.f32 0.7978846, %v1684_v2 }
 0xc22   :  { %2468 = vtanh.f32 %v1691_v3  ;;  %v2457_v18 = vpop.eup %2456 }
 0xc23   :  { %2470 = vtanh.f32 %v1692_v4  ;;  %v1701_v8 = vadd.f32 1.0, %v2457_v18 }
 0xc24   :  { %v2459_v22 = vpop.eup %2458 }
 0xc25   :  { %v1702_v5 = vadd.f32 1.0, %v2459_v22  ;;  %v1709_v16 = vmul.f32 0.5, %v1701_v8 }
 0xc26   :  { %v2461_v6 = vpop.eup %2460 }
 0xc27   :  { %v1703_v9 = vadd.f32 1.0, %v2461_v6  ;;  %v1710_v12 = vmul.f32 0.5, %v1702_v5  ;;  %v1717_v30 = vmul.f32 %v1709_v16, %v3074_v7 }
 0xc28   :  { %v2463_v32 = vpop.eup %2462 }
 0xc29   :  { %v1711_v40 = vmul.f32 0.5, %v1703_v9  ;;  %v1704_v27 = vadd.f32 1.0, %v2463_v32  ;;  %v1718_v28 = vmul.f32 %v1710_v12, %v3078_v10 }
 0xc2b   :  { %v2465_v23 = vpop.eup %2464  ;;  %v1712_v26 = vmul.f32 0.5, %v1704_v27  ;;  %v1719_v11 = vmul.f32 %v1711_v40, %v3083_v45 }
 0xc2c   :  { %v1705_v20 = vadd.f32 1.0, %v2465_v23 }
 0xc2d   :  { %v2467_v53 = vpop.eup %2466  ;;  %v1720_v29 = vmul.f32 %v1712_v26, %v3088_v60  ;;  %v1757_v42 = vpack.c.bf16 %v1719_v11, %v1717_v30 }
 0xc2e   :  { %v1706_v35 = vadd.f32 1.0, %v2467_v53  ;;  %v1713_v47 = vmul.f32 0.5, %v1705_v20 }
 0xc2f   :  { %v2469_v15 = vpop.eup %2468  ;;  %v1758_v37 = vpack.c.bf16 %v1720_v29, %v1718_v28 }
 0xc30   :  { %v2471_v41 = vpop.eup %2470  ;;  %v1707_v50 = vadd.f32 1.0, %v2469_v15  ;;  %v1714_v38 = vmul.f32 0.5, %v1706_v35  ;;  %v1721_v7 = vmul.f32 %v1713_v47, %v3094_v33 }
 0xc31   :  { %1895 = vmatprep.mubr.bf16.mxu1 %v1758_v37  ;;  %v1708_v44 = vadd.f32 1.0, %v2471_v41 }
 0xc32   :  { %1896 = vmatmul.mubr.bf16.vlgmr.msra.gmra.mxu1 %v1757_v42  ;;  %v1715_v45 = vmul.f32 0.5, %v1707_v50  ;;  %v1722_v10 = vmul.f32 %v1714_v38, %v3100_v31 }
 0xc33   :  { %v1716_v49 = vmul.f32 0.5, %v1708_v44 }
 0xc34   :  { %v1723_v51 = vmul.f32 %v1715_v45, %v1649_v48 }
 0xc35   :  { %v1724_v60 = vmul.f32 %v1716_v49, %v1651_v57 }
 0xc36   :  { %v1759_v55 = vpack.c.bf16 %v1723_v51, %v1721_v7 }
 0xc37   :  { %v1760_v52 = vpack.c.bf16 %v1724_v60, %v1722_v10 }
 0xc39   :  { %1903 = vmatprep.mubr.bf16.mxu1 %v1760_v52 }
 0xc3a   :  { %1904 = vmatmul.mubr.bf16.gmra.mxu1 %v1759_v55 }
 0xcf2   :  { %v2182_v0 = vpop.f32.mrf.mxu1 }
 0xcf4   :  { %v2183_v59 = vpop.f32.mrf.mxu1 }
 0xcf5   :  { %v2184_v61 = vadd.f32 %v2183_v59, %v2182_v0 }
 0xcf6   :  { %v2185_v48 = vpop.f32.mrf.mxu1 }
 0xcf7   :  { %v1898_v62 = vadd.f32 %v2184_v61, %v1766_v58 }
 0xcf8   :  { %v2186_v31 = vpop.f32.mrf.mxu1 }
 0xcf9   :  { %v2187_v57 = vadd.f32 %v2186_v31, %v2185_v48  ;;  %v1912_v33 = vadd.f32 %v1898_v62, %v2952_v36 }
 0xcfa   :  { %v2188_v17 = vpop.f32.mrf.mxu1 }
 0xcfb   :  { %v1901_v13 = vadd.f32 %v2187_v57, %v1766_v58  ;;  %v1916_v25 = vsel %vm169_vm0, %v1912_v33, 0.0 }
 0xcfc   :  { %v2189_v19 = vpop.f32.mrf.mxu1 }
 0xcfd   :  { %v1913_v21 = vadd.f32 %v1901_v13, %v2961_v43  ;;  %v2190_v1 = vadd.f32 %v2189_v19, %v2188_v17 }
 0xcfe   :  { %v2191_v24 = vpop.f32.mrf.mxu1 }
 0xcff   :  { %v1917_v63 = vsel %vm169_vm0, %v1913_v21, 0.0  ;;  %v1906_v34 = vadd.f32 %v2190_v1, %v1766_v58 }
 0xd00   :  { %v2099_v14 = vpack.c.bf16 %v1917_v63, %v1916_v25  ;;  %v2192_v2 = vpop.f32.mrf.mxu1 }
 0xd01   :  { %v2193_v3 = vadd.f32 %v2192_v2, %v2191_v24  ;;  %v1914_v36 = vadd.f32 %v1906_v34, %v2963_v46 }
 0xd02   :  { %2100 = vst [vmem:[%s3150_s16] sm:$0xff] %v2099_v14  }
 0xd03   :  { %v1909_v4 = vadd.f32 %v2193_v3, %v1766_v58  ;;  %v1918_v43 = vsel %vm169_vm0, %v1914_v36, 0.0 }
 0xd05   :  { %v1915_v18 = vadd.f32 %v1909_v4, %v2956_v39 }
 0xd07   :  { %v1919_v22 = vsel %vm169_vm0, %v1915_v18, 0.0 }
 0xd08   :  { %v2104_v5 = vpack.c.bf16 %v1919_v22, %v1918_v43 }
 0xd0a   :  { %2107 = vst [vmem:[%s3150_s16 + $0x8] sm:$0xff] %v2104_v5  }

// kernel: internvl_forward.3
= control target key start
LH: loop header
LB: loop body
LE: loop exit
PB: predicated region body
PF: predicated region fallthrough
CT: control target
= control target key end

     0   :  { %v78_v29 = vlaneseq  ;;  %v4186_v56 = vmov 0.0   ;;  %vm4187_vm0 = vmmov 0   ;;  %vm761_vm1 = vcmask 261120   ;;  %s4190_s18 = smov 96   ;;  %s5198_s0 = inlined_call_operand.vmem [shape: bf16[8,256], index: 0, kind: input, shape index: {}]   ;;  %s5199_s4 = inlined_call_operand.vmem [shape: bf16[256,128], index: 4, kind: input, shape index: {}]   ;;  %s5200_s2 = inlined_call_operand.vmem [shape: bf16[1,256], index: 2, kind: input, shape index: {}]   ;;  %s5201_s3 = inlined_call_operand.vmem [shape: bf16[1,256], index: 3, kind: input, shape index: {}]   ;;  %s5202_s6 = inlined_call_operand.vmem [shape: bf16[128,128], index: 6, kind: input, shape index: {}]   ;;  %s5203_s5 = inlined_call_operand.vmem [shape: bf16[1,128], index: 5, kind: input, shape index: {}]   ;;  %s5204_s9 = inlined_call_operand.vmem [shape: bf16[12,128,32], index: 9, kind: input, shape index: {}]   ;;  %s5205_s7 = inlined_call_operand.vmem [shape: bf16[1,128], index: 7, kind: input, shape index: {}]   ;;  %s5206_s1 = inlined_call_operand.vmem [shape: bf16[8,128], index: 1, kind: input, shape index: {}]   ;;  %s5207_s8 = inlined_call_operand.vmem [shape: bf16[1,128], index: 8, kind: input, shape index: {}]   ;;  %s5208_s10 = inlined_call_operand.vmem [shape: bf16[128,128], index: 10, kind: input, shape index: {}]   ;;  %s5209_s12 = inlined_call_operand.vmem [shape: bf16[128,512], index: 12, kind: input, shape index: {}]   ;;  %s5210_s11 = inlined_call_operand.vmem [shape: bf16[1,128], index: 11, kind: input, shape index: {}]   ;;  %s5211_s13 = inlined_call_operand.vmem [shape: bf16[256,128], index: 13, kind: input, shape index: {}]   ;;  %s5212_s15 = inlined_call_operand.vmem [shape: bf16[128,128], index: 15, kind: input, shape index: {}]   ;;  %s5213_s14 = inlined_call_operand.vmem [shape: bf16[1,128], index: 14, kind: input, shape index: {}]   ;;  %s5214_s16 = inlined_call_operand.vmem [shape: f32[16,128], index: 16, kind: output, shape index: {}]  }
   0x1   :  { %5215 = sst [smem:[#allocation2_spill]] %s5198_s0  ;;  %v3922_v4 = vld [vmem:[%s5199_s4 + $0x78] sm:$0xff]   ;;  %v3924_v6 = vld [vmem:[%s5199_s4 + $0x70] sm:$0xff]   ;;  %v3926_v15 = vld [vmem:[%s5199_s4 + $0x68] sm:$0xff]   ;;  %3553 = vmatprep.subr.bf16.mxu1 %v4186_v56  ;;  %3569 = vmatprep.mubr.msk.bf16.mxu1 %vm4187_vm0, %v4186_v56  ;;  %vm820_vm3 = vcmask 130048   ;;  %vm2232_vm5 = vcmask 523264  }
   0x2   :  { %s5216_s23 = sld [smem:[#allocation2_spill]]  ;;  %v3923_v5 = vld [vmem:[%s5199_s4 + $0x38] sm:$0xff]   ;;  %3358 = vmatprep.subr.bf16.mxu0 %v3922_v4  ;;  %v3925_v14 = vld [vmem:[%s5199_s4 + $0x30] sm:$0xff]   ;;  %v3927_v16 = vld [vmem:[%s5199_s4 + $0x28] sm:$0xff]   ;;  %v4329_v31 = vshrl.u32 %v78_v29, 7  ;;  %vm2235_vm6 = vcmask 785408  }
   0x3   :  { %3359 = vmatpush3.bf16.msra.mxu0 %v3923_v5  ;;  %v3928_v17 = vld [vmem:[%s5199_s4 + $0x60] sm:$0xff]   ;;  %v3930_v19 = vld [vmem:[%s5199_s4 + $0x58] sm:$0xff]   ;;  %v3932_v21 = vld [vmem:[%s5199_s4 + $0x50] sm:$0xff]  }
   0x4   :  { %3360 = vmatprep.subr.bf16.mxu0 %v3924_v6  ;;  %v3929_v18 = vld [vmem:[%s5199_s4 + $0x20] sm:$0xff]   ;;  %v3931_v20 = vld [vmem:[%s5199_s4 + $0x18] sm:$0xff]   ;;  %v3933_v22 = vld [vmem:[%s5199_s4 + $0x10] sm:$0xff]   ;;  %v4338_v35 = vsub.s32 0, %v4329_v31  ;;  %v84_v36 = vsub.s32 2, %v4329_v31 }
   0x5   :  { %v3934_v23 = vld [vmem:[%s5199_s4 + $0x48] sm:$0xff]   ;;  %v3936_v25 = vld [vmem:[%s5199_s4 + $0x40] sm:$0xff]   ;;  %v3938_v55 = vld [vmem:[%s5202_s6 + $0x38] sm:$0xff]  }
   0x6   :  { %v3935_v24 = vld [vmem:[%s5199_s4 + $0x8] sm:$0xff]   ;;  %v3937_v26 = vld [vmem:[%s5199_s4] sm:$0xff]   ;;  %3554 = vmatpush3.bf16.msra.mxu1 %v3938_v55  ;;  %v3939_v57 = vld [vmem:[%s5202_s6 + $0x30] sm:$0xff]  }
   0x7   :  { %3361 = vmatpush3.bf16.msra.mxu0 %v3925_v14  ;;  %v57_v32 = vld [vmem:[%s5200_s2] sm:$0x3]  ;;  %3555 = vmatprep.subr.bf16.mxu1 %v4186_v56  ;;  %v3940_v58 = vld [vmem:[%s5202_s6 + $0x28] sm:$0xff]   ;;  %v3942_v60 = vld [vmem:[%s5202_s6 + $0x18] sm:$0xff]  }
   0x8   :  { %v54_v0 = vld [vmem:[%s5216_s23] sm:$0xff]  ;;  %3362 = vmatprep.subr.bf16.mxu0 %v3926_v15  ;;  %v76_v34 = vunpack.c.l.bf16 %v57_v32  ;;  %v3943_v61 = vld [vmem:[%s5202_s6 + $0x10] sm:$0xff]   ;;  %v3944_v62 = vld [vmem:[%s5202_s6 + $0x8] sm:$0xff]   ;;  %s4189_s23 = smov 32  }
   0x9   :  { %v55_v1 = vunpack.c.l.bf16 %v54_v0  ;;  %v56_v2 = vunpack.c.h.bf16 %v54_v0  ;;  %v58_v33 = vld [vmem:[%s5201_s3] sm:$0x3] }
   0xa   :  { %v98_v37 = vunpack.c.l.bf16 %v58_v33  ;;  %v85_v38 = vrot.slane %v76_v34, %v84_v36  ;;  %v81_v39 = vrot.slane %v76_v34, %v4338_v35  ;;  %3556 = vmatpush3.bf16.msra.mxu1 %v3939_v57  ;;  %v3941_v59 = vld [vmem:[%s5202_s6 + $0x20] sm:$0xff]  }
   0xb   :  { %v59_v3 = vadd.f32 %v56_v2, %v55_v1  ;;  %3363 = vmatpush3.bf16.msra.mxu0 %v3927_v16  ;;  %3557 = vmatprep.subr.bf16.mxu1 %v4186_v56  ;;  %v3945_v63 = vld [vmem:[%s5202_s6] sm:$0xff]  }
   0xc   :  { %3364 = vmatprep.subr.bf16.mxu0 %v3928_v17  ;;  %v107_v40 = vrot.slane %v98_v37, %v84_v36  ;;  %v103_v41 = vrot.slane %v98_v37, %v4338_v35  ;;  %v95_v42 = vrot.slane %v85_v38, %v4338_v35  ;;  %v91_v43 = vrot.slane %v81_v39, %v4338_v35  ;;  %v154_v0 = vld [vmem:[%s5203_s5] sm:$0x1]  ;;  %v3948_v36 = vld [vmem:[%s5204_s9 + $0x30] sm:$0xff]   ;;  %v3950_v38 = vld [vmem:[%s5204_s9 + $0x28] sm:$0xff]  }
   0xd   :  { %60 = vadd.xlane.f32.xlu0 %v59_v3  ;;  %v3949_v37 = vld [vmem:[%s5204_s9 + $0x70] sm:$0xff]   ;;  %v3951_v39 = vld [vmem:[%s5204_s9 + $0x68] sm:$0xff]   ;;  %v418_v57 = vld [vmem:[%s5207_s8] sm:$0x1] }
   0xe   :  { %v117_v46 = vrot.slane %v107_v40, %v4338_v35  ;;  %v113_v48 = vrot.slane %v103_v41, %v4338_v35  ;;  %3558 = vmatpush3.bf16.msra.mxu1 %v3940_v58  ;;  %v3952_v40 = vld [vmem:[%s5204_s9 + $0x20] sm:$0xff]   ;;  %v434_v58 = vunpack.c.l.bf16 %v418_v57 }
   0xf   :  { %3365 = vmatpush3.bf16.msra.mxu0 %v3929_v18  ;;  %3559 = vmatprep.subr.bf16.mxu1 %v4186_v56  ;;  %v3953_v41 = vld [vmem:[%s5204_s9 + $0x60] sm:$0xff]  }
  0x10   :  { %3366 = vmatprep.subr.bf16.mxu0 %v3930_v19  ;;  %v3946_v19 = vld [vmem:[%s5204_s9 + $0x38] sm:$0xff]  }
  0x12   :  { %3560 = vmatpush3.bf16.msra.mxu1 %v3941_v59 }
  0x13   :  { %3367 = vmatpush3.bf16.msra.mxu0 %v3931_v20  ;;  %3561 = vmatprep.subr.bf16.mxu1 %v4186_v56  ;;  %v3947_v20 = vld [vmem:[%s5204_s9 + $0x78] sm:$0xff]  }
  0x14   :  { %3368 = vmatprep.subr.bf16.mxu0 %v3932_v21  ;;  %v322_v21 = vld [vmem:[%s5205_s7] sm:$0x1] }
  0x16   :  { %3562 = vmatpush3.bf16.msra.mxu1 %v3942_v60  ;;  %v438_v60 = vrot.slane %v434_v58, %v4338_v35 }
  0x17   :  { %3369 = vmatpush3.bf16.msra.mxu0 %v3933_v22  ;;  %3563 = vmatprep.subr.bf16.mxu1 %v4186_v56  ;;  %v323_v22 = vunpack.c.l.bf16 %v322_v21  ;;  %v3980_v21 = vld [vmem:[%s5204_s9 + $0x1a8] sm:$0xff]  }
  0x18   :  { %3370 = vmatprep.subr.bf16.mxu0 %v3934_v23 }
  0x19   :  { %v327_v23 = vrot.slane %v323_v22, %v4338_v35  ;;  %v3981_v22 = vld [vmem:[%s5204_s9 + $0x1a0] sm:$0xff]  }
  0x1a   :  { %3564 = vmatpush3.bf16.msra.mxu1 %v3943_v61 }
  0x1b   :  { %3371 = vmatpush3.bf16.msra.mxu0 %v3935_v24  ;;  %3565 = vmatprep.subr.bf16.mxu1 %v4186_v56  ;;  %v416_v24 = vld [vmem:[%s5206_s1] sm:$0xf] }
  0x1c   :  { %3372 = vmatprep.subr.bf16.mxu0 %v3936_v25 }
  0x1e   :  { %3566 = vmatpush3.bf16.msra.mxu1 %v3944_v62 }
  0x1f   :  { %3373 = vmatpush3.bf16.msra.mxu0 %v3937_v26  ;;  %3567 = vmatprep.subr.bf16.mxu1 %v4186_v56 }
  0x20   :  { %3573 = vmatprep.subr.bf16.mxu0 %v4186_v56 }
  0x22   :  { %3568 = vmatpush3.bf16.msra.mxu1 %v3945_v63 }
  0x23   :  { %3593 = vmatprep.subr.bf16.mxu1 %v4186_v56 }
  0x96   :  { %v61_v7 = vpop.xlane.xlu0 %60 }
  0x97   :  { %v63_v8 = vmul.f32 0.00390625, %v61_v7 }
  0x99   :  { %v64_v9 = vsub.f32 %v55_v1, %v63_v8  ;;  %v65_v10 = vsub.f32 %v56_v2, %v63_v8  ;;  %v155_v1 = vunpack.c.l.bf16 %v154_v0 }
  0x9b   :  { %v66_v11 = vmul.f32 %v64_v9, %v64_v9  ;;  %v67_v12 = vmul.f32 %v65_v10, %v65_v10  ;;  %v159_v3 = vrot.slane %v155_v1, %v4338_v35 }
  0x9d   :  { %v68_v13 = vadd.f32 %v67_v12, %v66_v11 }
  0x9f   :  { %69 = vadd.xlane.f32.xlu0 %v68_v13 }
 0x128   :  { %v70_v27 = vpop.xlane.xlu0 %69 }
 0x129   :  { %v71_v28 = vmul.f32 0.00390625, %v70_v27  ;;  %v4408_v27 = vunpack.c.l.bf16 %v416_v24  ;;  %v3983_v24 = vld [vmem:[%s5204_s9 + $0x190] sm:$0xff]  }
 0x12b   :  { %v72_v30 = vadd.f32 1e-05, %v71_v28  ;;  %v420_v33 = vmul.f32 %v4408_v27, %v4408_v27 }
 0x12d   :  { %4122 = vrsqrt.f32 %v72_v30 }
 0x13a   :  { %v4123_v44 = vpop.eup %4122 }
 0x13b   :  { %v75_v45 = vmul.f32 %v4123_v44, %v65_v10  ;;  %v74_v47 = vmul.f32 %v4123_v44, %v64_v9  ;;  %v3956_v44 = vld [vmem:[%s5204_s9 + $0x10] sm:$0xff]  }
 0x13d   :  { %v97_v49 = vmul.f32 %v95_v42, %v75_v45  ;;  %v96_v50 = vmul.f32 %v91_v43, %v74_v47  ;;  %v3954_v42 = vld [vmem:[%s5204_s9 + $0x18] sm:$0xff]   ;;  %v3957_v45 = vld [vmem:[%s5204_s9 + $0x50] sm:$0xff]   ;;  %v3959_v47 = vld [vmem:[%s5204_s9 + $0x48] sm:$0xff]  }
 0x13e   :  { %v3955_v43 = vld [vmem:[%s5204_s9 + $0x58] sm:$0xff]  }
 0x13f   :  { %v119_v51 = vadd.f32 %v117_v46, %v97_v49  ;;  %v118_v52 = vadd.f32 %v113_v48, %v96_v50  ;;  %v3958_v46 = vld [vmem:[%s5204_s9 + $0x8] sm:$0xff]   ;;  %v3960_v48 = vld [vmem:[%s5204_s9] sm:$0xff]  }
 0x140   :  { %v3961_v49 = vld [vmem:[%s5204_s9 + $0x40] sm:$0xff]  }
 0x141   :  { %v153_v53 = vpack.c.bf16 %v119_v51, %v119_v51  ;;  %v152_v54 = vpack.c.bf16 %v118_v52, %v118_v52 }
 0x143   :  { %288 = vmatprep.mubr.bf16.mxu0 %v153_v53 }
 0x144   :  { %289 = vmatmul.mubr.bf16.vlgmr.msra.gmra.mxu0 %v152_v54 }
 0x145   :  { %3589 = vmatprep.mubr.msk.bf16.mxu0 %vm4187_vm0, %v4186_v56  ;;  %3574 = vmatpush3.bf16.msra.mxu0 %v3946_v19  ;;  %v3978_v19 = vld [vmem:[%s5204_s9 + $0x1b8] sm:$0xff]  }
 0x146   :  { %3575 = vmatprep.subr.bf16.mxu0 %v4186_v56 }
 0x149   :  { %3576 = vmatpush3.bf16.msra.mxu0 %v3948_v36  ;;  %v3990_v36 = vld [vmem:[%s5204_s9 + $0x218] sm:$0xff]  }
 0x14a   :  { %3577 = vmatprep.subr.bf16.mxu0 %v4186_v56 }
 0x14d   :  { %3578 = vmatpush3.bf16.msra.mxu0 %v3950_v38  ;;  %v3992_v38 = vld [vmem:[%s5204_s9 + $0x208] sm:$0xff]  }
 0x14e   :  { %3579 = vmatprep.subr.bf16.mxu0 %v4186_v56 }
 0x151   :  { %3580 = vmatpush3.bf16.msra.mxu0 %v3952_v40  ;;  %v3994_v40 = vld [vmem:[%s5204_s9 + $0x2b8] sm:$0xff]  }
 0x152   :  { %3581 = vmatprep.subr.bf16.mxu0 %v4186_v56 }
 0x155   :  { %3582 = vmatpush3.bf16.msra.mxu0 %v3954_v42  ;;  %v3996_v42 = vld [vmem:[%s5204_s9 + $0x2a8] sm:$0xff]  }
 0x156   :  { %3583 = vmatprep.subr.bf16.mxu0 %v4186_v56 }
 0x159   :  { %3584 = vmatpush3.bf16.msra.mxu0 %v3956_v44  ;;  %v3998_v44 = vld [vmem:[%s5204_s9 + $0x298] sm:$0xff]  }
 0x15a   :  { %3585 = vmatprep.subr.bf16.mxu0 %v4186_v56 }
 0x15d   :  { %3586 = vmatpush3.bf16.msra.mxu0 %v3958_v46  ;;  %v4000_v46 = vld [vmem:[%s5204_s9 + $0x288] sm:$0xff]  }
 0x15e   :  { %3587 = vmatprep.subr.bf16.mxu0 %v4186_v56 }
 0x161   :  { %3588 = vmatpush3.bf16.msra.mxu0 %v3960_v48 }
 0x162   :  { %3613 = vmatprep.subr.bf16.mxu0 %v4186_v56 }
 0x204   :  { %v3374_v2 = vpop.f32.mrf.mxu0 }
 0x206   :  { %v3375_v4 = vpop.f32.mrf.mxu0 }
 0x207   :  { %v3376_v5 = vadd.f32 %v3375_v4, %v3374_v2  ;;  %v3962_v2 = vld [vmem:[%s5204_s9 + $0xb8] sm:$0xff]   ;;  %v3963_v4 = vld [vmem:[%s5204_s9 + $0xb0] sm:$0xff]  }
 0x208   :  { %v3377_v6 = vpop.f32.mrf.mxu0 }
 0x209   :  { %v291_v7 = vadd.f32 %v3376_v5, %v159_v3  ;;  %v3964_v5 = vld [vmem:[%s5204_s9 + $0xa8] sm:$0xff]   ;;  %v3965_v6 = vld [vmem:[%s5204_s9 + $0xa0] sm:$0xff]  }
 0x20a   :  { %v3378_v8 = vpop.f32.mrf.mxu0 }
 0x20b   :  { %v296_v9 = vmul.f32 %v291_v7, %v291_v7  ;;  %v3967_v8 = vld [vmem:[%s5204_s9 + $0x90] sm:$0xff]  }
 0x20d   :  { %v297_v10 = vmul.f32 %v296_v9, %v291_v7  ;;  %v3968_v9 = vld [vmem:[%s5204_s9 + $0x88] sm:$0xff]  }
 0x20f   :  { %v298_v11 = vmul.f32 0.044715, %v297_v10  ;;  %v3969_v10 = vld [vmem:[%s5204_s9 + $0x80] sm:$0xff]  }
 0x211   :  { %v299_v12 = vadd.f32 %v298_v11, %v291_v7  ;;  %v3970_v11 = vld [vmem:[%s5204_s9 + $0x138] sm:$0xff]  }
 0x213   :  { %v300_v13 = vmul.f32 0.7978846, %v299_v12  ;;  %v3971_v12 = vld [vmem:[%s5204_s9 + $0x130] sm:$0xff]  }
 0x215   :  { %4124 = vtanh.f32 %v300_v13  ;;  %v3972_v13 = vld [vmem:[%s5204_s9 + $0x128] sm:$0xff]  }
 0x222   :  { %v4125_v14 = vpop.eup %4124 }
 0x223   :  { %v302_v15 = vadd.f32 1.0, %v4125_v14  ;;  %v3973_v14 = vld [vmem:[%s5204_s9 + $0x120] sm:$0xff]  }
 0x225   :  { %v303_v16 = vmul.f32 0.5, %v302_v15  ;;  %v3974_v15 = vld [vmem:[%s5204_s9 + $0x118] sm:$0xff]  }
 0x227   :  { %v304_v17 = vmul.f32 %v303_v16, %v291_v7  ;;  %v3966_v7 = vld [vmem:[%s5204_s9 + $0x98] sm:$0xff]   ;;  %v3975_v16 = vld [vmem:[%s5204_s9 + $0x110] sm:$0xff]  }
 0x229   :  { %v321_v18 = vpack.c.bf16 %v304_v17, %v304_v17  ;;  %v3976_v17 = vld [vmem:[%s5204_s9 + $0x108] sm:$0xff]  }
 0x22b   :  { %3570 = vmatmul.mubr.bf16.vlgmr.msra.gmra.mxu1 %v321_v18  ;;  %v3977_v18 = vld [vmem:[%s5204_s9 + $0x100] sm:$0xff]  }
 0x22c   :  { %3609 = vmatprep.mubr.msk.bf16.mxu1 %vm4187_vm0, %v4186_v56  ;;  %3594 = vmatpush3.bf16.msra.mxu1 %v3947_v20  ;;  %v3979_v20 = vld [vmem:[%s5204_s9 + $0x1b0] sm:$0xff]  }
 0x22d   :  { %3595 = vmatprep.subr.bf16.mxu1 %v4186_v56 }
 0x230   :  { %3596 = vmatpush3.bf16.msra.mxu1 %v3949_v37  ;;  %v3991_v37 = vld [vmem:[%s5204_s9 + $0x210] sm:$0xff]  }
 0x231   :  { %3597 = vmatprep.subr.bf16.mxu1 %v4186_v56 }
 0x234   :  { %3598 = vmatpush3.bf16.msra.mxu1 %v3951_v39  ;;  %v3993_v39 = vld [vmem:[%s5204_s9 + $0x200] sm:$0xff]  }
 0x235   :  { %3599 = vmatprep.subr.bf16.mxu1 %v4186_v56 }
 0x238   :  { %3600 = vmatpush3.bf16.msra.mxu1 %v3953_v41  ;;  %v3995_v41 = vld [vmem:[%s5204_s9 + $0x2b0] sm:$0xff]  }
 0x239   :  { %3601 = vmatprep.subr.bf16.mxu1 %v4186_v56 }
 0x23c   :  { %3602 = vmatpush3.bf16.msra.mxu1 %v3955_v43  ;;  %v3997_v43 = vld [vmem:[%s5204_s9 + $0x2a0] sm:$0xff]  }
 0x23d   :  { %3603 = vmatprep.subr.bf16.mxu1 %v4186_v56 }
 0x240   :  { %3604 = vmatpush3.bf16.msra.mxu1 %v3957_v45  ;;  %v3999_v45 = vld [vmem:[%s5204_s9 + $0x290] sm:$0xff]  }
 0x241   :  { %3605 = vmatprep.subr.bf16.mxu1 %v4186_v56 }
 0x244   :  { %3606 = vmatpush3.bf16.msra.mxu1 %v3959_v47  ;;  %v4001_v47 = vld [vmem:[%s5204_s9 + $0x280] sm:$0xff]  }
 0x245   :  { %3607 = vmatprep.subr.bf16.mxu1 %v4186_v56 }
 0x248   :  { %3608 = vmatpush3.bf16.msra.mxu1 %v3961_v49 }
 0x249   :  { %3633 = vmatprep.subr.bf16.mxu1 %v4186_v56 }
 0x2eb   :  { %v410_v25 = vpop.f32.mrf.mxu1 }
 0x2ec   :  { %v4406_v26 = vadd.f32 %v410_v25, %v327_v23  ;;  %v3982_v23 = vld [vmem:[%s5204_s9 + $0x198] sm:$0xff]   ;;  %v3984_v25 = vld [vmem:[%s5204_s9 + $0x188] sm:$0xff]  }
 0x2ed   :  { %v3571_v28 = vpop.f32.mrf.mxu1 }
 0x2ee   :  { %v419_v30 = vmul.f32 %v4406_v26, %v4406_v26  ;;  %v3985_v28 = vld [vmem:[%s5204_s9 + $0x180] sm:$0xff]  }
 0x2ef   :  { %v413_v32 = vpop.f32.mrf.mxu1 }
 0x2f0   :  { %421 = vadd.xlane.f32.xlu1 %v419_v30  ;;  %v3986_v30 = vld [vmem:[%s5204_s9 + $0x238] sm:$0xff]   ;;  %v3987_v32 = vld [vmem:[%s5204_s9 + $0x230] sm:$0xff]  }
 0x2f1   :  { %v3572_v34 = vpop.f32.mrf.mxu1 }
 0x2f2   :  { %v3989_v34 = vld [vmem:[%s5204_s9 + $0x220] sm:$0xff]  }
 0x2f4   :  { %423 = vadd.xlane.f32.xlu1 %v420_v33  ;;  %v3988_v33 = vld [vmem:[%s5204_s9 + $0x228] sm:$0xff]  }
 0x379   :  { %v422_v50 = vpop.xlane.xlu1 %421 }
 0x37a   :  { %v426_v51 = vmul.f32 0.0078125, %v422_v50 }
 0x37c   :  { %v428_v52 = vadd.f32 1e-06, %v426_v51 }
 0x37d   :  { %v424_v53 = vpop.xlane.xlu1 %423 }
 0x37e   :  { %4126 = vrsqrt.f32 %v428_v52  ;;  %v427_v54 = vmul.f32 0.0078125, %v424_v53 }
 0x380   :  { %v429_v55 = vadd.f32 1e-06, %v427_v54 }
 0x382   :  { %4128 = vrsqrt.f32 %v429_v55 }
 0x38b   :  { %v4127_v59 = vpop.eup %4126 }
 0x38c   :  { %v432_v61 = vmul.f32 %v4127_v59, %v4406_v26 }
 0x38e   :  { %v439_v0 = vmul.f32 %v438_v60, %v432_v61 }
 0x38f   :  { %v4129_v62 = vpop.eup %4128 }
 0x390   :  { %v433_v63 = vmul.f32 %v4129_v62, %v4408_v27 }
 0x392   :  { %v440_v1 = vmul.f32 %v438_v60, %v433_v63 }
 0x394   :  { %v4479_v3 = vpack.c.bf16 %v440_v1, %v439_v0 }
 0x396   :  { %3590 = vmatmul.mubr.bf16.vlgmr.msra.gmra.mxu0 %v4479_v3  ;;  %3610 = vmatmul.mubr.bf16.vlgmr.msra.gmra.mxu1 %v4479_v3 }
 0x397   :  { %3614 = vmatpush3.bf16.msra.mxu0 %v3962_v2  ;;  %3629 = vmatprep.mubr.msk.bf16.mxu0 %vm4187_vm0, %v4186_v56 }
 0x398   :  { %3615 = vmatprep.subr.bf16.mxu0 %v4186_v56  ;;  %3635 = vmatprep.mubr.msk.bf16.mxu1 %vm4187_vm0, %v4186_v56 }
 0x39b   :  { %3616 = vmatpush3.bf16.msra.mxu0 %v3963_v4 }
 0x39c   :  { %3617 = vmatprep.subr.bf16.mxu0 %v4186_v56 }
 0x39f   :  { %3618 = vmatpush3.bf16.msra.mxu0 %v3964_v5 }
 0x3a0   :  { %3619 = vmatprep.subr.bf16.mxu0 %v4186_v56 }
 0x3a3   :  { %3620 = vmatpush3.bf16.msra.mxu0 %v3965_v6 }
 0x3a4   :  { %3621 = vmatprep.subr.bf16.mxu0 %v4186_v56 }
 0x3a7   :  { %3622 = vmatpush3.bf16.msra.mxu0 %v3966_v7 }
 0x3a8   :  { %3623 = vmatprep.subr.bf16.mxu0 %v4186_v56 }
 0x3ab   :  { %3624 = vmatpush3.bf16.msra.mxu0 %v3967_v8 }
 0x3ac   :  { %3625 = vmatprep.subr.bf16.mxu0 %v4186_v56 }
 0x3af   :  { %3626 = vmatpush3.bf16.msra.mxu0 %v3968_v9 }
 0x3b0   :  { %3627 = vmatprep.subr.bf16.mxu0 %v4186_v56 }
 0x3b3   :  { %3628 = vmatpush3.bf16.msra.mxu0 %v3969_v10 }
 0x3b4   :  { %3665 = vmatprep.subr.bf16.mxu0 %v4186_v56 }
 0x3b6   :  { %3630 = vmatmul.mubr.bf16.vlgmr.msra.gmra.mxu0 %v4479_v3 }
 0x3b7   :  { %3666 = vmatpush3.bf16.msra.mxu0 %v3970_v11  ;;  %3681 = vmatprep.mubr.msk.bf16.mxu0 %vm4187_vm0, %v4186_v56 }
 0x3b8   :  { %3667 = vmatprep.subr.bf16.mxu0 %v4186_v56 }
 0x3bb   :  { %3668 = vmatpush3.bf16.msra.mxu0 %v3971_v12 }
 0x3bc   :  { %3669 = vmatprep.subr.bf16.mxu0 %v4186_v56 }
 0x3bf   :  { %3670 = vmatpush3.bf16.msra.mxu0 %v3972_v13 }
 0x3c0   :  { %3671 = vmatprep.subr.bf16.mxu0 %v4186_v56 }
 0x3c3   :  { %3672 = vmatpush3.bf16.msra.mxu0 %v3973_v14 }
 0x3c4   :  { %3673 = vmatprep.subr.bf16.mxu0 %v4186_v56 }
 0x3c7   :  { %3674 = vmatpush3.bf16.msra.mxu0 %v3974_v15 }
 0x3c8   :  { %3675 = vmatprep.subr.bf16.mxu0 %v4186_v56 }
 0x3cb   :  { %3676 = vmatpush3.bf16.msra.mxu0 %v3975_v16 }
 0x3cc   :  { %3677 = vmatprep.subr.bf16.mxu0 %v4186_v56 }
 0x3cf   :  { %3678 = vmatpush3.bf16.msra.mxu0 %v3976_v17 }
 0x3d0   :  { %3679 = vmatprep.subr.bf16.mxu0 %v4186_v56 }
 0x3d3   :  { %3680 = vmatpush3.bf16.msra.mxu0 %v3977_v18 }
 0x3d4   :  { %3717 = vmatprep.subr.bf16.mxu0 %v4186_v56 }
 0x3d6   :  { %3682 = vmatmul.mubr.bf16.vlgmr.msra.gmra.mxu0 %v4479_v3 }
 0x3d7   :  { %3718 = vmatpush3.bf16.msra.mxu0 %v3978_v19  ;;  %3733 = vmatprep.mubr.msk.bf16.mxu0 %vm4187_vm0, %v4186_v56 }
 0x3d8   :  { %3719 = vmatprep.subr.bf16.mxu0 %v4186_v56 }
 0x3db   :  { %3720 = vmatpush3.bf16.msra.mxu0 %v3979_v20 }
 0x3dc   :  { %3721 = vmatprep.subr.bf16.mxu0 %v4186_v56 }
 0x3df   :  { %3722 = vmatpush3.bf16.msra.mxu0 %v3980_v21 }
 0x3e0   :  { %3723 = vmatprep.subr.bf16.mxu0 %v4186_v56 }
 0x3e3   :  { %3724 = vmatpush3.bf16.msra.mxu0 %v3981_v22 }
 0x3e4   :  { %3725 = vmatprep.subr.bf16.mxu0 %v4186_v56 }
 0x3e7   :  { %3726 = vmatpush3.bf16.msra.mxu0 %v3982_v23  ;;  %v4686_v23 = vand.u32 127, %v78_v29 }
 0x3e8   :  { %3727 = vmatprep.subr.bf16.mxu0 %v4186_v56 }
 0x3e9   :  { %vm816_vm2 = vcmp.le.s32.totalorder %v4686_v23, %v4329_v31 }
 0x3eb   :  { %3728 = vmatpush3.bf16.msra.mxu0 %v3983_v24 }
 0x3ec   :  { %3729 = vmatprep.subr.bf16.mxu0 %v4186_v56 }
 0x3ef   :  { %3730 = vmatpush3.bf16.msra.mxu0 %v3984_v25  ;;  %v4691_v25 = vadd.s32 8, %v4329_v31 }
 0x3f0   :  { %3731 = vmatprep.subr.bf16.mxu0 %v4186_v56 }
 0x3f1   :  { %vm817_vm4 = vcmp.le.s32.totalorder %v4686_v23, %v4691_v25 }
 0x3f3   :  { %3732 = vmatpush3.bf16.msra.mxu0 %v3985_v28 }
 0x3f4   :  { %3757 = vmatprep.subr.bf16.mxu0 %v4186_v56 }
 0x3f6   :  { %3734 = vmatmul.mubr.bf16.vlgmr.msra.gmra.mxu0 %v4479_v3 }
 0x3f7   :  { %3758 = vmatpush3.bf16.msra.mxu0 %v3986_v30  ;;  %3773 = vmatprep.mubr.msk.bf16.mxu0 %vm4187_vm0, %v4186_v56 }
 0x3f8   :  { %3759 = vmatprep.subr.bf16.mxu0 %v4186_v56 }
 0x3fb   :  { %3760 = vmatpush3.bf16.msra.mxu0 %v3987_v32 }
 0x3fc   :  { %3761 = vmatprep.subr.bf16.mxu0 %v4186_v56 }
 0x3ff   :  { %3762 = vmatpush3.bf16.msra.mxu0 %v3988_v33 }
 0x400   :  { %3763 = vmatprep.subr.bf16.mxu0 %v4186_v56 }
 0x403   :  { %3764 = vmatpush3.bf16.msra.mxu0 %v3989_v34 }
 0x404   :  { %3765 = vmatprep.subr.bf16.mxu0 %v4186_v56 }
 0x407   :  { %3766 = vmatpush3.bf16.msra.mxu0 %v3990_v36 }
 0x408   :  { %3767 = vmatprep.subr.bf16.mxu0 %v4186_v56 }
 0x40b   :  { %3768 = vmatpush3.bf16.msra.mxu0 %v3991_v37 }
 0x40c   :  { %3769 = vmatprep.subr.bf16.mxu0 %v4186_v56 }
 0x40f   :  { %3770 = vmatpush3.bf16.msra.mxu0 %v3992_v38 }
 0x410   :  { %3771 = vmatprep.subr.bf16.mxu0 %v4186_v56 }
 0x413   :  { %3772 = vmatpush3.bf16.msra.mxu0 %v3993_v39 }
 0x414   :  { %3809 = vmatprep.subr.bf16.mxu0 %v4186_v56 }
 0x416   :  { %3774 = vmatmul.mubr.bf16.vlgmr.msra.gmra.mxu0 %v4479_v3 }
 0x417   :  { %3810 = vmatpush3.bf16.msra.mxu0 %v3994_v40  ;;  %3825 = vmatprep.mubr.msk.bf16.mxu0 %vm4187_vm0, %v4186_v56 }
 0x418   :  { %3811 = vmatprep.subr.bf16.mxu0 %v4186_v56 }
 0x41b   :  { %3812 = vmatpush3.bf16.msra.mxu0 %v3995_v41 }
 0x41c   :  { %3813 = vmatprep.subr.bf16.mxu0 %v4186_v56 }
 0x41f   :  { %3814 = vmatpush3.bf16.msra.mxu0 %v3996_v42 }
 0x420   :  { %3815 = vmatprep.subr.bf16.mxu0 %v4186_v56 }
 0x423   :  { %3816 = vmatpush3.bf16.msra.mxu0 %v3997_v43 }
 0x424   :  { %3817 = vmatprep.subr.bf16.mxu0 %v4186_v56 }
 0x427   :  { %3818 = vmatpush3.bf16.msra.mxu0 %v3998_v44 }
 0x428   :  { %3819 = vmatprep.subr.bf16.mxu0 %v4186_v56 }
 0x42b   :  { %3820 = vmatpush3.bf16.msra.mxu0 %v3999_v45 }
 0x42c   :  { %3821 = vmatprep.subr.bf16.mxu0 %v4186_v56 }
 0x42f   :  { %3822 = vmatpush3.bf16.msra.mxu0 %v4000_v46 }
 0x430   :  { %3823 = vmatprep.subr.bf16.mxu0 %v4186_v56 }
 0x433   :  { %3824 = vmatpush3.bf16.msra.mxu0 %v4001_v47 }
 0x434   :  { %3849 = vmatprep.subr.bf16.mxu0 %v4186_v56 }
 0x436   :  { %3826 = vmatmul.mubr.bf16.vlgmr.msra.gmra.mxu0 %v4479_v3 }
 0x437   :  { %3851 = vmatprep.mubr.msk.bf16.mxu0 %vm4187_vm0, %v4186_v56 }
 0x456   :  { %v540_v48 = vpop.f32.mrf.mxu0  ;;  %v646_v49 = vpop.f32.mrf.mxu1 }
 0x458   :  { %v3591_v50 = vpop.f32.mrf.mxu0  ;;  %v3611_v51 = vpop.f32.mrf.mxu1 }
 0x45a   :  { %v543_v52 = vpop.f32.mrf.mxu0  ;;  %v649_v53 = vpop.f32.mrf.mxu1 }
 0x45b   :  { %v760_v54 = vpack.c.bf16 %v649_v53, %v646_v49  ;;  %v759_v59 = vpack.c.bf16 %v543_v52, %v540_v48 }
 0x45c   :  { %v3592_v55 = vpop.f32.mrf.mxu0  ;;  %v3612_v57 = vpop.f32.mrf.mxu1 }
 0x45d   :  { %v766_v58 = vsel %vm761_vm1, %v760_v54, 0  ;;  %v4002_v55 = vld [vmem:[%s5204_s9 + $0xf8] sm:$0xff]  }
 0x45e   :  { %3634 = vmatpush3.bf16.xpose.msra.mxu1 %v766_v58  ;;  %v4003_v58 = vld [vmem:[%s5204_s9 + $0xf0] sm:$0xff]  }
 0x45f   :  { %3639 = vmatprep.subr.bf16.mxu1 %v4186_v56 }
 0x465   :  { %3636 = vmatmul.mubr.msk.bf16.vlgmr.msra.gmra.mxu1 %vm761_vm1, %v759_v59  ;;  %v4004_v59 = vld [vmem:[%s5204_s9 + $0xe8] sm:$0xff]  }
 0x466   :  { %3641 = vmatprep.mubr.msk.bf16.mxu1 %vm4187_vm0, %v4186_v56 }
 0x476   :  { %v752_v60 = vpop.f32.mrf.mxu0 }
 0x478   :  { %v3631_v61 = vpop.f32.mrf.mxu0 }
 0x479   :  { %v4006_v61 = vld [vmem:[%s5204_s9 + $0xd8] sm:$0xff]  }
 0x47a   :  { %v755_v62 = vpop.f32.mrf.mxu0 }
 0x47b   :  { %v844_v63 = vpack.c.bf16 %v755_v62, %v752_v60  ;;  %v4005_v60 = vld [vmem:[%s5204_s9 + $0xe0] sm:$0xff]   ;;  %v4007_v62 = vld [vmem:[%s5204_s9 + $0xd0] sm:$0xff]  }
 0x47c   :  { %v3632_v0 = vpop.f32.mrf.mxu0 }
 0x47d   :  { %3640 = vmatpush3.bf16.msra.mxu1 %v844_v63  ;;  %v4008_v63 = vld [vmem:[%s5204_s9 + $0xc8] sm:$0xff]   ;;  %v4009_v0 = vld [vmem:[%s5204_s9 + $0xc0] sm:$0xff]  }
 0x47e   :  { %3645 = vmatprep.subr.bf16.mxu1 %v4186_v56 }
 0x496   :  { %v4665_v1 = vpop.f32.mrf.mxu0 }
 0x498   :  { %v3683_v2 = vpop.f32.mrf.mxu0 }
 0x499   :  { %v4010_v2 = vld [vmem:[%s5204_s9 + $0x178] sm:$0xff]  }
 0x49a   :  { %v4667_v4 = vpop.f32.mrf.mxu0 }
 0x49b   :  { %v1208_v5 = vpack.c.bf16 %v4667_v4, %v4665_v1 }
 0x49c   :  { %v3684_v6 = vpop.f32.mrf.mxu0 }
 0x49d   :  { %v4011_v6 = vld [vmem:[%s5204_s9 + $0x170] sm:$0xff]  }
 0x4b6   :  { %v4671_v7 = vpop.f32.mrf.mxu0 }
 0x4b8   :  { %v3735_v8 = vpop.f32.mrf.mxu0 }
 0x4b9   :  { %v4012_v8 = vld [vmem:[%s5204_s9 + $0x168] sm:$0xff]  }
 0x4ba   :  { %v4673_v9 = vpop.f32.mrf.mxu0 }
 0x4bb   :  { %v1646_v10 = vpack.c.bf16 %v4673_v9, %v4671_v7 }
 0x4bc   :  { %v3736_v11 = vpop.f32.mrf.mxu0 }
 0x4bd   :  { %v4013_v11 = vld [vmem:[%s5204_s9 + $0x160] sm:$0xff]  }
 0x4d6   :  { %v4677_v12 = vpop.f32.mrf.mxu0 }
 0x4d8   :  { %v3775_v13 = vpop.f32.mrf.mxu0 }
 0x4d9   :  { %v4014_v13 = vld [vmem:[%s5204_s9 + $0x158] sm:$0xff]  }
 0x4da   :  { %v4679_v14 = vpop.f32.mrf.mxu0 }
 0x4db   :  { %v1722_v15 = vpack.c.bf16 %v4679_v14, %v4677_v12 }
 0x4dc   :  { %v3776_v16 = vpop.f32.mrf.mxu0 }
 0x4dd   :  { %v4015_v16 = vld [vmem:[%s5204_s9 + $0x150] sm:$0xff]  }
 0x4f6   :  { %v1972_v17 = vpop.f32.mrf.mxu0 }
 0x4f8   :  { %v3827_v18 = vpop.f32.mrf.mxu0 }
 0x4f9   :  { %v4017_v18 = vld [vmem:[%s5204_s9 + $0x140] sm:$0xff]  }
 0x4fa   :  { %v1975_v19 = vpop.f32.mrf.mxu0 }
 0x4fb   :  { %v2086_v20 = vpack.c.bf16 %v1975_v19, %v1972_v17  ;;  %v4016_v17 = vld [vmem:[%s5204_s9 + $0x148] sm:$0xff]   ;;  %v1213_v19 = vsel %vm761_vm1, %v1208_v5, 0 }
 0x4fc   :  { %v3828_v21 = vpop.f32.mrf.mxu0 }
 0x4fd   :  { %v2091_v22 = vsel %vm761_vm1, %v2086_v20, 0 }
 0x4fe   :  { %3850 = vmatpush3.bf16.xpose.msra.mxu0 %v2091_v22 }
 0x4ff   :  { %3855 = vmatprep.subr.bf16.mxu0 %v4186_v56 }
 0x525   :  { %v802_v24 = vpop.f32.mrf.mxu1 }
 0x526   :  { %v809_v28 = vmul.f32 0.17677669, %v802_v24 }
 0x527   :  { %v3637_v30 = vpop.f32.mrf.mxu1 }
 0x528   :  { %v818_v32 = vsel %vm816_vm2, %v809_v28, -1e+30 }
 0x529   :  { %v805_v33 = vpop.f32.mrf.mxu1  ;;  %v821_v34 = vsel %vm820_vm3, %v818_v32, -inf }
 0x52a   :  { %v810_v29 = vmul.f32 0.17677669, %v805_v33  ;;  %822 = vmax.xlane.f32.xlu0 %v821_v34 }
 0x52b   :  { %v3638_v36 = vpop.f32.mrf.mxu1 }
 0x52c   :  { %v819_v37 = vsel %vm817_vm4, %v810_v29, -1e+30 }
 0x52d   :  { %v824_v38 = vsel %vm820_vm3, %v819_v37, -inf }
 0x52e   :  { %825 = vmax.xlane.f32.xlu1 %v824_v38 }
 0x5b3   :  { %v823_v39 = vpop.xlane.xlu0 %822 }
 0x5b4   :  { %v827_v40 = vsub.f32 %v818_v32, %v823_v39 }
 0x5b6   :  { %v829_v41 = vmul.f32 1.442695, %v827_v40 }
 0x5b7   :  { %v826_v42 = vpop.xlane.xlu1 %825 }
 0x5b8   :  { %4130 = vpow2.f32 %v829_v41  ;;  %v828_v43 = vsub.f32 %v819_v37, %v826_v42 }
 0x5ba   :  { %v831_v44 = vmul.f32 1.442695, %v828_v43 }
 0x5bc   :  { %4132 = vpow2.f32 %v831_v44 }
 0x5c5   :  { %v4131_v45 = vpop.eup %4130 }
 0x5c6   :  { %v833_v46 = vsel %vm820_vm3, %v4131_v45, 0.0 }
 0x5c7   :  { %834 = vadd.xlane.f32.xlu0 %v833_v46 }
 0x5c9   :  { %v4133_v47 = vpop.eup %4132 }
 0x5ca   :  { %v836_v48 = vsel %vm820_vm3, %v4133_v47, 0.0 }
 0x5cb   :  { %837 = vadd.xlane.f32.xlu1 %v836_v48 }
 0x650   :  { %v835_v49 = vpop.xlane.xlu0 %834 }
 0x651   :  { %4134 = vrcp.f32 %v835_v49 }
 0x654   :  { %v838_v50 = vpop.xlane.xlu1 %837 }
 0x655   :  { %4136 = vrcp.f32 %v838_v50 }
 0x65e   :  { %v4135_v51 = vpop.eup %4134 }
 0x65f   :  { %v841_v53 = vmul.f32 %v4135_v51, %v4131_v45 }
 0x662   :  { %v4137_v52 = vpop.eup %4136 }
 0x663   :  { %v842_v54 = vmul.f32 %v4137_v52, %v4133_v47 }
 0x665   :  { %v843_v57 = vpack.c.bf16 %v842_v54, %v841_v53 }
 0x667   :  { %3642 = vmatmul.mubr.msk.bf16.vlgmr.msra.gmra.mxu1 %vm820_vm3, %v843_v57 }
 0x668   :  { %3646 = vmatpush3.bf16.msra.mxu1 %v4002_v55  ;;  %3661 = vmatprep.mubr.msk.bf16.mxu1 %vm4187_vm0, %v4186_v56 }
 0x669   :  { %3647 = vmatprep.subr.bf16.mxu1 %v4186_v56 }
 0x66c   :  { %3648 = vmatpush3.bf16.msra.mxu1 %v4003_v58 }
 0x66d   :  { %3649 = vmatprep.subr.bf16.mxu1 %v4186_v56 }
 0x670   :  { %3650 = vmatpush3.bf16.msra.mxu1 %v4004_v59 }
 0x671   :  { %3651 = vmatprep.subr.bf16.mxu1 %v4186_v56 }
 0x674   :  { %3652 = vmatpush3.bf16.msra.mxu1 %v4005_v60 }
 0x675   :  { %3653 = vmatprep.subr.bf16.mxu1 %v4186_v56 }
 0x678   :  { %3654 = vmatpush3.bf16.msra.mxu1 %v4006_v61 }
 0x679   :  { %3655 = vmatprep.subr.bf16.mxu1 %v4186_v56 }
 0x67c   :  { %3656 = vmatpush3.bf16.msra.mxu1 %v4007_v62 }
 0x67d   :  { %3657 = vmatprep.subr.bf16.mxu1 %v4186_v56 }
 0x680   :  { %3658 = vmatpush3.bf16.msra.mxu1 %v4008_v63 }
 0x681   :  { %3659 = vmatprep.subr.bf16.mxu1 %v4186_v56 }
 0x684   :  { %3660 = vmatpush3.bf16.msra.mxu1 %v4009_v0  ;;  %v4018_v0 = vld [vmem:[%s5204_s9 + $0x1f8] sm:$0xff]  }
 0x685   :  { %3685 = vmatprep.subr.bf16.mxu1 %v4186_v56 }
 0x687   :  { %3662 = vmatmul.mubr.bf16.vlgmr.msra.gmra.mxu1 %v4479_v3 }
 0x688   :  { %3686 = vmatpush3.bf16.msra.mxu1 %v4010_v2  ;;  %3701 = vmatprep.mubr.msk.bf16.mxu1 %vm4187_vm0, %v4186_v56 }
 0x689   :  { %3687 = vmatprep.subr.bf16.mxu1 %v4186_v56 }
 0x68c   :  { %3688 = vmatpush3.bf16.msra.mxu1 %v4011_v6  ;;  %v4019_v6 = vld [vmem:[%s5204_s9 + $0x1f0] sm:$0xff]  }
 0x68d   :  { %3689 = vmatprep.subr.bf16.mxu1 %v4186_v56 }
 0x690   :  { %3690 = vmatpush3.bf16.msra.mxu1 %v4012_v8  ;;  %v4020_v8 = vld [vmem:[%s5204_s9 + $0x1e8] sm:$0xff]  }
 0x691   :  { %3691 = vmatprep.subr.bf16.mxu1 %v4186_v56 }
 0x694   :  { %3692 = vmatpush3.bf16.msra.mxu1 %v4013_v11  ;;  %v4021_v11 = vld [vmem:[%s5204_s9 + $0x1e0] sm:$0xff]  }
 0x695   :  { %3693 = vmatprep.subr.bf16.mxu1 %v4186_v56 }
 0x698   :  { %3694 = vmatpush3.bf16.msra.mxu1 %v4014_v13  ;;  %v4022_v13 = vld [vmem:[%s5204_s9 + $0x1d8] sm:$0xff]  }
 0x699   :  { %3695 = vmatprep.subr.bf16.mxu1 %v4186_v56 }
 0x69c   :  { %3696 = vmatpush3.bf16.msra.mxu1 %v4015_v16  ;;  %v4023_v16 = vld [vmem:[%s5204_s9 + $0x1d0] sm:$0xff]  }
 0x69d   :  { %3697 = vmatprep.subr.bf16.mxu1 %v4186_v56 }
 0x6a0   :  { %3698 = vmatpush3.bf16.msra.mxu1 %v4016_v17  ;;  %v4024_v17 = vld [vmem:[%s5204_s9 + $0x1c8] sm:$0xff]  }
 0x6a1   :  { %3699 = vmatprep.subr.bf16.mxu1 %v4186_v56 }
 0x6a4   :  { %3700 = vmatpush3.bf16.msra.mxu1 %v4017_v18  ;;  %v4025_v18 = vld [vmem:[%s5204_s9 + $0x1c0] sm:$0xff]  }
 0x6a5   :  { %3705 = vmatprep.subr.bf16.mxu1 %v4186_v56 }
 0x6a7   :  { %3702 = vmatmul.mubr.bf16.vlgmr.msra.gmra.mxu1 %v4479_v3 }
 0x6a8   :  { %3706 = vmatpush3.bf16.xpose.msra.mxu1 %v1213_v19  ;;  %3707 = vmatprep.mubr.msk.bf16.mxu1 %vm4187_vm0, %v4186_v56 }
 0x6a9   :  { %3711 = vmatprep.subr.bf16.mxu1 %v4186_v56 }
 0x727   :  { %v4783_v20 = vpop.f32.mrf.mxu1 }
 0x729   :  { %v3643_v21 = vpop.f32.mrf.mxu1 }
 0x72b   :  { %v4785_v22 = vpop.f32.mrf.mxu1 }
 0x72d   :  { %v3644_v24 = vpop.f32.mrf.mxu1 }
 0x747   :  { %v988_v28 = vpop.f32.mrf.mxu1 }
 0x749   :  { %v3663_v30 = vpop.f32.mrf.mxu1 }
 0x74b   :  { %v991_v32 = vpop.f32.mrf.mxu1 }
 0x74c   :  { %v1207_v1 = vpack.c.bf16 %v991_v32, %v988_v28 }
 0x74d   :  { %v3664_v4 = vpop.f32.mrf.mxu1 }
 0x74e   :  { %3708 = vmatmul.mubr.msk.bf16.vlgmr.msra.gmra.mxu1 %vm761_vm1, %v1207_v1 }
 0x74f   :  { %3713 = vmatprep.mubr.msk.bf16.mxu1 %vm4187_vm0, %v4186_v56 }
 0x767   :  { %v1200_v5 = vpop.f32.mrf.mxu1 }
 0x769   :  { %v3703_v33 = vpop.f32.mrf.mxu1 }
 0x76b   :  { %v1203_v34 = vpop.f32.mrf.mxu1 }
 0x76c   :  { %v1283_v29 = vpack.c.bf16 %v1203_v34, %v1200_v5 }
 0x76d   :  { %v3704_v36 = vpop.f32.mrf.mxu1 }
 0x76e   :  { %3712 = vmatpush3.bf16.msra.mxu1 %v1283_v29 }
 0x76f   :  { %3737 = vmatprep.subr.bf16.mxu1 %v4186_v56 }
 0x80e   :  { %v1249_v37 = vpop.f32.mrf.mxu1 }
 0x80f   :  { %v1256_v38 = vmul.f32 0.17677669, %v1249_v37 }
 0x810   :  { %v3709_v39 = vpop.f32.mrf.mxu1 }
 0x811   :  { %v1258_v40 = vsel %vm816_vm2, %v1256_v38, -1e+30 }
 0x812   :  { %v1252_v41 = vpop.f32.mrf.mxu1  ;;  %v1260_v42 = vsel %vm820_vm3, %v1258_v40, -inf }
 0x813   :  { %v1257_v43 = vmul.f32 0.17677669, %v1252_v41  ;;  %1261 = vmax.xlane.f32.xlu0 %v1260_v42 }
 0x814   :  { %v3710_v44 = vpop.f32.mrf.mxu1 }
 0x815   :  { %v1259_v45 = vsel %vm817_vm4, %v1257_v43, -1e+30 }
 0x816   :  { %v1263_v46 = vsel %vm820_vm3, %v1259_v45, -inf }
 0x817   :  { %1264 = vmax.xlane.f32.xlu1 %v1263_v46 }
 0x89c   :  { %v1262_v47 = vpop.xlane.xlu0 %1261 }
 0x89d   :  { %v1266_v48 = vsub.f32 %v1258_v40, %v1262_v47 }
 0x89f   :  { %v1268_v49 = vmul.f32 1.442695, %v1266_v48 }
 0x8a0   :  { %v1265_v50 = vpop.xlane.xlu1 %1264 }
 0x8a1   :  { %4138 = vpow2.f32 %v1268_v49  ;;  %v1267_v51 = vsub.f32 %v1259_v45, %v1265_v50 }
 0x8a3   :  { %v1270_v52 = vmul.f32 1.442695, %v1267_v51 }
 0x8a5   :  { %4140 = vpow2.f32 %v1270_v52 }
 0x8ae   :  { %v4139_v53 = vpop.eup %4138 }
 0x8af   :  { %v1272_v54 = vsel %vm820_vm3, %v4139_v53, 0.0 }
 0x8b0   :  { %1273 = vadd.xlane.f32.xlu0 %v1272_v54 }
 0x8b2   :  { %v4141_v55 = vpop.eup %4140 }
 0x8b3   :  { %v1275_v57 = vsel %vm820_vm3, %v4141_v55, 0.0 }
 0x8b4   :  { %1276 = vadd.xlane.f32.xlu1 %v1275_v57 }
 0x939   :  { %v1274_v58 = vpop.xlane.xlu0 %1273 }
 0x93a   :  { %4142 = vrcp.f32 %v1274_v58  ;;  %v4027_v58 = vld [vmem:[%s5204_s9 + $0x270] sm:$0xff]  }
 0x93d   :  { %v1277_v59 = vpop.xlane.xlu1 %1276 }
 0x93e   :  { %4144 = vrcp.f32 %v1277_v59  ;;  %v4028_v59 = vld [vmem:[%s5204_s9 + $0x268] sm:$0xff]  }
 0x947   :  { %v4143_v60 = vpop.eup %4142 }
 0x948   :  { %v1280_v62 = vmul.f32 %v4143_v60, %v4139_v53  ;;  %v4029_v60 = vld [vmem:[%s5204_s9 + $0x260] sm:$0xff]  }
 0x94b   :  { %v4145_v61 = vpop.eup %4144 }
 0x94c   :  { %v1281_v63 = vmul.f32 %v4145_v61, %v4141_v55  ;;  %v4026_v55 = vld [vmem:[%s5204_s9 + $0x278] sm:$0xff]  }
 0x94d   :  { %v4030_v61 = vld [vmem:[%s5204_s9 + $0x258] sm:$0xff]  }
 0x94e   :  { %v1282_v2 = vpack.c.bf16 %v1281_v63, %v1280_v62  ;;  %v4031_v62 = vld [vmem:[%s5204_s9 + $0x250] sm:$0xff]   ;;  %v4032_v63 = vld [vmem:[%s5204_s9 + $0x248] sm:$0xff]  }
 0x950   :  { %3714 = vmatmul.mubr.msk.bf16.vlgmr.msra.gmra.mxu1 %vm820_vm3, %v1282_v2  ;;  %v4034_v2 = vld [vmem:[%s5204_s9 + $0x2f8] sm:$0xff]  }
 0x951   :  { %3738 = vmatpush3.bf16.msra.mxu1 %v4018_v0  ;;  %3753 = vmatprep.mubr.msk.bf16.mxu1 %vm4187_vm0, %v4186_v56  ;;  %v4033_v0 = vld [vmem:[%s5204_s9 + $0x240] sm:$0xff]  }
 0x952   :  { %3739 = vmatprep.subr.bf16.mxu1 %v4186_v56 }
 0x955   :  { %3740 = vmatpush3.bf16.msra.mxu1 %v4019_v6  ;;  %v4035_v6 = vld [vmem:[%s5204_s9 + $0x2f0] sm:$0xff]  }
 0x956   :  { %3741 = vmatprep.subr.bf16.mxu1 %v4186_v56 }
 0x959   :  { %3742 = vmatpush3.bf16.msra.mxu1 %v4020_v8  ;;  %v4036_v8 = vld [vmem:[%s5204_s9 + $0x2e8] sm:$0xff]  }
 0x95a   :  { %3743 = vmatprep.subr.bf16.mxu1 %v4186_v56 }
 0x95d   :  { %3744 = vmatpush3.bf16.msra.mxu1 %v4021_v11  ;;  %v4037_v11 = vld [vmem:[%s5204_s9 + $0x2e0] sm:$0xff]  }
 0x95e   :  { %3745 = vmatprep.subr.bf16.mxu1 %v4186_v56 }
 0x961   :  { %3746 = vmatpush3.bf16.msra.mxu1 %v4022_v13  ;;  %v4038_v13 = vld [vmem:[%s5204_s9 + $0x2d8] sm:$0xff]  }
 0x962   :  { %3747 = vmatprep.subr.bf16.mxu1 %v4186_v56 }
 0x965   :  { %3748 = vmatpush3.bf16.msra.mxu1 %v4023_v16  ;;  %v4039_v16 = vld [vmem:[%s5204_s9 + $0x2d0] sm:$0xff]  }
 0x966   :  { %3749 = vmatprep.subr.bf16.mxu1 %v4186_v56 }
 0x969   :  { %3750 = vmatpush3.bf16.msra.mxu1 %v4024_v17  ;;  %v4040_v17 = vld [vmem:[%s5204_s9 + $0x2c8] sm:$0xff]  }
 0x96a   :  { %3751 = vmatprep.subr.bf16.mxu1 %v4186_v56 }
 0x96d   :  { %3752 = vmatpush3.bf16.msra.mxu1 %v4025_v18  ;;  %v4041_v18 = vld [vmem:[%s5204_s9 + $0x2c0] sm:$0xff]   ;;  %s4188_s9 = smov 64  }
 0x96e   :  { %3777 = vmatprep.subr.bf16.mxu1 %v4186_v56 }
 0x970   :  { %3754 = vmatmul.mubr.bf16.vlgmr.msra.gmra.mxu1 %v4479_v3 }
 0x971   :  { %3779 = vmatprep.mubr.msk.bf16.mxu1 %vm4187_vm0, %v4186_v56 }
 0xa10   :  { %v4839_v19 = vpop.f32.mrf.mxu1 }
 0xa12   :  { %v3715_v21 = vpop.f32.mrf.mxu1 }
 0xa14   :  { %v4841_v24 = vpop.f32.mrf.mxu1 }
 0xa15   :  { %v3907_v28 = vpack.i.bf16 %v4841_v24, %v4839_v19  ;;  %v4043_v19 = vld [vmem:[%s5208_s10 + $0x30] sm:$0xff]   ;;  %v4044_v24 = vld [vmem:[%s5208_s10 + $0x28] sm:$0xff]  }
 0xa16   :  { %v3716_v30 = vpop.f32.mrf.mxu1 }
 0xa30   :  { %v1533_v32 = vpop.f32.mrf.mxu1 }
 0xa32   :  { %v3755_v1 = vpop.f32.mrf.mxu1 }
 0xa34   :  { %v1536_v4 = vpop.f32.mrf.mxu1 }
 0xa35   :  { %v1647_v5 = vpack.c.bf16 %v1536_v4, %v1533_v32 }
 0xa36   :  { %v3756_v33 = vpop.f32.mrf.mxu1 }
 0xa37   :  { %v1652_v34 = vsel %vm761_vm1, %v1647_v5, 0 }
 0xa38   :  { %3778 = vmatpush3.bf16.xpose.msra.mxu1 %v1652_v34 }
 0xa39   :  { %3783 = vmatprep.subr.bf16.mxu1 %v4186_v56 }
 0xa3f   :  { %3780 = vmatmul.mubr.msk.bf16.vlgmr.msra.gmra.mxu1 %vm761_vm1, %v1646_v10 }
 0xa40   :  { %3784 = vmatpush3.bf16.msra.mxu1 %v1722_v15  ;;  %3785 = vmatprep.mubr.msk.bf16.mxu1 %vm4187_vm0, %v4186_v56 }
 0xa41   :  { %3789 = vmatprep.subr.bf16.mxu1 %v4186_v56 }
 0xaff   :  { %v1688_v29 = vpop.f32.mrf.mxu1 }
 0xb00   :  { %v1695_v36 = vmul.f32 0.17677669, %v1688_v29 }
 0xb01   :  { %v3781_v37 = vpop.f32.mrf.mxu1 }
 0xb02   :  { %v1697_v38 = vsel %vm816_vm2, %v1695_v36, -1e+30 }
 0xb03   :  { %v1691_v39 = vpop.f32.mrf.mxu1  ;;  %v1699_v7 = vsel %vm820_vm3, %v1697_v38, -inf }
 0xb04   :  { %v1696_v9 = vmul.f32 0.17677669, %v1691_v39  ;;  %1700 = vmax.xlane.f32.xlu0 %v1699_v7 }
 0xb05   :  { %v3782_v10 = vpop.f32.mrf.mxu1 }
 0xb06   :  { %v1698_v12 = vsel %vm817_vm4, %v1696_v9, -1e+30 }
 0xb07   :  { %v1702_v14 = vsel %vm820_vm3, %v1698_v12, -inf }
 0xb08   :  { %1703 = vmax.xlane.f32.xlu1 %v1702_v14 }
 0xb8d   :  { %v1701_v15 = vpop.xlane.xlu0 %1700 }
 0xb8e   :  { %v1705_v40 = vsub.f32 %v1697_v38, %v1701_v15 }
 0xb90   :  { %v1707_v41 = vmul.f32 1.442695, %v1705_v40 }
 0xb91   :  { %v1704_v42 = vpop.xlane.xlu1 %1703 }
 0xb92   :  { %4146 = vpow2.f32 %v1707_v41  ;;  %v1706_v43 = vsub.f32 %v1698_v12, %v1704_v42 }
 0xb94   :  { %v1709_v44 = vmul.f32 1.442695, %v1706_v43 }
 0xb96   :  { %4148 = vpow2.f32 %v1709_v44 }
 0xb9f   :  { %v4147_v45 = vpop.eup %4146 }
 0xba0   :  { %v1711_v46 = vsel %vm820_vm3, %v4147_v45, 0.0 }
 0xba1   :  { %1712 = vadd.xlane.f32.xlu0 %v1711_v46 }
 0xba3   :  { %v4149_v47 = vpop.eup %4148 }
 0xba4   :  { %v1714_v48 = vsel %vm820_vm3, %v4149_v47, 0.0 }
 0xba5   :  { %1715 = vadd.xlane.f32.xlu1 %v1714_v48 }
 0xc2a   :  { %v1713_v49 = vpop.xlane.xlu0 %1712 }
 0xc2b   :  { %4150 = vrcp.f32 %v1713_v49 }
 0xc2e   :  { %v1716_v50 = vpop.xlane.xlu1 %1715 }
 0xc2f   :  { %4152 = vrcp.f32 %v1716_v50 }
 0xc38   :  { %v4151_v51 = vpop.eup %4150 }
 0xc39   :  { %v1719_v53 = vmul.f32 %v4151_v51, %v4147_v45 }
 0xc3c   :  { %v4153_v52 = vpop.eup %4152 }
 0xc3d   :  { %v1720_v54 = vmul.f32 %v4153_v52, %v4149_v47 }
 0xc3f   :  { %v1721_v57 = vpack.c.bf16 %v1720_v54, %v1719_v53 }
 0xc41   :  { %3786 = vmatmul.mubr.msk.bf16.vlgmr.msra.gmra.mxu1 %vm820_vm3, %v1721_v57 }
 0xc42   :  { %3790 = vmatpush3.bf16.msra.mxu1 %v4026_v55  ;;  %3805 = vmatprep.mubr.msk.bf16.mxu1 %vm4187_vm0, %v4186_v56 }
 0xc43   :  { %3791 = vmatprep.subr.bf16.mxu1 %v4186_v56 }
 0xc46   :  { %3792 = vmatpush3.bf16.msra.mxu1 %v4027_v58 }
 0xc47   :  { %3793 = vmatprep.subr.bf16.mxu1 %v4186_v56 }
 0xc4a   :  { %3794 = vmatpush3.bf16.msra.mxu1 %v4028_v59 }
 0xc4b   :  { %3795 = vmatprep.subr.bf16.mxu1 %v4186_v56 }
 0xc4e   :  { %3796 = vmatpush3.bf16.msra.mxu1 %v4029_v60  ;;  %v4042_v60 = vld [vmem:[%s5208_s10 + $0x38] sm:$0xff]  }
 0xc4f   :  { %3797 = vmatprep.subr.bf16.mxu1 %v4186_v56 }
 0xc52   :  { %3798 = vmatpush3.bf16.msra.mxu1 %v4030_v61  ;;  %v4046_v61 = vld [vmem:[%s5208_s10 + $0x18] sm:$0xff]  }
 0xc53   :  { %3799 = vmatprep.subr.bf16.mxu1 %v4186_v56 }
 0xc56   :  { %3800 = vmatpush3.bf16.msra.mxu1 %v4031_v62  ;;  %v4047_v62 = vld [vmem:[%s5208_s10 + $0x10] sm:$0xff]  }
 0xc57   :  { %3801 = vmatprep.subr.bf16.mxu1 %v4186_v56 }
 0xc5a   :  { %3802 = vmatpush3.bf16.msra.mxu1 %v4032_v63  ;;  %v4048_v63 = vld [vmem:[%s5208_s10 + $0x8] sm:$0xff]  }
 0xc5b   :  { %3803 = vmatprep.subr.bf16.mxu1 %v4186_v56 }
 0xc5e   :  { %3804 = vmatpush3.bf16.msra.mxu1 %v4033_v0  ;;  %v4049_v0 = vld [vmem:[%s5208_s10] sm:$0xff]  }
 0xc5f   :  { %3829 = vmatprep.subr.bf16.mxu1 %v4186_v56 }
 0xc61   :  { %3806 = vmatmul.mubr.bf16.vlgmr.msra.gmra.mxu1 %v4479_v3 }
 0xc62   :  { %3830 = vmatpush3.bf16.msra.mxu1 %v4034_v2  ;;  %3845 = vmatprep.mubr.msk.bf16.mxu1 %vm4187_vm0, %v4186_v56 }
 0xc63   :  { %3831 = vmatprep.subr.bf16.mxu1 %v4186_v56 }
 0xc66   :  { %3832 = vmatpush3.bf16.msra.mxu1 %v4035_v6 }
 0xc67   :  { %3833 = vmatprep.subr.bf16.mxu1 %v4186_v56 }
 0xc6a   :  { %3834 = vmatpush3.bf16.msra.mxu1 %v4036_v8 }
 0xc6b   :  { %3835 = vmatprep.subr.bf16.mxu1 %v4186_v56 }
 0xc6e   :  { %3836 = vmatpush3.bf16.msra.mxu1 %v4037_v11 }
 0xc6f   :  { %3837 = vmatprep.subr.bf16.mxu1 %v4186_v56 }
 0xc72   :  { %3838 = vmatpush3.bf16.msra.mxu1 %v4038_v13 }
 0xc73   :  { %3839 = vmatprep.subr.bf16.mxu1 %v4186_v56 }
 0xc76   :  { %3840 = vmatpush3.bf16.msra.mxu1 %v4039_v16 }
 0xc77   :  { %3841 = vmatprep.subr.bf16.mxu1 %v4186_v56 }
 0xc7a   :  { %3842 = vmatpush3.bf16.msra.mxu1 %v4040_v17 }
 0xc7b   :  { %3843 = vmatprep.subr.bf16.mxu1 %v4186_v56 }
 0xc7e   :  { %3844 = vmatpush3.bf16.msra.mxu1 %v4041_v18 }
 0xc81   :  { %3846 = vmatmul.mubr.bf16.vlgmr.msra.gmra.mxu1 %v4479_v3 }
 0xd01   :  { %v1760_v21 = vpop.f32.mrf.mxu1 }
 0xd03   :  { %v3787_v30 = vpop.f32.mrf.mxu1 }
 0xd05   :  { %v1763_v32 = vpop.f32.mrf.mxu1 }
 0xd06   :  { %v3912_v1 = vpack.i.bf16 %v1763_v32, %v1760_v21 }
 0xd07   :  { %v3788_v4 = vpop.f32.mrf.mxu1 }
 0xd21   :  { %v1866_v5 = vpop.f32.mrf.mxu1 }
 0xd23   :  { %v3807_v33 = vpop.f32.mrf.mxu1 }
 0xd25   :  { %v1869_v34 = vpop.f32.mrf.mxu1 }
 0xd26   :  { %v2085_v29 = vpack.c.bf16 %v1869_v34, %v1866_v5 }
 0xd27   :  { %v3808_v36 = vpop.f32.mrf.mxu1 }
 0xd28   :  { %3852 = vmatmul.mubr.msk.bf16.vlgmr.msra.gmra.mxu0 %vm761_vm1, %v2085_v29 }
 0xd29   :  { %3857 = vmatprep.mubr.msk.bf16.mxu0 %vm4187_vm0, %v4186_v56 }
 0xd41   :  { %v2078_v37 = vpop.f32.mrf.mxu1 }
 0xd43   :  { %v3847_v38 = vpop.f32.mrf.mxu1 }
 0xd45   :  { %v2081_v39 = vpop.f32.mrf.mxu1 }
 0xd46   :  { %v2161_v7 = vpack.c.bf16 %v2081_v39, %v2078_v37 }
 0xd47   :  { %v3848_v3 = vpop.f32.mrf.mxu1 }
 0xd48   :  { %3856 = vmatpush3.bf16.msra.mxu0 %v2161_v7  ;;  %v4050_v7 = vld [vmem:[%s5209_s12 + $0xe0] ss:$16 sps:$4 sm:$0xff]   ;;  %v4052_v3 = vld [vmem:[%s5209_s12 + $0xe4] ss:$16 sps:$4 sm:$0xff]  }
 0xd49   :  { %3861 = vmatprep.subr.bf16.mxu0 %v4186_v56  ;;  %2561 = vmatprep.subr.bf16.mxu1 %v4052_v3  ;;  %v4104_v3 = vld [vmem:[%s5211_s13 + $0x60] sm:$0xff]  }
 0xd4a   :  { %2562 = vmatpush1.bf16.msra.mxu1 %v4050_v7  ;;  %v4103_v7 = vld [vmem:[%s5211_s13 + $0x28] sm:$0xff]  }
 0xde8   :  { %v2127_v9 = vpop.f32.mrf.mxu0 }
 0xde9   :  { %v2134_v10 = vmul.f32 0.17677669, %v2127_v9 }
 0xdea   :  { %v3853_v12 = vpop.f32.mrf.mxu0 }
 0xdeb   :  { %v2136_v14 = vsel %vm816_vm2, %v2134_v10, -1e+30 }
 0xdec   :  { %v2130_v15 = vpop.f32.mrf.mxu0  ;;  %v2138_v40 = vsel %vm820_vm3, %v2136_v14, -inf }
 0xded   :  { %v2135_v41 = vmul.f32 0.17677669, %v2130_v15  ;;  %2139 = vmax.xlane.f32.xlu0 %v2138_v40 }
 0xdee   :  { %v3854_v42 = vpop.f32.mrf.mxu0 }
 0xdef   :  { %v2137_v43 = vsel %vm817_vm4, %v2135_v41, -1e+30 }
 0xdf0   :  { %v2141_v44 = vsel %vm820_vm3, %v2137_v43, -inf }
 0xdf1   :  { %2142 = vmax.xlane.f32.xlu1 %v2141_v44  ;;  %v4056_v44 = vld [vmem:[%s5209_s12 + $0xc0] ss:$16 sps:$4 sm:$0xff]  }
 0xe76   :  { %v2140_v45 = vpop.xlane.xlu0 %2139 }
 0xe77   :  { %v2144_v46 = vsub.f32 %v2136_v14, %v2140_v45  ;;  %v4064_v45 = vld [vmem:[%s5209_s12 + $0xa4] ss:$16 sps:$4 sm:$0xff]  }
 0xe79   :  { %v2146_v47 = vmul.f32 1.442695, %v2144_v46  ;;  %v4067_v46 = vld [vmem:[%s5209_s12 + $0xac] ss:$16 sps:$4 sm:$0xff]  }
 0xe7a   :  { %v2143_v48 = vpop.xlane.xlu1 %2142 }
 0xe7b   :  { %4154 = vpow2.f32 %v2146_v47  ;;  %v2145_v31 = vsub.f32 %v2137_v43, %v2143_v48  ;;  %v4058_v43 = vld [vmem:[%s5209_s12 + $0xc4] ss:$16 sps:$4 sm:$0xff]   ;;  %v4062_v47 = vld [vmem:[%s5209_s12 + $0xa0] ss:$16 sps:$4 sm:$0xff]   ;;  %v4065_v48 = vld [vmem:[%s5209_s12 + $0xa8] ss:$16 sps:$4 sm:$0xff]  }
 0xe7c   :  { %2563 = vmatprep.subr.bf16.mxu1 %v4058_v43  ;;  %v4113_v43 = vld [vmem:[%s5211_s13] sm:$0xff]  }
 0xe7d   :  { %v2148_v49 = vmul.f32 1.442695, %v2145_v31  ;;  %2564 = vmatpush1.bf16.msra.mxu1 %v4056_v44  ;;  %v4070_v31 = vld [vmem:[%s5209_s12 + $0x84] ss:$16 sps:$4 sm:$0xff]  }
 0xe7e   :  { %2565 = vmatprep.subr.bf16.mxu1 %v4064_v45 }
 0xe7f   :  { %4156 = vpow2.f32 %v2148_v49  ;;  %v4073_v49 = vld [vmem:[%s5209_s12 + $0x8c] ss:$16 sps:$4 sm:$0xff]  }
 0xe81   :  { %2566 = vmatpush1.bf16.msra.mxu1 %v4062_v47 }
 0xe82   :  { %2567 = vmatprep.subr.bf16.mxu1 %v4070_v31 }
 0xe88   :  { %v4155_v50 = vpop.eup %4154 }
 0xe89   :  { %v2150_v51 = vsel %vm820_vm3, %v4155_v50, 0.0 }
 0xe8a   :  { %2151 = vadd.xlane.f32.xlu0 %v2150_v51  ;;  %v4071_v51 = vld [vmem:[%s5209_s12 + $0x88] ss:$16 sps:$4 sm:$0xff]  }
 0xe8c   :  { %v4157_v52 = vpop.eup %4156 }
 0xe8d   :  { %v2153_v53 = vsel %vm820_vm3, %v4157_v52, 0.0 }
 0xe8e   :  { %2154 = vadd.xlane.f32.xlu1 %v2153_v53  ;;  %v4074_v53 = vld [vmem:[%s5209_s12 + $0x60] ss:$16 sps:$4 sm:$0xff]  }
 0xe9f   :  { %3913 = vrot.lane.b32.xlu1 %v3912_v1, %s4188_s9 }
 0xea0   :  { %3908 = vrot.lane.b32.xlu0 %v3907_v28, %s4189_s23  ;;  %v4045_v28 = vld [vmem:[%s5208_s10 + $0x20] sm:$0xff]  }
 0xf13   :  { %v2152_v23 = vpop.xlane.xlu0 %2151 }
 0xf14   :  { %4158 = vrcp.f32 %v2152_v23  ;;  %v4077_v23 = vld [vmem:[%s5209_s12 + $0x68] ss:$16 sps:$4 sm:$0xff]  }
 0xf17   :  { %v2155_v25 = vpop.xlane.xlu1 %2154  ;;  %v3909_v16 = vpop.permute.xlu0 %3908 }
 0xf18   :  { %4160 = vrcp.f32 %v2155_v25  ;;  %v3911_v18 = vunpack.i.h.bf16 %v3909_v16  ;;  %v3910_v21 = vunpack.i.l.bf16 %v3909_v16  ;;  %v4079_v25 = vld [vmem:[%s5209_s12 + $0x6c] ss:$16 sps:$4 sm:$0xff]  }
 0xf1a   :  { %v2231_v4 = vsel %vm761_vm1, %v4785_v22, %v3911_v18  ;;  %v2230_v5 = vsel %vm761_vm1, %v4783_v20, %v3910_v21  ;;  %v4053_v20 = vld [vmem:[%s5209_s12 + $0xe8] ss:$16 sps:$4 sm:$0xff]   ;;  %v4055_v22 = vld [vmem:[%s5209_s12 + $0xec] ss:$16 sps:$4 sm:$0xff]  }
 0xf1b   :  { %v3914_v17 = vpop.permute.xlu1 %3913 }
 0xf1c   :  { %v3916_v30 = vunpack.i.h.bf16 %v3914_v17  ;;  %v3915_v32 = vunpack.i.l.bf16 %v3914_v17  ;;  %v2346_v17 = vld [vmem:[%s5210_s11] sm:$0x1] }
 0xf1d   :  { %v2361_v18 = vunpack.c.l.bf16 %v2346_v17  ;;  %v4114_v17 = vld [vmem:[%s5212_s15 + $0x38] sm:$0xff]  }
 0xf1e   :  { %v2234_v29 = vsel %vm2232_vm5, %v2231_v4, %v3916_v30  ;;  %v2233_v36 = vsel %vm2232_vm5, %v2230_v5, %v3915_v32 }
 0xf1f   :  { %v2365_v32 = vrot.slane %v2361_v18, %v4338_v35 }
 0xf21   :  { %v4159_v54 = vpop.eup %4158 }
 0xf22   :  { %v2158_v57 = vmul.f32 %v4159_v54, %v4155_v50  ;;  %v4068_v50 = vld [vmem:[%s5209_s12 + $0x80] ss:$16 sps:$4 sm:$0xff]   ;;  %v4082_v54 = vld [vmem:[%s5209_s12 + $0x44] ss:$16 sps:$4 sm:$0xff]  }
 0xf23   :  { %2568 = vmatpush1.bf16.msra.mxu1 %v4068_v50 }
 0xf25   :  { %v4161_v55 = vpop.eup %4160 }
 0xf26   :  { %v2159_v58 = vmul.f32 %v4161_v55, %v4157_v52  ;;  %v4076_v52 = vld [vmem:[%s5209_s12 + $0x64] ss:$16 sps:$4 sm:$0xff]   ;;  %v4085_v55 = vld [vmem:[%s5209_s12 + $0x4c] ss:$16 sps:$4 sm:$0xff]  }
 0xf27   :  { %2569 = vmatprep.subr.bf16.mxu1 %v4076_v52 }
 0xf28   :  { %v2160_v59 = vpack.c.bf16 %v2159_v58, %v2158_v57  ;;  %2570 = vmatpush1.bf16.msra.mxu1 %v4074_v53  ;;  %v4080_v57 = vld [vmem:[%s5209_s12 + $0x40] ss:$16 sps:$4 sm:$0xff]   ;;  %v4083_v58 = vld [vmem:[%s5209_s12 + $0x48] ss:$16 sps:$4 sm:$0xff]  }
 0xf29   :  { %2571 = vmatprep.subr.bf16.mxu1 %v4082_v54 }
 0xf2a   :  { %3858 = vmatmul.mubr.msk.bf16.vlgmr.msra.gmra.mxu0 %vm820_vm3, %v2160_v59  ;;  %v4088_v59 = vld [vmem:[%s5209_s12 + $0x24] ss:$16 sps:$4 sm:$0xff]  }
 0xf2b   :  { %3877 = vmatprep.mubr.msk.bf16.mxu0 %vm4187_vm0, %v4186_v56  ;;  %3862 = vmatpush3.bf16.msra.mxu0 %v4042_v60  ;;  %v4091_v60 = vld [vmem:[%s5209_s12 + $0x2c] ss:$16 sps:$4 sm:$0xff]  }
 0xf2c   :  { %3863 = vmatprep.subr.bf16.mxu0 %v4186_v56  ;;  %2572 = vmatpush1.bf16.msra.mxu1 %v4080_v57 }
 0xf2d   :  { %2573 = vmatprep.subr.bf16.mxu1 %v4088_v59 }
 0xf2f   :  { %3864 = vmatpush3.bf16.msra.mxu0 %v4043_v19  ;;  %v4191_v19 = vmov 0  }
 0xf30   :  { %3865 = vmatprep.subr.bf16.mxu0 %v4186_v56  ;;  %2593 = vmatprep.mubr.bf16.mxu1 %v4191_v19 }
 0xf33   :  { %3866 = vmatpush3.bf16.msra.mxu0 %v4044_v24  ;;  %v4086_v24 = vld [vmem:[%s5209_s12 + $0x20] ss:$16 sps:$4 sm:$0xff]  }
 0xf34   :  { %3867 = vmatprep.subr.bf16.mxu0 %v4186_v56  ;;  %2574 = vmatpush1.bf16.msra.mxu1 %v4086_v24 }
 0xf37   :  { %3868 = vmatpush3.bf16.msra.mxu0 %v4045_v28  ;;  %v4089_v28 = vld [vmem:[%s5209_s12 + $0x28] ss:$16 sps:$4 sm:$0xff]  }
 0xf38   :  { %3869 = vmatprep.subr.bf16.mxu0 %v4186_v56 }
 0xf3b   :  { %3870 = vmatpush3.bf16.msra.mxu0 %v4046_v61  ;;  %v4094_v61 = vld [vmem:[%s5209_s12 + $0x4] ss:$16 sps:$4 sm:$0xff]  }
 0xf3c   :  { %3871 = vmatprep.subr.bf16.mxu0 %v4186_v56  ;;  %2575 = vmatprep.subr.bf16.mxu1 %v4094_v61 }
 0xf3f   :  { %3872 = vmatpush3.bf16.msra.mxu0 %v4047_v62  ;;  %v4097_v62 = vld [vmem:[%s5209_s12 + $0xc] ss:$16 sps:$4 sm:$0xff]  }
 0xf40   :  { %3873 = vmatprep.subr.bf16.mxu0 %v4186_v56 }
 0xf43   :  { %3874 = vmatpush3.bf16.msra.mxu0 %v4048_v63  ;;  %v4092_v63 = vld [vmem:[%s5209_s12] ss:$16 sps:$4 sm:$0xff]  }
 0xf44   :  { %3875 = vmatprep.subr.bf16.mxu0 %v4186_v56  ;;  %2576 = vmatpush1.bf16.msra.mxu1 %v4092_v63 }
 0xf47   :  { %3876 = vmatpush3.bf16.msra.mxu0 %v4049_v0  ;;  %v4095_v0 = vld [vmem:[%s5209_s12 + $0x8] ss:$16 sps:$4 sm:$0xff]  }
 0xf48   :  { %2604 = vmatprep.subr.bf16.mxu0 %v4055_v22  ;;  %v4106_v22 = vld [vmem:[%s5211_s13 + $0x58] sm:$0xff]  }
 0xfea   :  { %v2199_v2 = vpop.f32.mrf.mxu0 }
 0xfec   :  { %v3859_v6 = vpop.f32.mrf.mxu0 }
 0xfee   :  { %v2202_v8 = vpop.f32.mrf.mxu0 }
 0xfef   :  { %v3917_v11 = vpack.i.bf16 %v2202_v8, %v2199_v2 }
 0xff0   :  { %v3860_v13 = vpop.f32.mrf.mxu0 }
 0xff1   :  { %3918 = vrot.lane.b32.xlu1 %v3917_v11, %s4190_s18 }
0x1063   :  { %v3919_v1 = vpop.permute.xlu1 %3918 }
0x1064   :  { %v3921_v33 = vunpack.i.h.bf16 %v3919_v1  ;;  %v3920_v34 = vunpack.i.l.bf16 %v3919_v1 }
0x1066   :  { %v2237_v37 = vsel %vm2235_vm6, %v2234_v29, %v3921_v33  ;;  %v2236_v38 = vsel %vm2235_vm6, %v2233_v36, %v3920_v34  ;;  %v4098_v29 = vld [vmem:[%s5211_s13 + $0x78] sm:$0xff]  }
0x1067   :  { %v2254_v39 = vpack.c.bf16 %v2237_v37, %v2236_v38  ;;  %v4099_v36 = vld [vmem:[%s5211_s13 + $0x38] sm:$0xff]   ;;  %3522 = vmatprep.subr.bf16.mxu1 %v4098_v29  ;;  %v4100_v37 = vld [vmem:[%s5211_s13 + $0x70] sm:$0xff]  }
0x1068   :  { %v4101_v38 = vld [vmem:[%s5211_s13 + $0x30] sm:$0xff]  }
0x1069   :  { %3878 = vmatmul.mubr.bf16.vlgmr.msra.gmra.mxu0 %v2254_v39  ;;  %v4102_v39 = vld [vmem:[%s5211_s13 + $0x68] sm:$0xff]  }
0x106a   :  { %2605 = vmatpush1.bf16.msra.mxu0 %v4053_v20  ;;  %2636 = vmatprep.mubr.bf16.mxu0 %v4191_v19  ;;  %v4105_v20 = vld [vmem:[%s5211_s13 + $0x20] sm:$0xff]  }
0x1129   :  { %v2337_v9 = vpop.f32.mrf.mxu0 }
0x112a   :  { %v5005_v10 = vadd.f32 %v2337_v9, %v4406_v26  ;;  %v4061_v26 = vld [vmem:[%s5209_s12 + $0xcc] ss:$16 sps:$4 sm:$0xff]  }
0x112b   :  { %v3879_v12 = vpop.f32.mrf.mxu0  ;;  %2606 = vmatprep.subr.bf16.mxu0 %v4061_v26  ;;  %v4107_v9 = vld [vmem:[%s5211_s13 + $0x18] sm:$0xff]  }
0x112c   :  { %v2347_v14 = vmul.f32 %v5005_v10, %v5005_v10  ;;  %v4108_v12 = vld [vmem:[%s5211_s13 + $0x50] sm:$0xff]  }
0x112d   :  { %v2340_v15 = vpop.f32.mrf.mxu0 }
0x112e   :  { %v5010_v40 = vadd.f32 %v2340_v15, %v4408_v27  ;;  %2349 = vadd.xlane.f32.xlu1 %v2347_v14  ;;  %v4059_v27 = vld [vmem:[%s5209_s12 + $0xc8] ss:$16 sps:$4 sm:$0xff]   ;;  %v4109_v14 = vld [vmem:[%s5211_s13 + $0x10] sm:$0xff]  }
0x112f   :  { %v3880_v41 = vpop.f32.mrf.mxu0  ;;  %2607 = vmatpush1.bf16.msra.mxu0 %v4059_v27  ;;  %v4110_v15 = vld [vmem:[%s5211_s13 + $0x48] sm:$0xff]  }
0x1130   :  { %v2348_v42 = vmul.f32 %v5010_v40, %v5010_v40  ;;  %2608 = vmatprep.subr.bf16.mxu0 %v4067_v46  ;;  %v4111_v41 = vld [vmem:[%s5211_s13 + $0x8] sm:$0xff]  }
0x1132   :  { %2351 = vadd.xlane.f32.xlu0 %v2348_v42  ;;  %v4112_v42 = vld [vmem:[%s5211_s13 + $0x40] sm:$0xff]  }
0x1133   :  { %2609 = vmatpush1.bf16.msra.mxu0 %v4065_v48 }
0x1134   :  { %2610 = vmatprep.subr.bf16.mxu0 %v4073_v49 }
0x1137   :  { %2611 = vmatpush1.bf16.msra.mxu0 %v4071_v51 }
0x1138   :  { %2612 = vmatprep.subr.bf16.mxu0 %v4079_v25 }
0x113b   :  { %2613 = vmatpush1.bf16.msra.mxu0 %v4077_v23 }
0x113c   :  { %2614 = vmatprep.subr.bf16.mxu0 %v4085_v55 }
0x113f   :  { %2615 = vmatpush1.bf16.msra.mxu0 %v4083_v58 }
0x1140   :  { %2616 = vmatprep.subr.bf16.mxu0 %v4091_v60 }
0x1143   :  { %2617 = vmatpush1.bf16.msra.mxu0 %v4089_v28 }
0x1144   :  { %2618 = vmatprep.subr.bf16.mxu0 %v4097_v62 }
0x1147   :  { %2619 = vmatpush1.bf16.msra.mxu0 %v4095_v0 }
0x1148   :  { %3881 = vmatprep.subr.bf16.mxu0 %v4186_v56 }
0x11b7   :  { %v2350_v2 = vpop.xlane.xlu1 %2349 }
0x11b8   :  { %v2353_v6 = vmul.f32 0.0078125, %v2350_v2 }
0x11ba   :  { %v2355_v8 = vadd.f32 1e-06, %v2353_v6 }
0x11bb   :  { %v2352_v11 = vpop.xlane.xlu0 %2351 }
0x11bc   :  { %4162 = vrsqrt.f32 %v2355_v8  ;;  %v2354_v13 = vmul.f32 0.0078125, %v2352_v11 }
0x11be   :  { %v2356_v16 = vadd.f32 1e-06, %v2354_v13 }
0x11c0   :  { %4164 = vrsqrt.f32 %v2356_v16 }
0x11c9   :  { %v4163_v21 = vpop.eup %4162 }
0x11ca   :  { %v2359_v30 = vmul.f32 %v4163_v21, %v5005_v10 }
0x11cc   :  { %v2366_v5 = vmul.f32 %v2365_v32, %v2359_v30 }
0x11cd   :  { %v4165_v1 = vpop.eup %4164 }
0x11ce   :  { %v2360_v4 = vmul.f32 %v4165_v1, %v5010_v40 }
0x11d0   :  { %v2367_v33 = vmul.f32 %v2365_v32, %v2360_v4 }
0x11d2   :  { %v2400_v34 = vpack.c.bf16 %v2367_v33, %v2366_v5 }
0x11d4   :  { %2594 = vmatmul.mubr.bf16.vlgmr.msra.gmra.mxu1 %v2400_v34  ;;  %2637 = vmatmul.mubr.bf16.vlgmr.msra.gmra.mxu0 %v2400_v34 }
0x11d5   :  { %3897 = vmatprep.mubr.msk.bf16.mxu0 %vm4187_vm0, %v4186_v56  ;;  %3523 = vmatpush3.bf16.msra.mxu1 %v4099_v36  ;;  %v4115_v36 = vld [vmem:[%s5212_s15 + $0x30] sm:$0xff]  }
0x11d6   :  { %3524 = vmatprep.subr.bf16.mxu1 %v4100_v37  ;;  %3882 = vmatpush3.bf16.msra.mxu0 %v4114_v17  ;;  %v4116_v37 = vld [vmem:[%s5212_s15 + $0x28] sm:$0xff]  }
0x11d7   :  { %3883 = vmatprep.subr.bf16.mxu0 %v4186_v56 }
0x11d9   :  { %3525 = vmatpush3.bf16.msra.mxu1 %v4101_v38  ;;  %v4119_v38 = vld [vmem:[%s5212_s15 + $0x10] sm:$0xff]  }
0x11da   :  { %3526 = vmatprep.subr.bf16.mxu1 %v4102_v39  ;;  %3884 = vmatpush3.bf16.msra.mxu0 %v4115_v36  ;;  %v4120_v39 = vld [vmem:[%s5212_s15 + $0x8] sm:$0xff]  }
0x11db   :  { %3885 = vmatprep.subr.bf16.mxu0 %v4186_v56 }
0x11dd   :  { %3527 = vmatpush3.bf16.msra.mxu1 %v4103_v7  ;;  %v4121_v7 = vld [vmem:[%s5212_s15] sm:$0xff]  }
0x11de   :  { %3528 = vmatprep.subr.bf16.mxu1 %v4104_v3  ;;  %3886 = vmatpush3.bf16.msra.mxu0 %v4116_v37 }
0x11df   :  { %3887 = vmatprep.subr.bf16.mxu0 %v4186_v56 }
0x11e1   :  { %3529 = vmatpush3.bf16.msra.mxu1 %v4105_v20 }
0x11e2   :  { %3530 = vmatprep.subr.bf16.mxu1 %v4106_v22 }
0x11e5   :  { %3531 = vmatpush3.bf16.msra.mxu1 %v4107_v9 }
0x11e6   :  { %3532 = vmatprep.subr.bf16.mxu1 %v4108_v12 }
0x11e9   :  { %3533 = vmatpush3.bf16.msra.mxu1 %v4109_v14 }
0x11ea   :  { %3534 = vmatprep.subr.bf16.mxu1 %v4110_v15  ;;  %v2852_v15 = vld [vmem:[%s5213_s14] sm:$0x1] }
0x11ed   :  { %3535 = vmatpush3.bf16.msra.mxu1 %v4111_v41  ;;  %v2867_v41 = vunpack.c.l.bf16 %v2852_v15 }
0x11ee   :  { %3536 = vmatprep.subr.bf16.mxu1 %v4112_v42 }
0x11f1   :  { %3537 = vmatpush3.bf16.msra.mxu1 %v4113_v43 }
0x1294   :  { %v2595_v26 = vpop.f32.mrf.mxu1  ;;  %v2638_v55 = vpop.f32.mrf.mxu0 }
0x1295   :  { %v3330_v44 = vmul.f32 -1.442695, %v2595_v26 }
0x1296   :  { %v2597_v27 = vpop.f32.mrf.mxu1  ;;  %v2640_v57 = vpop.f32.mrf.mxu0 }
0x1297   :  { %4166 = vpow2.f32 %v3330_v44  ;;  %v3331_v45 = vmul.f32 -1.442695, %v2597_v27 }
0x1298   :  { %v2599_v46 = vpop.f32.mrf.mxu1  ;;  %v2642_v19 = vpop.f32.mrf.mxu0 }
0x1299   :  { %4168 = vpow2.f32 %v3331_v45  ;;  %v3332_v47 = vmul.f32 -1.442695, %v2599_v46 }
0x129a   :  { %v2601_v48 = vpop.f32.mrf.mxu1  ;;  %v2644_v2 = vpop.f32.mrf.mxu0 }
0x129b   :  { %4170 = vpow2.f32 %v3332_v47  ;;  %v3333_v31 = vmul.f32 -1.442695, %v2601_v48 }
0x129d   :  { %4172 = vpow2.f32 %v3333_v31 }
0x12a4   :  { %v4167_v49 = vpop.eup %4166 }
0x12a5   :  { %v2659_v51 = vadd.f32 1.0, %v4167_v49 }
0x12a6   :  { %v4169_v50 = vpop.eup %4168 }
0x12a7   :  { %v2660_v52 = vadd.f32 1.0, %v4169_v50 }
0x12a8   :  { %v4171_v53 = vpop.eup %4170 }
0x12a9   :  { %4174 = vrcp.f32 %v2660_v52  ;;  %v2661_v23 = vadd.f32 1.0, %v4171_v53 }
0x12aa   :  { %v4173_v25 = vpop.eup %4172  ;;  %4176 = vrcp.f32 %v2659_v51 }
0x12ab   :  { %4178 = vrcp.f32 %v2661_v23  ;;  %v2662_v54 = vadd.f32 1.0, %v4173_v25 }
0x12ad   :  { %4180 = vrcp.f32 %v2662_v54 }
0x12b6   :  { %v4175_v58 = vpop.eup %4174 }
0x12b7   :  { %v4177_v59 = vpop.eup %4176  ;;  %v2672_v24 = vmul.f32 %v4175_v58, %v2597_v27 }
0x12b8   :  { %v4179_v60 = vpop.eup %4178  ;;  %v2671_v62 = vmul.f32 %v4177_v59, %v2595_v26  ;;  %v2871_v26 = vrot.slane %v2867_v41, %v4338_v35 }
0x12b9   :  { %v2673_v28 = vmul.f32 %v4179_v60, %v2599_v46  ;;  %v2676_v6 = vmul.f32 %v2672_v24, %v2640_v57 }
0x12ba   :  { %v4181_v61 = vpop.eup %4180  ;;  %v2675_v11 = vmul.f32 %v2671_v62, %v2638_v55 }
0x12bb   :  { %v2674_v63 = vmul.f32 %v4181_v61, %v2601_v48  ;;  %v2677_v0 = vmul.f32 %v2673_v28, %v2642_v19 }
0x12bd   :  { %v2678_v8 = vmul.f32 %v2674_v63, %v2644_v2  ;;  %v2711_v16 = vpack.c.bf16 %v2677_v0, %v2675_v11 }
0x12bf   :  { %v2712_v13 = vpack.c.bf16 %v2678_v8, %v2676_v6 }
0x12c1   :  { %2841 = vmatprep.mubr.bf16.mxu1 %v2712_v13 }
0x12c2   :  { %2842 = vmatmul.mubr.bf16.vlgmr.msra.gmra.mxu1 %v2711_v16 }
0x1382   :  { %v3538_v18 = vpop.f32.mrf.mxu1 }
0x1384   :  { %v3539_v21 = vpop.f32.mrf.mxu1 }
0x1385   :  { %v3540_v30 = vadd.f32 %v3539_v21, %v3538_v18 }
0x1386   :  { %v3541_v32 = vpop.f32.mrf.mxu1 }
0x1387   :  { %v2850_v1 = vadd.f32 %v3540_v30, %v5005_v10  ;;  %v4117_v10 = vld [vmem:[%s5212_s15 + $0x20] sm:$0xff]  }
0x1388   :  { %v3542_v4 = vpop.f32.mrf.mxu1  ;;  %3888 = vmatpush3.bf16.msra.mxu0 %v4117_v10 }
0x1389   :  { %v3543_v5 = vadd.f32 %v3542_v4, %v3541_v32  ;;  %v2853_v33 = vmul.f32 %v2850_v1, %v2850_v1  ;;  %3889 = vmatprep.subr.bf16.mxu0 %v4186_v56 }
0x138b   :  { %v2851_v34 = vadd.f32 %v3543_v5, %v5010_v40  ;;  %2855 = vadd.xlane.f32.xlu0 %v2853_v33  ;;  %v4118_v40 = vld [vmem:[%s5212_s15 + $0x18] sm:$0xff]  }
0x138c   :  { %3890 = vmatpush3.bf16.msra.mxu0 %v4118_v40 }
0x138d   :  { %v2854_v29 = vmul.f32 %v2851_v34, %v2851_v34  ;;  %3891 = vmatprep.subr.bf16.mxu0 %v4186_v56 }
0x138f   :  { %2857 = vadd.xlane.f32.xlu0 %v2854_v29 }
0x1390   :  { %3892 = vmatpush3.bf16.msra.mxu0 %v4119_v38 }
0x1391   :  { %3893 = vmatprep.subr.bf16.mxu0 %v4186_v56 }
0x1394   :  { %3894 = vmatpush3.bf16.msra.mxu0 %v4120_v39 }
0x1395   :  { %3895 = vmatprep.subr.bf16.mxu0 %v4186_v56 }
0x1398   :  { %3896 = vmatpush3.bf16.msra.mxu0 %v4121_v7 }
0x1414   :  { %v2856_v3 = vpop.xlane.xlu0 %2855 }
0x1415   :  { %v2859_v20 = vmul.f32 0.0078125, %v2856_v3 }
0x1417   :  { %v2861_v22 = vadd.f32 1e-06, %v2859_v20 }
0x1418   :  { %v2858_v9 = vpop.xlane.xlu0 %2857 }
0x1419   :  { %4182 = vrsqrt.f32 %v2861_v22  ;;  %v2860_v12 = vmul.f32 0.0078125, %v2858_v9 }
0x141b   :  { %v2862_v14 = vadd.f32 1e-06, %v2860_v12 }
0x141d   :  { %4184 = vrsqrt.f32 %v2862_v14 }
0x1426   :  { %v4183_v42 = vpop.eup %4182 }
0x1427   :  { %v2865_v43 = vmul.f32 %v4183_v42, %v2850_v1 }
0x1429   :  { %v2872_v27 = vmul.f32 %v2871_v26, %v2865_v43 }
0x142a   :  { %v4185_v44 = vpop.eup %4184 }
0x142b   :  { %v2866_v56 = vmul.f32 %v4185_v44, %v2851_v34 }
0x142d   :  { %v2873_v45 = vmul.f32 %v2871_v26, %v2866_v56 }
0x142f   :  { %v2890_v46 = vpack.c.bf16 %v2873_v45, %v2872_v27 }
0x1431   :  { %3898 = vmatmul.mubr.bf16.vlgmr.msra.gmra.mxu0 %v2890_v46 }
0x14f1   :  { %v2973_v47 = vpop.f32.mrf.mxu0 }
0x14f2   :  { %2980 = vst [vmem:[%s5214_s16] sm:$0xff] %v2973_v47 }
0x14f3   :  { %v3899_v48 = vpop.f32.mrf.mxu0 }
0x14f5   :  { %v2976_v31 = vpop.f32.mrf.mxu0 }
0x14f6   :  { %2981 = vst [vmem:[%s5214_s16 + $0x8] sm:$0xff] %v2976_v31 }
0x14f7   :  { %v3900_v49 = vpop.f32.mrf.mxu0 }

</bundles_post_ra>
